<compile_context>
chip_gen: v6e
topology: v6e:2x2x1
jax: 0.10.0
libtpu: 0.0.40
codegen_flags: <defaults>
</compile_context>

<pallas_src>
import functools

import jax
import jax.numpy as jnp
import numpy as np
from jax.experimental import pallas as pl
from jax.experimental.pallas import tpu as pltpu

IGNORE_LABEL = 255
EPS = 1e-12  # F.normalize eps


def _loss_kernel(feat_ref, labels_ref, m_ref, loss_ref, count_ref, *,
                 n_rows, tile_m):
    """Per-tile partial cross-entropy sum and valid-pixel count."""
    feat = feat_ref[...].astype(jnp.float32)                  # (TM, A)
    labels = labels_ref[...]                                  # (TM, 1) int32

    # Single fused MXU matmul: feat @ M,  M = (sum_k Pn_k^T @ W_k) * 2/(K+1).
    raw = jnp.dot(feat, m_ref[...], preferred_element_type=jnp.float32)   # (TM, C)

    # L2 normalization folded into a post-matmul per-row scale (EUP rsqrt).
    # rsqrt(max(ss, EPS^2)) == 1 / max(||f||, EPS)  (matches F.normalize).
    ss = jnp.sum(feat * feat, axis=1, keepdims=True)          # (TM, 1)
    inv_norm = jax.lax.rsqrt(jnp.maximum(ss, EPS * EPS))
    hw_logits = raw * inv_norm                                # (TM, C)

    # Cross-entropy per row (mean reduction finished in the wrapper).
    row_max = jnp.max(hw_logits, axis=1, keepdims=True)
    lse = jnp.log(jnp.sum(jnp.exp(hw_logits - row_max), axis=1,
                          keepdims=True)) + row_max           # (TM, 1)
    cls_iota = jax.lax.broadcasted_iota(jnp.int32, hw_logits.shape, 1)
    onehot = (cls_iota == labels).astype(jnp.float32)
    correct = jnp.sum(hw_logits * onehot, axis=1, keepdims=True)
    per_row = lse - correct                                   # (TM, 1)

    # Valid = not-ignored AND inside the real (un-padded) row range (ragged tail mask).
    row_idx = (pl.program_id(0) * tile_m
               + jax.lax.broadcasted_iota(jnp.int32, labels.shape, 0))
    valid = jnp.logical_and(labels != IGNORE_LABEL, row_idx < n_rows)

    part_loss = jnp.sum(jnp.where(valid, per_row, 0.0))
    part_count = jnp.sum(valid.astype(jnp.float32))

    # (1, 8, 128) aligned partial-sum tiles -> grid axis can stay 'parallel'.
    loss_ref[...] = jnp.full(loss_ref.shape, part_loss, jnp.float32)
    count_ref[...] = jnp.full(count_ref.shape, part_count, jnp.float32)


def hard_prototype_contrastive_loss(proto_aug_num, Proto1, Proto2, feat, labels,
                                    tile_m=2048):
    """proto_aug_num: static int K; Proto1: (K, C, A); Proto2: (C, A);
    feat: (N, A); labels: (N,) int (255 = ignore)."""
    K = int(proto_aug_num)
    C, A = Proto2.shape

    # TODO(synk): Proto1[i].update(x=Proto2) (EMA prototype update) is an external,
    # stateful op undefined in this module; Proto1 is taken as the post-update bank.

    P1 = Proto1.astype(jnp.float32)
    P2 = Proto2.astype(jnp.float32)
    eye = jnp.eye(C, dtype=jnp.float32)

    def _row_normalize(p):
        return p / jnp.maximum(jnp.linalg.norm(p, axis=1, keepdims=True), EPS)

    # Tiny (C x A)/(C x C) prototype-only preprocessing stays in plain JAX.
    # Algebraic fusion of the per-k loop into one (A, C) matrix M, including the
    # /(proto_aug_num + 1) and /0.5 scalings.
    p2_fro = jnp.linalg.norm(P2)
    M = jnp.zeros((A, C), jnp.float32)
    hw_sum = jnp.zeros((C, C), jnp.float32)
    for i in range(K):
        # loss_calc_cosin2: matmul / (frobenius norms)
        S = (P1[i] @ P2.T) / (jnp.linalg.norm(P1[i]) * p2_fro)
        hw = jnp.abs(eye - S)
        hw_sum = hw_sum + hw
        M = M + _row_normalize(P1[i]).T @ hw
    M = M + _row_normalize(P2).T @ (hw_sum / K)     # mean hard weight for Proto2 term
    M = M * (2.0 / (K + 1))                         # folds /(K+1) and /0.5

    N = feat.shape[0]
    labels2 = labels.astype(jnp.int32).reshape(N, 1)

    # Large streaming tile; no HBM pad copy — last (partial) tile is masked in-kernel.
    tile_m = max(8, (int(tile_m) // 8) * 8)
    tile_m_eff = N if N <= tile_m else tile_m
    grid = pl.cdiv(N, tile_m_eff)

    kernel = functools.partial(_loss_kernel, n_rows=N, tile_m=tile_m_eff)
    loss_parts, count_parts = pl.pallas_call(
        kernel,
        out_shape=(jax.ShapeDtypeStruct((grid, 8, 128), jnp.float32),
                   jax.ShapeDtypeStruct((grid, 8, 128), jnp.float32)),
        grid_spec=pltpu.PrefetchScalarGridSpec(
            num_scalar_prefetch=0,
            grid=(grid,),
            in_specs=[
                pl.BlockSpec((tile_m_eff, A), lambda i: (i, 0)),   # feat (native dtype)
                pl.BlockSpec((tile_m_eff, 1), lambda i: (i, 0)),   # labels
                pl.BlockSpec((A, C), lambda i: (0, 0)),            # fused proto matrix
            ],
            out_specs=(pl.BlockSpec((1, 8, 128), lambda i: (i, 0, 0)),
                       pl.BlockSpec((1, 8, 128), lambda i: (i, 0, 0))),
        ),
        compiler_params=pltpu.CompilerParams(
            dimension_semantics=("parallel",)),
    )(feat, labels2, M)

    loss_sum = jnp.sum(loss_parts[:, 0, 0])
    count = jnp.sum(count_parts[:, 0, 0])
    # Note: count == 0 (every pixel ignored) yields NaN, same as the PyTorch reference.
    return loss_sum / count


def reference_loss(K, Proto1, Proto2, feat, labels):
    """Pure-JAX replica of the PyTorch forward (eager, dynamic-shape masking)."""
    mask = labels != IGNORE_LABEL
    feat = feat[mask]
    labels = labels[mask]
    feat = feat / jnp.maximum(jnp.linalg.norm(feat, axis=1, keepdims=True), EPS)
    C = Proto2.shape[0]
    I = jnp.eye(C, dtype=jnp.float32)
    hard_weights = jnp.zeros((C, C), jnp.float32)
    hwl = jnp.zeros((feat.shape[0], C), jnp.float32)
    for i in range(K):
        S = (Proto1[i] @ Proto2.T) / (jnp.linalg.norm(Proto1[i]) * jnp.linalg.norm(Proto2))
        hw = jnp.abs(I - S)
        hard_weights = hard_weights + hw
        Pa = Proto1[i] / jnp.maximum(jnp.linalg.norm(Proto1[i], axis=1, keepdims=True), EPS)
        hwl = hwl + (feat @ Pa.T) @ hw
    hard_weights = hard_weights / K
    P2n = Proto2 / jnp.maximum(jnp.linalg.norm(Proto2, axis=1, keepdims=True), EPS)
    hwl = hwl + (feat @ P2n.T) @ hard_weights
    hwl = hwl / (K + 1) / 0.5
    lse = jax.scipy.special.logsumexp(hwl, axis=1)
    correct = hwl[jnp.arange(hwl.shape[0]), labels]
    return jnp.mean(lse - correct)


if __name__ == "__main__":
    key = jax.random.PRNGKey(0)
    k1, k2, k3, k4 = jax.random.split(key, 4)

    proto_aug_num = 3
    C = 19        # number of classes (hard-coded via torch.eye(19) in the original)
    A = 32        # feature dim
    B, H, W = 2, 16, 16
    N = B * H * W  # feat is (BHW, A)

    Proto1 = jax.random.normal(k1, (proto_aug_num, C, A), dtype=jnp.float32)
    Proto2 = jax.random.normal(k2, (C, A), dtype=jnp.float32)
    feat = jax.random.normal(k3, (N, A), dtype=jnp.float32)
    labels = jax.random.randint(k4, (N,), 0, C, dtype=jnp.int32)
    # sprinkle some ignore labels
    labels = labels.at[::17].set(IGNORE_LABEL)

    ref = reference_loss(proto_aug_num, Proto1, Proto2, feat, labels)

    # Single-tile path (N <= tile_m).
    loss = hard_prototype_contrastive_loss(proto_aug_num, Proto1, Proto2, feat, labels)
    loss = jax.block_until_ready(loss)
    np.testing.assert_allclose(np.asarray(loss), np.asarray(ref), rtol=2e-5, atol=2e-5)

    # Multi-tile path with a ragged, in-kernel-masked tail (tile_m=120 -> grid=5).
    loss2 = hard_prototype_contrastive_loss(proto_aug_num, Proto1, Proto2, feat, labels,
                                            tile_m=120)
    loss2 = jax.block_until_ready(loss2)
    np.testing.assert_allclose(np.asarray(loss2), np.asarray(ref), rtol=2e-5, atol=2e-5)

    print("KERNEL_OK")
</pallas_src>

<mosaic_0001>
module attributes {stable_mosaic.version = 11 : i64} {
  func.func @_loss_kernel(%arg0: i32, %arg1: memref<512x32xf32, #tpu.memory_space<vmem>>, %arg2: memref<512x1xi32, #tpu.memory_space<vmem>>, %arg3: memref<32x19xf32, #tpu.memory_space<vmem>>, %arg4: memref<1x8x128xf32, #tpu.memory_space<vmem>>, %arg5: memref<1x8x128xf32, #tpu.memory_space<vmem>>) attributes {dimension_semantics = [#tpu.dimension_semantics<parallel>], iteration_bounds = array<i64: 1>, scalar_prefetch = 0 : i64, scratch_operands = 0 : i64, tpu.core_type = #tpu.core_type<tc>, window_params = [{transform_indices = @transform_0, window_bounds = array<i64: 512, 32>}, {transform_indices = @transform_1, window_bounds = array<i64: 512, 1>}, {pipeline_mode = #tpu.pipeline_mode<synchronous>, transform_indices = @transform_2, window_bounds = array<i64: 32, 19>}, {transform_indices = @transform_3, window_bounds = array<i64: 1, 8, 128>}, {transform_indices = @transform_4, window_bounds = array<i64: 1, 8, 128>}]} {
    %c0 = arith.constant 0 : index
    %c0_0 = arith.constant 0 : index
    %0 = vector.load %arg1[%c0, %c0_0] : memref<512x32xf32, #tpu.memory_space<vmem>>, vector<512x32xf32>
    %c0_1 = arith.constant 0 : index
    %c0_2 = arith.constant 0 : index
    %1 = vector.load %arg2[%c0_1, %c0_2] : memref<512x1xi32, #tpu.memory_space<vmem>>, vector<512x1xi32>
    %c0_3 = arith.constant 0 : index
    %c0_4 = arith.constant 0 : index
    %2 = vector.load %arg3[%c0_3, %c0_4] : memref<32x19xf32, #tpu.memory_space<vmem>>, vector<32x19xf32>
    %cst = arith.constant dense<0.000000e+00> : vector<512x19xf32>
    %3 = tpu.matmul %0, %2, %cst {dimension_numbers = #tpu.dot_dimension_numbers<[1], [0], [0], [1], [0, 0, 1, 1], [], []>} : vector<512x32xf32>, vector<32x19xf32>, vector<512x19xf32> -> vector<512x19xf32>
    %4 = arith.mulf %0, %0 : vector<512x32xf32>
    %cst_5 = arith.constant dense<0.000000e+00> : vector<512xf32>
    %5 = vector.multi_reduction <add>, %4, %cst_5 [1] : vector<512x32xf32> to vector<512xf32>
    %6 = vector.shape_cast %5 : vector<512xf32> to vector<512x1xf32>
    %cst_6 = arith.constant 1.000000e-24 : f32
    %7 = vector.broadcast %cst_6 : f32 to vector<512x1xf32>
    %8 = arith.maximumf %6, %7 : vector<512x1xf32>
    %9 = math.rsqrt %8 : vector<512x1xf32>
    %10 = vector.broadcast %9 : vector<512x1xf32> to vector<512x19xf32>
    %11 = arith.mulf %3, %10 : vector<512x19xf32>
    %cst_7 = arith.constant dense<0xFF800000> : vector<512xf32>
    %12 = vector.multi_reduction <maximumf>, %11, %cst_7 [1] : vector<512x19xf32> to vector<512xf32>
    %13 = vector.shape_cast %12 : vector<512xf32> to vector<512x1xf32>
    %14 = vector.broadcast %13 : vector<512x1xf32> to vector<512x19xf32>
    %15 = arith.subf %11, %14 : vector<512x19xf32>
    %16 = math.exp %15 : vector<512x19xf32>
    %cst_8 = arith.constant dense<0.000000e+00> : vector<512xf32>
    %17 = vector.multi_reduction <add>, %16, %cst_8 [1] : vector<512x19xf32> to vector<512xf32>
    %18 = vector.shape_cast %17 : vector<512xf32> to vector<512x1xf32>
    %19 = math.log %18 : vector<512x1xf32>
    %20 = arith.addf %19, %13 : vector<512x1xf32>
    %21 = tpu.iota {dimensions = array<i32: 1>} : vector<512x19xi32>
    %22 = vector.broadcast %1 : vector<512x1xi32> to vector<512x19xi32>
    %23 = arith.cmpi eq, %21, %22 : vector<512x19xi32>
    %24 = arith.extui %23 : vector<512x19xi1> to vector<512x19xi32>
    %25 = arith.sitofp %24 : vector<512x19xi32> to vector<512x19xf32>
    %26 = arith.mulf %11, %25 : vector<512x19xf32>
    %cst_9 = arith.constant dense<0.000000e+00> : vector<512xf32>
    %27 = vector.multi_reduction <add>, %26, %cst_9 [1] : vector<512x19xf32> to vector<512xf32>
    %28 = vector.shape_cast %27 : vector<512xf32> to vector<512x1xf32>
    %29 = arith.subf %20, %28 : vector<512x1xf32>
    %c512_i32 = arith.constant 512 : i32
    %30 = arith.muli %arg0, %c512_i32 : i32
    %31 = tpu.iota {dimensions = array<i32: 0>} : vector<512x1xi32>
    %32 = vector.broadcast %30 : i32 to vector<512x1xi32>
    %33 = arith.addi %32, %31 : vector<512x1xi32>
    %c255_i32 = arith.constant 255 : i32
    %34 = vector.broadcast %c255_i32 : i32 to vector<512x1xi32>
    %35 = arith.cmpi ne, %1, %34 : vector<512x1xi32>
    %c512_i32_10 = arith.constant 512 : i32
    %36 = vector.broadcast %c512_i32_10 : i32 to vector<512x1xi32>
    %37 = arith.cmpi slt, %33, %36 : vector<512x1xi32>
    %38 = arith.andi %35, %37 : vector<512x1xi1>
    %cst_11 = arith.constant 0.000000e+00 : f32
    %39 = vector.broadcast %cst_11 : f32 to vector<512x1xf32>
    %40 = arith.select %38, %29, %39 : vector<512x1xi1>, vector<512x1xf32>
    %41 = vector.shape_cast %40 : vector<512x1xf32> to vector<1x512x1xf32>
    %cst_12 = arith.constant dense<0.000000e+00> : vector<1xf32>
    %42 = vector.multi_reduction <add>, %41, %cst_12 [1, 2] : vector<1x512x1xf32> to vector<1xf32>
    %43 = vector.shape_cast %42 : vector<1xf32> to vector<1x1x1xf32>
    %44 = vector.extract %43[0, 0, 0] : f32 from vector<1x1x1xf32>
    %45 = arith.extui %38 : vector<512x1xi1> to vector<512x1xi32>
    %46 = arith.sitofp %45 : vector<512x1xi32> to vector<512x1xf32>
    %47 = vector.shape_cast %46 : vector<512x1xf32> to vector<1x512x1xf32>
    %cst_13 = arith.constant dense<0.000000e+00> : vector<1xf32>
    %48 = vector.multi_reduction <add>, %47, %cst_13 [1, 2] : vector<1x512x1xf32> to vector<1xf32>
    %49 = vector.shape_cast %48 : vector<1xf32> to vector<1x1x1xf32>
    %50 = vector.extract %49[0, 0, 0] : f32 from vector<1x1x1xf32>
    %51 = vector.broadcast %44 : f32 to vector<1x8x128xf32>
    %c0_14 = arith.constant 0 : index
    %c0_15 = arith.constant 0 : index
    %c0_16 = arith.constant 0 : index
    %52 = vector.load %arg4[%c0_14, %c0_15, %c0_16] : memref<1x8x128xf32, #tpu.memory_space<vmem>>, vector<1x8x128xf32>
    tpu.vector_store %arg4[%c0_14, %c0_15, %c0_16], %51 {strides = array<i32>} : memref<1x8x128xf32, #tpu.memory_space<vmem>>, vector<1x8x128xf32>,
    %53 = vector.broadcast %50 : f32 to vector<1x8x128xf32>
    %c0_17 = arith.constant 0 : index
    %c0_18 = arith.constant 0 : index
    %c0_19 = arith.constant 0 : index
    %54 = vector.load %arg5[%c0_17, %c0_18, %c0_19] : memref<1x8x128xf32, #tpu.memory_space<vmem>>, vector<1x8x128xf32>
    tpu.vector_store %arg5[%c0_17, %c0_18, %c0_19], %53 {strides = array<i32>} : memref<1x8x128xf32, #tpu.memory_space<vmem>>, vector<1x8x128xf32>,
    return
  }
  func.func @transform_0(%arg0: i32) -> (i32, i32) {
    %c0_i32 = arith.constant 0 : i32
    %c0_i32_0 = arith.constant 0 : i32
    return %arg0, %c0_i32 : i32, i32
  }
  func.func @transform_1(%arg0: i32) -> (i32, i32) {
    %c0_i32 = arith.constant 0 : i32
    %c0_i32_0 = arith.constant 0 : i32
    return %arg0, %c0_i32 : i32, i32
  }
  func.func @transform_2(%arg0: i32) -> (i32, i32) {
    %c0_i32 = arith.constant 0 : i32
    %c0_i32_0 = arith.constant 0 : i32
    %c0_i32_1 = arith.constant 0 : i32
    return %c0_i32, %c0_i32_0 : i32, i32
  }
  func.func @transform_3(%arg0: i32) -> (i32, i32, i32) {
    %c0_i32 = arith.constant 0 : i32
    %c0_i32_0 = arith.constant 0 : i32
    %c0_i32_1 = arith.constant 0 : i32
    return %arg0, %c0_i32, %c0_i32_0 : i32, i32, i32
  }
  func.func @transform_4(%arg0: i32) -> (i32, i32, i32) {
    %c0_i32 = arith.constant 0 : i32
    %c0_i32_0 = arith.constant 0 : i32
    %c0_i32_1 = arith.constant 0 : i32
    return %arg0, %c0_i32, %c0_i32_0 : i32, i32, i32
  }
}

</mosaic_0001>

<bundles_post_ra>
// kernel: tpu_custom_call.1
= control target key start
LH: loop header
LB: loop body
LE: loop exit
PB: predicated region body
PF: predicated region fallthrough
CT: control target
= control target key end

     0   :  { %10 = vsyncpa [#allocation3], 0  ;;  %vm150_vm0 = vcmask 261120   ;;  %s7154_s0 = inlined_call_operand.vmem [shape: f32[512,32], index: 0, kind: input, shape index: {}]   ;;  %s7155_s1 = inlined_call_operand.vmem [shape: s32[512,1], index: 1, kind: input, shape index: {}]   ;;  %s7156_s2 = inlined_call_operand.vmem [shape: f32[32,19], index: 2, kind: input, shape index: {}]   ;;  %s7157_s3 = inlined_call_operand.hbm [shape: f32[1,8,128], index: 3, kind: output, shape index: {0}]   ;;  %s7158_s4 = inlined_call_operand.hbm [shape: f32[1,8,128], index: 4, kind: output, shape index: {1}]  }
   0x1   :  { %v149_v0 = vld [vmem:[%s7156_s2 + $0x18] sm:$0xff]  ;;  %v148_v1 = vld [vmem:[%s7156_s2 + $0x10] sm:$0xff]  ;;  %v18_v4 = vld [vmem:[%s7154_s0] sm:$0xff] }
   0x2   :  { %v20_v2 = vld [vmem:[%s7154_s0 + $0x10] sm:$0xff]  ;;  %3731 = vmatprep.subr.mxu0 %v149_v0  ;;  %v147_v5 = vld [vmem:[%s7156_s2 + $0x8] sm:$0xff]  ;;  %3835 = vmatprep.subr.mxu1 %v149_v0  ;;  %v728_v6 = vmul.f32 %v18_v4, %v18_v4  ;;  %v21_v7 = vld [vmem:[%s7154_s0 + $0x18] sm:$0xff] }
   0x3   :  { %v730_v3 = vmul.f32 %v20_v2, %v20_v2  ;;  %3732 = vmatpush3.msra.mxu0 %v149_v0  ;;  %v19_v8 = vld [vmem:[%s7154_s0 + $0x8] sm:$0xff]  ;;  %3739 = vmatprep.mubr.msk.f32.mxu0 %vm150_vm0, %v18_v4  ;;  %v731_v11 = vmul.f32 %v21_v7, %v21_v7  ;;  %v22_v13 = vld [vmem:[%s7154_s0 + $0x20] sm:$0xff]  ;;  %v25_v20 = vld [vmem:[%s7154_s0 + $0x38] sm:$0xff] }
   0x4   :  { %v23_v9 = vld [vmem:[%s7154_s0 + $0x28] sm:$0xff]  ;;  %3733 = vmatprep.subr.mxu0 %v148_v1  ;;  %v729_v12 = vmul.f32 %v19_v8, %v19_v8  ;;  %3839 = vmatpush3.msra.mxu1 %v149_v0  ;;  %v792_v14 = vsel %vm150_vm0, %v728_v6, 0.0  ;;  %v146_v15 = vld [vmem:[%s7156_s2] sm:$0xff]  ;;  %v732_v19 = vmul.f32 %v22_v13, %v22_v13  ;;  %v24_v21 = vld [vmem:[%s7154_s0 + $0x30] sm:$0xff]  ;;  %v735_v24 = vmul.f32 %v25_v20, %v25_v20 }
   0x5   :  { %v798_v10 = vsel %vm150_vm0, %v730_v3, 0.0  ;;  %3734 = vmatpush3.msra.mxu0 %v148_v1  ;;  %793 = vadd.xlane.f32.xlu0 %v792_v14  ;;  %v801_v16 = vsel %vm150_vm0, %v731_v11, 0.0  ;;  %v733_v17 = vmul.f32 %v23_v9, %v23_v9  ;;  %v4383_v22 = vld [vmem:[%s7154_s0 + $0x100] sm:$0xff]  ;;  %v734_v26 = vmul.f32 %v24_v21, %v24_v21  ;;  %v27_v27 = vld [vmem:[%s7154_s0 + $0x48] sm:$0xff]  ;;  %v4407_v32 = vld [vmem:[%s7154_s0 + $0x110] sm:$0xff] }
   0x6   :  { %799 = vadd.xlane.f32.xlu1 %v798_v10  ;;  %3735 = vmatprep.subr.mxu0 %v147_v5  ;;  %v795_v18 = vsel %vm150_vm0, %v729_v12, 0.0  ;;  %v804_v25 = vsel %vm150_vm0, %v732_v19, 0.0  ;;  %v26_v28 = vld [vmem:[%s7154_s0 + $0x40] sm:$0xff]  ;;  %v4400_v29 = vld [vmem:[%s7154_s0 + $0x108] sm:$0xff]  ;;  %v813_v30 = vsel %vm150_vm0, %v735_v24, 0.0  ;;  %v737_v31 = vmul.f32 %v27_v27, %v27_v27  ;;  %v29_v35 = vld [vmem:[%s7154_s0 + $0x58] sm:$0xff] }
   0x7   :  { %3736 = vmatpush3.msra.mxu0 %v147_v5  ;;  %3836 = vmatprep.subr.mxu1 %v148_v1  ;;  %v807_v23 = vsel %vm150_vm0, %v733_v17, 0.0  ;;  %v810_v33 = vsel %vm150_vm0, %v734_v26, 0.0  ;;  %v736_v34 = vmul.f32 %v26_v28, %v26_v28  ;;  %v28_v36 = vld [vmem:[%s7154_s0 + $0x50] sm:$0xff]  ;;  %v4424_v37 = vld [vmem:[%s7154_s0 + $0x118] sm:$0xff]  ;;  %v739_v39 = vmul.f32 %v29_v35, %v29_v35  ;;  %v4431_v40 = vld [vmem:[%s7154_s0 + $0x120] sm:$0xff] }
   0x8   :  { %3737 = vmatprep.subr.mxu0 %v146_v15  ;;  %3840 = vmatpush3.msra.mxu1 %v148_v1  ;;  %v819_v38 = vsel %vm150_vm0, %v737_v31, 0.0  ;;  %v738_v42 = vmul.f32 %v28_v36, %v28_v36  ;;  %v31_v43 = vld [vmem:[%s7154_s0 + $0x68] sm:$0xff]  ;;  %v30_v44 = vld [vmem:[%s7154_s0 + $0x60] sm:$0xff]  ;;  %v4455_v48 = vld [vmem:[%s7154_s0 + $0x130] sm:$0xff] }
   0x9   :  { %3738 = vmatpush3.msra.mxu0 %v146_v15  ;;  %796 = vadd.xlane.f32.xlu0 %v795_v18  ;;  %v816_v41 = vsel %vm150_vm0, %v736_v34, 0.0  ;;  %v4448_v45 = vld [vmem:[%s7154_s0 + $0x128] sm:$0xff]  ;;  %v825_v46 = vsel %vm150_vm0, %v739_v39, 0.0  ;;  %v741_v47 = vmul.f32 %v31_v43, %v31_v43  ;;  %v740_v50 = vmul.f32 %v30_v44, %v30_v44  ;;  %v33_v51 = vld [vmem:[%s7154_s0 + $0x78] sm:$0xff]  ;;  %v32_v52 = vld [vmem:[%s7154_s0 + $0x70] sm:$0xff] }
   0xa   :  { %802 = vadd.xlane.f32.xlu1 %v801_v16  ;;  %3740 = vmatmul.mubr.msk.f32.vlgmr.msra.gmra.mxu0 %vm150_vm0, %v19_v8  ;;  %v822_v49 = vsel %vm150_vm0, %v738_v42, 0.0 }
   0xb   :  { %3742 = vmatprep.mubr.msk.f32.mxu0 %vm150_vm0, %v20_v2  ;;  %3837 = vmatprep.subr.mxu1 %v147_v5 }
   0xc   :  { %3841 = vmatpush3.msra.mxu1 %v147_v5  ;;  %3787 = vmatprep.mubr.msk.f32.mxu1 %vm150_vm0, %v4383_v22 }
   0xd   :  { %3838 = vmatprep.subr.mxu1 %v146_v15  ;;  %805 = vadd.xlane.f32.xlu0 %v804_v25 }
   0xe   :  { %808 = vadd.xlane.f32.xlu1 %v807_v23  ;;  %3743 = vmatmul.mubr.msk.f32.gmra.mxu0 %vm150_vm0, %v21_v7 }
   0xf   :  { %3745 = vmatprep.mubr.msk.f32.mxu0 %vm150_vm0, %v22_v13  ;;  %3842 = vmatpush3.msra.mxu1 %v146_v15 }
  0x10   :  { %3788 = vmatmul.mubr.msk.f32.vlgmr.msra.gmra.mxu1 %vm150_vm0, %v4400_v29 }
  0x11   :  { %3790 = vmatprep.mubr.msk.f32.mxu1 %vm150_vm0, %v4407_v32  ;;  %811 = vadd.xlane.f32.xlu0 %v810_v33 }
  0x12   :  { %814 = vadd.xlane.f32.xlu1 %v813_v30  ;;  %3746 = vmatmul.mubr.msk.f32.gmra.mxu0 %vm150_vm0, %v23_v9 }
  0x13   :  { %3748 = vmatprep.mubr.msk.f32.mxu0 %vm150_vm0, %v24_v21 }
  0x14   :  { %3791 = vmatmul.mubr.msk.f32.gmra.mxu1 %vm150_vm0, %v4424_v37 }
  0x15   :  { %3793 = vmatprep.mubr.msk.f32.mxu1 %vm150_vm0, %v4431_v40  ;;  %817 = vadd.xlane.f32.xlu0 %v816_v41 }
  0x16   :  { %820 = vadd.xlane.f32.xlu1 %v819_v38  ;;  %3749 = vmatmul.mubr.msk.f32.gmra.mxu0 %vm150_vm0, %v25_v20 }
  0x17   :  { %3751 = vmatprep.mubr.msk.f32.mxu0 %vm150_vm0, %v26_v28 }
  0x18   :  { %3794 = vmatmul.mubr.msk.f32.gmra.mxu1 %vm150_vm0, %v4448_v45 }
  0x19   :  { %11 = vsyncpa [#allocation5], 0  ;;  %3796 = vmatprep.mubr.msk.f32.mxu1 %vm150_vm0, %v4455_v48  ;;  %v4472_v53 = vld [vmem:[%s7154_s0 + $0x138] sm:$0xff]  ;;  %823 = vadd.xlane.f32.xlu0 %v822_v49  ;;  %v831_v54 = vsel %vm150_vm0, %v741_v47, 0.0  ;;  %v743_v55 = vmul.f32 %v33_v51, %v33_v51  ;;  %v4479_v56 = vld [vmem:[%s7154_s0 + $0x140] sm:$0xff]  ;;  %v828_v57 = vsel %vm150_vm0, %v740_v50, 0.0  ;;  %v742_v58 = vmul.f32 %v32_v52, %v32_v52 }
  0x1a   :  { %826 = vadd.xlane.f32.xlu1 %v825_v46  ;;  %3752 = vmatmul.mubr.msk.f32.gmra.mxu0 %vm150_vm0, %v27_v27  ;;  %v35_v59 = vld [vmem:[%s7154_s0 + $0x88] sm:$0xff]  ;;  %v34_v60 = vld [vmem:[%s7154_s0 + $0x80] sm:$0xff]  ;;  %v4503_v0 = vld [vmem:[%s7154_s0 + $0x150] sm:$0xff]  ;;  %vm1176_vm1 = vcmask 154624   ;;  %vm3038_vm13 = vcmask 7168   ;;  %s4313_s8 = smov [#allocation4]  }
  0x1b   :  { %3754 = vmatprep.mubr.msk.f32.mxu0 %vm150_vm0, %v28_v36  ;;  %v4496_v61 = vld [vmem:[%s7154_s0 + $0x148] sm:$0xff]  ;;  %v837_v62 = vsel %vm150_vm0, %v743_v55, 0.0  ;;  %v745_v63 = vmul.f32 %v35_v59, %v35_v59  ;;  %v834_v1 = vsel %vm150_vm0, %v742_v58, 0.0  ;;  %v744_v2 = vmul.f32 %v34_v60, %v34_v60  ;;  %v37_v3 = vld [vmem:[%s7154_s0 + $0x98] sm:$0xff]  ;;  %v36_v4 = vld [vmem:[%s7154_s0 + $0x90] sm:$0xff]  ;;  %s3459_s9 = sshll.u32 %s4313_s8, 4  ;;  %s3460_s9 = int_to_ptr.vmem [resolvable:$true] %s3459_s9 }
  0x1c   :  { %3797 = vmatmul.mubr.msk.f32.gmra.mxu1 %vm150_vm0, %v4472_v53  ;;  %v4520_v5 = vld [vmem:[%s7154_s0 + $0x158] sm:$0xff]  ;;  %v747_v7 = vmul.f32 %v37_v3, %v37_v3  ;;  %v4527_v8 = vld [vmem:[%s7154_s0 + $0x160] sm:$0xff]  ;;  %v746_v10 = vmul.f32 %v36_v4, %v36_v4  ;;  %v39_v11 = vld [vmem:[%s7154_s0 + $0xa8] sm:$0xff] }
  0x1d   :  { %3799 = vmatprep.mubr.msk.f32.mxu1 %vm150_vm0, %v4479_v56  ;;  %829 = vadd.xlane.f32.xlu0 %v828_v57  ;;  %v843_v6 = vsel %vm150_vm0, %v745_v63, 0.0  ;;  %v840_v9 = vsel %vm150_vm0, %v744_v2, 0.0  ;;  %v38_v12 = vld [vmem:[%s7154_s0 + $0xa0] sm:$0xff]  ;;  %v4544_v13 = vld [vmem:[%s7154_s0 + $0x168] sm:$0xff]  ;;  %v749_v15 = vmul.f32 %v39_v11, %v39_v11  ;;  %v4551_v16 = vld [vmem:[%s7154_s0 + $0x170] sm:$0xff] }
  0x1e   :  { %832 = vadd.xlane.f32.xlu1 %v831_v54  ;;  %3755 = vmatmul.mubr.msk.f32.gmra.mxu0 %vm150_vm0, %v29_v35  ;;  %v849_v14 = vsel %vm150_vm0, %v747_v7, 0.0  ;;  %v846_v17 = vsel %vm150_vm0, %v746_v10, 0.0  ;;  %v748_v18 = vmul.f32 %v38_v12, %v38_v12  ;;  %v41_v19 = vld [vmem:[%s7154_s0 + $0xb8] sm:$0xff]  ;;  %v40_v20 = vld [vmem:[%s7154_s0 + $0xb0] sm:$0xff]  ;;  %v4575_v25 = vld [vmem:[%s7154_s0 + $0x180] sm:$0xff]  ;;  %v761_v10 = vmul.f32 %v4400_v29, %v4400_v29 }
  0x1f   :  { %3757 = vmatprep.mubr.msk.f32.mxu0 %vm150_vm0, %v30_v44  ;;  %v4568_v21 = vld [vmem:[%s7154_s0 + $0x178] sm:$0xff]  ;;  %v855_v23 = vsel %vm150_vm0, %v749_v15, 0.0  ;;  %v751_v24 = vmul.f32 %v41_v19, %v41_v19  ;;  %v750_v27 = vmul.f32 %v40_v20, %v40_v20  ;;  %v43_v28 = vld [vmem:[%s7154_s0 + $0xc8] sm:$0xff]  ;;  %v42_v30 = vld [vmem:[%s7154_s0 + $0xc0] sm:$0xff]  ;;  %v763_v15 = vmul.f32 %v4424_v37, %v4424_v37 }
  0x20   :  { %3800 = vmatmul.mubr.msk.f32.gmra.mxu1 %vm150_vm0, %v4496_v61  ;;  %v852_v26 = vsel %vm150_vm0, %v748_v18, 0.0  ;;  %v4592_v31 = vld [vmem:[%s7154_s0 + $0x188] sm:$0xff]  ;;  %v753_v34 = vmul.f32 %v43_v28, %v43_v28  ;;  %v4599_v35 = vld [vmem:[%s7154_s0 + $0x190] sm:$0xff]  ;;  %v752_v38 = vmul.f32 %v42_v30, %v42_v30  ;;  %v45_v39 = vld [vmem:[%s7154_s0 + $0xd8] sm:$0xff] }
  0x21   :  { %3802 = vmatprep.mubr.msk.f32.mxu1 %vm150_vm0, %v4503_v0  ;;  %835 = vadd.xlane.f32.xlu0 %v834_v1  ;;  %v861_v33 = vsel %vm150_vm0, %v751_v24, 0.0  ;;  %v858_v36 = vsel %vm150_vm0, %v750_v27, 0.0  ;;  %v44_v41 = vld [vmem:[%s7154_s0 + $0xd0] sm:$0xff]  ;;  %v4616_v42 = vld [vmem:[%s7154_s0 + $0x198] sm:$0xff]  ;;  %v755_v44 = vmul.f32 %v45_v39, %v45_v39  ;;  %v4623_v46 = vld [vmem:[%s7154_s0 + $0x1a0] sm:$0xff] }
  0x22   :  { %838 = vadd.xlane.f32.xlu1 %v837_v62  ;;  %3758 = vmatmul.mubr.msk.f32.gmra.mxu0 %vm150_vm0, %v31_v43  ;;  %v867_v43 = vsel %vm150_vm0, %v753_v34, 0.0  ;;  %v864_v47 = vsel %vm150_vm0, %v752_v38, 0.0  ;;  %v754_v49 = vmul.f32 %v44_v41, %v44_v41  ;;  %v47_v50 = vld [vmem:[%s7154_s0 + $0xe8] sm:$0xff]  ;;  %v4647_v57 = vld [vmem:[%s7154_s0 + $0x1b0] sm:$0xff]  ;;  %v4664_v63 = vld [vmem:[%s7154_s0 + $0x1b8] sm:$0xff]  ;;  %v769_v34 = vmul.f32 %v4496_v61, %v4496_v61 }
  0x23   :  { %3760 = vmatprep.mubr.msk.f32.mxu0 %vm150_vm0, %v32_v52  ;;  %v4640_v52 = vld [vmem:[%s7154_s0 + $0x1a8] sm:$0xff]  ;;  %v873_v54 = vsel %vm150_vm0, %v755_v44, 0.0  ;;  %v757_v55 = vmul.f32 %v47_v50, %v47_v50  ;;  %v48_v62 = vld [vmem:[%s7154_s0 + $0xf0] sm:$0xff]  ;;  %v4704_v29 = vld [vmem:[%s7154_s0 + $0x1d8] sm:$0xff]  ;;  %v772_v44 = vmul.f32 %v4527_v8, %v4527_v8 }
  0x24   :  { %3803 = vmatmul.mubr.msk.f32.gmra.mxu1 %vm150_vm0, %v4520_v5  ;;  %v870_v58 = vsel %vm150_vm0, %v754_v49, 0.0  ;;  %v4682_v7 = vld [vmem:[%s7154_s0 + $0x1c8] sm:$0xff]  ;;  %v915_v38 = vsel %vm150_vm0, %v769_v34, 0.0  ;;  %v774_v49 = vmul.f32 %v4551_v16, %v4551_v16 }
  0x25   :  { %3805 = vmatprep.mubr.msk.f32.mxu1 %vm150_vm0, %v4527_v8  ;;  %841 = vadd.xlane.f32.xlu0 %v840_v9  ;;  %v879_v1 = vsel %vm150_vm0, %v757_v55, 0.0  ;;  %v4726_v37 = vld [vmem:[%s7154_s0 + $0x1e8] sm:$0xff]  ;;  %v778_v55 = vmul.f32 %v4599_v35, %v4599_v35 }
  0x26   :  { %844 = vadd.xlane.f32.xlu1 %v843_v6  ;;  %3761 = vmatmul.mubr.msk.f32.gmra.mxu0 %vm150_vm0, %v33_v51  ;;  %v46_v51 = vld [vmem:[%s7154_s0 + $0xe0] sm:$0xff]  ;;  %v758_v6 = vmul.f32 %v48_v62, %v48_v62  ;;  %v930_v8 = vsel %vm150_vm0, %v774_v49, 0.0 }
  0x27   :  { %3763 = vmatprep.mubr.msk.f32.mxu0 %vm150_vm0, %v34_v60  ;;  %v49_v60 = vld [vmem:[%s7154_s0 + $0xf8] sm:$0xff] }
  0x28   :  { %3806 = vmatmul.mubr.msk.f32.gmra.mxu1 %vm150_vm0, %v4544_v13  ;;  %v759_v2 = vmul.f32 %v49_v60, %v49_v60 }
  0x29   :  { %3808 = vmatprep.mubr.msk.f32.mxu1 %vm150_vm0, %v4551_v16  ;;  %847 = vadd.xlane.f32.xlu0 %v846_v17  ;;  %v4713_v17 = vld [vmem:[%s7154_s0 + $0x1e0] sm:$0xff] }
  0x2a   :  { %850 = vadd.xlane.f32.xlu1 %v849_v14  ;;  %3764 = vmatmul.mubr.msk.f32.gmra.mxu0 %vm150_vm0, %v35_v59  ;;  %v756_v59 = vmul.f32 %v46_v51, %v46_v51  ;;  %v885_v9 = vsel %vm150_vm0, %v759_v2, 0.0  ;;  %v882_v14 = vsel %vm150_vm0, %v758_v6, 0.0 }
  0x2b   :  { %3766 = vmatprep.mubr.msk.f32.mxu0 %vm150_vm0, %v36_v4 }
  0x2c   :  { %3809 = vmatmul.mubr.msk.f32.gmra.mxu1 %vm150_vm0, %v4568_v21  ;;  %v876_v4 = vsel %vm150_vm0, %v756_v59, 0.0  ;;  %v780_v59 = vmul.f32 %v4623_v46, %v4623_v46 }
  0x2d   :  { %3811 = vmatprep.mubr.msk.f32.mxu1 %vm150_vm0, %v4575_v25  ;;  %853 = vadd.xlane.f32.xlu0 %v852_v26  ;;  %v764_v26 = vmul.f32 %v4431_v40, %v4431_v40 }
  0x2e   :  { %856 = vadd.xlane.f32.xlu1 %v855_v23  ;;  %3767 = vmatmul.mubr.msk.f32.gmra.mxu0 %vm150_vm0, %v37_v3  ;;  %v4671_v3 = vld [vmem:[%s7154_s0 + $0x1c0] sm:$0xff]  ;;  %v4735_v23 = vld [vmem:[%s7154_s0 + $0x1f0] sm:$0xff] }
  0x2f   :  { %3769 = vmatprep.mubr.msk.f32.mxu0 %vm150_vm0, %v38_v12  ;;  %v760_v12 = vmul.f32 %v4383_v22, %v4383_v22  ;;  %v891_v22 = vsel %vm150_vm0, %v761_v10, 0.0  ;;  %v900_v40 = vsel %vm150_vm0, %v764_v26, 0.0  ;;  %v784_v2 = vmul.f32 %v4671_v3, %v4671_v3 }
  0x30   :  { %3812 = vmatmul.mubr.msk.f32.gmra.mxu1 %vm150_vm0, %v4592_v31  ;;  %v788_v10 = vmul.f32 %v4713_v17, %v4713_v17 }
  0x31   :  { %3814 = vmatprep.mubr.msk.f32.mxu1 %vm150_vm0, %v4599_v35  ;;  %859 = vadd.xlane.f32.xlu0 %v858_v36  ;;  %v888_v18 = vsel %vm150_vm0, %v760_v12, 0.0  ;;  %v948_v35 = vsel %vm150_vm0, %v780_v59, 0.0 }
  0x32   :  { %862 = vadd.xlane.f32.xlu1 %v861_v33  ;;  %3770 = vmatmul.mubr.msk.f32.gmra.mxu0 %vm150_vm0, %v39_v11  ;;  %v4691_v11 = vld [vmem:[%s7154_s0 + $0x1d0] sm:$0xff] }
  0x33   :  { %3772 = vmatprep.mubr.msk.f32.mxu0 %vm150_vm0, %v40_v20  ;;  %v897_v20 = vsel %vm150_vm0, %v763_v15, 0.0  ;;  %v786_v6 = vmul.f32 %v4691_v11, %v4691_v11 }
  0x34   :  { %3815 = vmatmul.mubr.msk.f32.gmra.mxu1 %vm150_vm0, %v4616_v42 }
  0x35   :  { %3817 = vmatprep.mubr.msk.f32.mxu1 %vm150_vm0, %v4623_v46  ;;  %865 = vadd.xlane.f32.xlu0 %v864_v47  ;;  %v775_v47 = vmul.f32 %v4568_v21, %v4568_v21 }
  0x36   :  { %868 = vadd.xlane.f32.xlu1 %v867_v43  ;;  %3773 = vmatmul.mubr.msk.f32.gmra.mxu0 %vm150_vm0, %v41_v19  ;;  %v762_v19 = vmul.f32 %v4407_v32, %v4407_v32  ;;  %v765_v32 = vmul.f32 %v4448_v45, %v4448_v45  ;;  %v4747_v45 = vld [vmem:[%s7154_s0 + $0x1f8] sm:$0xff]  ;;  %v773_v43 = vmul.f32 %v4544_v13, %v4544_v13 }
  0x37   :  { %3775 = vmatprep.mubr.msk.f32.mxu0 %vm150_vm0, %v42_v30  ;;  %v766_v30 = vmul.f32 %v4455_v48, %v4455_v48  ;;  %v771_v48 = vmul.f32 %v4520_v5, %v4520_v5  ;;  %v933_v13 = vsel %vm150_vm0, %v775_v47, 0.0 }
  0x38   :  { %3818 = vmatmul.mubr.msk.f32.gmra.mxu1 %vm150_vm0, %v4640_v52  ;;  %v894_v24 = vsel %vm150_vm0, %v762_v19, 0.0  ;;  %v903_v27 = vsel %vm150_vm0, %v765_v32, 0.0  ;;  %v927_v5 = vsel %vm150_vm0, %v773_v43, 0.0 }
  0x39   :  { %3820 = vmatprep.mubr.msk.f32.mxu1 %vm150_vm0, %v4647_v57  ;;  %871 = vadd.xlane.f32.xlu0 %v870_v58  ;;  %v906_v36 = vsel %vm150_vm0, %v766_v30, 0.0  ;;  %v921_v61 = vsel %vm150_vm0, %v771_v48, 0.0  ;;  %v781_v58 = vmul.f32 %v4640_v52, %v4640_v52 }
  0x3a   :  { %874 = vadd.xlane.f32.xlu1 %v873_v54  ;;  %3776 = vmatmul.mubr.msk.f32.gmra.mxu0 %vm150_vm0, %v43_v28  ;;  %v767_v28 = vmul.f32 %v4472_v53, %v4472_v53  ;;  %v768_v53 = vmul.f32 %v4479_v56, %v4479_v56  ;;  %v779_v54 = vmul.f32 %v4616_v42, %v4616_v42 }
  0x3b   :  { %3778 = vmatprep.mubr.msk.f32.mxu0 %vm150_vm0, %v44_v41  ;;  %v770_v41 = vmul.f32 %v4503_v0, %v4503_v0  ;;  %v924_v0 = vsel %vm150_vm0, %v772_v44, 0.0  ;;  %v951_v42 = vsel %vm150_vm0, %v781_v58, 0.0 }
  0x3c   :  { %3821 = vmatmul.mubr.msk.f32.gmra.mxu1 %vm150_vm0, %v4664_v63  ;;  %v909_v33 = vsel %vm150_vm0, %v767_v28, 0.0 }
  0x3d   :  { %3823 = vmatprep.mubr.msk.f32.mxu1 %vm150_vm0, %v4671_v3  ;;  %877 = vadd.xlane.f32.xlu0 %v876_v4  ;;  %v918_v56 = vsel %vm150_vm0, %v770_v41, 0.0  ;;  %v787_v4 = vmul.f32 %v4704_v29, %v4704_v29  ;;  %v966_v3 = vsel %vm150_vm0, %v786_v6, 0.0 }
  0x3e   :  { %880 = vadd.xlane.f32.xlu1 %v879_v1  ;;  %3779 = vmatmul.mubr.msk.f32.gmra.mxu0 %vm150_vm0, %v45_v39  ;;  %v912_v39 = vsel %vm150_vm0, %v768_v53, 0.0  ;;  %v785_v1 = vmul.f32 %v4682_v7, %v4682_v7 }
  0x3f   :  { %3781 = vmatprep.mubr.msk.f32.mxu0 %vm150_vm0, %v46_v51  ;;  %v776_v51 = vmul.f32 %v4575_v25, %v4575_v25  ;;  %v942_v25 = vsel %vm150_vm0, %v778_v55, 0.0 }
  0x40   :  { %3824 = vmatmul.mubr.msk.f32.gmra.mxu1 %vm150_vm0, %v4682_v7  ;;  %v969_v7 = vsel %vm150_vm0, %v787_v4, 0.0 }
  0x41   :  { %3826 = vmatprep.mubr.msk.f32.mxu1 %vm150_vm0, %v4691_v11  ;;  %883 = vadd.xlane.f32.xlu0 %v882_v14  ;;  %v936_v16 = vsel %vm150_vm0, %v776_v51, 0.0  ;;  %v791_v14 = vmul.f32 %v4747_v45, %v4747_v45  ;;  %v972_v11 = vsel %vm150_vm0, %v788_v10, 0.0 }
  0x42   :  { %886 = vadd.xlane.f32.xlu1 %v885_v9  ;;  %3782 = vmatmul.mubr.msk.f32.gmra.mxu0 %vm150_vm0, %v47_v50  ;;  %v777_v50 = vmul.f32 %v4592_v31, %v4592_v31  ;;  %v945_v31 = vsel %vm150_vm0, %v779_v54, 0.0  ;;  %v789_v9 = vmul.f32 %v4726_v37, %v4726_v37 }
  0x43   :  { %3784 = vmatprep.mubr.msk.f32.mxu0 %vm150_vm0, %v48_v62  ;;  %v782_v62 = vmul.f32 %v4647_v57, %v4647_v57  ;;  %v960_v57 = vsel %vm150_vm0, %v784_v2, 0.0 }
  0x44   :  { %3827 = vmatmul.mubr.msk.f32.gmra.mxu1 %vm150_vm0, %v4704_v29  ;;  %v939_v21 = vsel %vm150_vm0, %v777_v50, 0.0  ;;  %v975_v12 = vsel %vm150_vm0, %v789_v9, 0.0  ;;  %v790_v29 = vmul.f32 %v4735_v23, %v4735_v23 }
  0x45   :  { %3829 = vmatprep.mubr.msk.f32.mxu1 %vm150_vm0, %v4713_v17  ;;  %889 = vadd.xlane.f32.xlu0 %v888_v18  ;;  %v954_v46 = vsel %vm150_vm0, %v782_v62, 0.0 }
  0x46   :  { %892 = vadd.xlane.f32.xlu1 %v891_v22  ;;  %3785 = vmatmul.mubr.msk.f32.gmra.mxu0 %vm150_vm0, %v49_v60  ;;  %v783_v60 = vmul.f32 %v4664_v63, %v4664_v63  ;;  %v963_v63 = vsel %vm150_vm0, %v785_v1, 0.0  ;;  %v981_v22 = vsel %vm150_vm0, %v791_v14, 0.0  ;;  %v978_v15 = vsel %vm150_vm0, %v790_v29, 0.0 }
  0x48   :  { %3830 = vmatmul.mubr.msk.f32.gmra.mxu1 %vm150_vm0, %v4726_v37  ;;  %v957_v52 = vsel %vm150_vm0, %v783_v60, 0.0 }
  0x49   :  { %3832 = vmatprep.mubr.msk.f32.mxu1 %vm150_vm0, %v4735_v23  ;;  %895 = vadd.xlane.f32.xlu0 %v894_v24 }
  0x4a   :  { %898 = vadd.xlane.f32.xlu1 %v897_v20 }
  0x4c   :  { %3833 = vmatmul.mubr.msk.f32.gmra.mxu1 %vm150_vm0, %v4747_v45 }
  0x4d   :  { %901 = vadd.xlane.f32.xlu0 %v900_v40 }
  0x4e   :  { %904 = vadd.xlane.f32.xlu1 %v903_v27 }
  0x51   :  { %907 = vadd.xlane.f32.xlu0 %v906_v36 }
  0x52   :  { %910 = vadd.xlane.f32.xlu1 %v909_v33 }
  0x55   :  { %913 = vadd.xlane.f32.xlu0 %v912_v39 }
  0x56   :  { %916 = vadd.xlane.f32.xlu1 %v915_v38 }
  0x59   :  { %919 = vadd.xlane.f32.xlu0 %v918_v56 }
  0x5a   :  { %922 = vadd.xlane.f32.xlu1 %v921_v61 }
  0x5d   :  { %925 = vadd.xlane.f32.xlu0 %v924_v0 }
  0x5e   :  { %928 = vadd.xlane.f32.xlu1 %v927_v5 }
  0x61   :  { %931 = vadd.xlane.f32.xlu0 %v930_v8 }
  0x62   :  { %934 = vadd.xlane.f32.xlu1 %v933_v13 }
  0x65   :  { %937 = vadd.xlane.f32.xlu0 %v936_v16 }
  0x66   :  { %940 = vadd.xlane.f32.xlu1 %v939_v21 }
  0x69   :  { %943 = vadd.xlane.f32.xlu0 %v942_v25 }
  0x6a   :  { %946 = vadd.xlane.f32.xlu1 %v945_v31 }
  0x6d   :  { %949 = vadd.xlane.f32.xlu0 %v948_v35 }
  0x6e   :  { %952 = vadd.xlane.f32.xlu1 %v951_v42 }
  0x71   :  { %955 = vadd.xlane.f32.xlu0 %v954_v46 }
  0x72   :  { %958 = vadd.xlane.f32.xlu1 %v957_v52 }
  0x75   :  { %961 = vadd.xlane.f32.xlu0 %v960_v57 }
  0x76   :  { %964 = vadd.xlane.f32.xlu1 %v963_v63 }
  0x79   :  { %967 = vadd.xlane.f32.xlu0 %v966_v3 }
  0x7a   :  { %970 = vadd.xlane.f32.xlu1 %v969_v7 }
  0x7d   :  { %973 = vadd.xlane.f32.xlu0 %v972_v11 }
  0x7e   :  { %976 = vadd.xlane.f32.xlu1 %v975_v12 }
  0x81   :  { %979 = vadd.xlane.f32.xlu0 %v978_v15 }
  0x82   :  { %982 = vadd.xlane.f32.xlu1 %v981_v22 }
  0x8e   :  { %v794_v18 = vpop.xlane.xlu0 %793 }
  0x8f   :  { %v800_v17 = vpop.xlane.xlu1 %799  ;;  %v984_v43 = vmax.f32 %v794_v18, 1e-24 }
  0x90   :  { %v986_v52 = vmax.f32 %v800_v17, 1e-24 }
  0x92   :  { %v797_v37 = vpop.xlane.xlu0 %796 }
  0x93   :  { %v803_v19 = vpop.xlane.xlu1 %802  ;;  %v985_v41 = vmax.f32 %v797_v37, 1e-24 }
  0x94   :  { %v987_v42 = vmax.f32 %v803_v19, 1e-24 }
  0x95   :  { %3853 = vrsqrt.f32 %v985_v41 }
  0x96   :  { %v4833_v32 = vpop.xlane.xlu0 %805  ;;  %3855 = vrsqrt.f32 %v984_v43  ;;  %v4310_v43 = vmov 0  }
  0x97   :  { %v4831_v20 = vpop.xlane.xlu1 %808  ;;  %v988_v6 = vmax.f32 %v4833_v32, 1e-24  ;;  %3852 = vset.pattern.permute.xlu1 %v4310_v43  ;;  %3851 = vset.pattern.permute.xlu0 %v4310_v43 }
  0x98   :  { %v989_v57 = vmax.f32 %v4831_v20, 1e-24 }
  0x9a   :  { %v4837_v26 = vpop.xlane.xlu0 %811 }
  0x9b   :  { %v4835_v24 = vpop.xlane.xlu1 %814  ;;  %v990_v19 = vmax.f32 %v4837_v26, 1e-24 }
  0x9c   :  { %v991_v22 = vmax.f32 %v4835_v24, 1e-24 }
  0x9e   :  { %v4841_v45 = vpop.xlane.xlu0 %817 }
  0x9f   :  { %v4839_v23 = vpop.xlane.xlu1 %820 }
  0xa2   :  { %v4845_v28 = vpop.xlane.xlu0 %823  ;;  %v3854_v8 = vpop.eup %3853 }
  0xa3   :  { %v4843_v27 = vpop.xlane.xlu1 %826  ;;  %v3856_v51 = vpop.eup %3855 }
  0xa6   :  { %v4849_v30 = vpop.xlane.xlu0 %829 }
  0xa7   :  { %v4847_v40 = vpop.xlane.xlu1 %832 }
  0xaa   :  { %v4853_v34 = vpop.xlane.xlu0 %835 }
  0xab   :  { %v4851_v33 = vpop.xlane.xlu1 %838 }
  0xae   :  { %v4857_v53 = vpop.xlane.xlu0 %841 }
  0xaf   :  { %v4855_v36 = vpop.xlane.xlu1 %844 }
  0xb2   :  { %v4861_v48 = vpop.xlane.xlu0 %847 }
  0xb3   :  { %v4859_v38 = vpop.xlane.xlu1 %850 }
  0xb6   :  { %v4865_v61 = vpop.xlane.xlu0 %853 }
  0xb7   :  { %v4863_v39 = vpop.xlane.xlu1 %856 }
  0xba   :  { %v4869_v44 = vpop.xlane.xlu0 %859 }
  0xbb   :  { %v4867_v56 = vpop.xlane.xlu1 %862 }
  0xbe   :  { %v4873_v47 = vpop.xlane.xlu0 %865 }
  0xbf   :  { %v4871_v5 = vpop.xlane.xlu1 %868 }
  0xc2   :  { %v4877_v49 = vpop.xlane.xlu0 %871 }
  0xc3   :  { %v4875_v0 = vpop.xlane.xlu1 %874 }
  0xc6   :  { %v4881_v50 = vpop.xlane.xlu0 %877 }
  0xc7   :  { %v4879_v13 = vpop.xlane.xlu1 %880 }
  0xca   :  { %v3741_v54 = vpop.f32.mrf.mxu0  ;;  %v4885_v16 = vpop.xlane.xlu0 %883 }
  0xcb   :  { %v4883_v21 = vpop.xlane.xlu1 %886  ;;  %v4887_v55 = vmul.f32 %v3854_v8, %v3741_v54 }
  0xcc   :  { %v409_v31 = vpop.f32.mrf.mxu0 }
  0xcd   :  { %v4889_v58 = vmul.f32 %v3856_v51, %v409_v31  ;;  %v1180_v25 = vsel %vm1176_vm1, %v4887_v55, -inf }
  0xce   :  { %1181 = vmax.xlane.f32.xlu1 %v1180_v25  ;;  %v890_v35 = vpop.xlane.xlu0 %889  ;;  %v3744_v14 = vpop.f32.mrf.mxu0 }
  0xcf   :  { %7408 = vst [vmem:[#allocation8_spill] sm:$0xff] %v4889_v58  ;;  %v893_v59 = vpop.xlane.xlu1 %892  ;;  %v1177_v62 = vsel %vm1176_vm1, %v4889_v58, -inf  ;;  %v1016_v1 = vmax.f32 %v890_v35, 1e-24 }
  0xd0   :  { %v1017_v60 = vmax.f32 %v893_v59, 1e-24  ;;  %1178 = vmax.xlane.f32.xlu0 %v1177_v62  ;;  %v3789_v9 = vpop.f32.mrf.mxu1  ;;  %v419_v20 = vpop.f32.mrf.mxu0 }
  0xd2   :  { %3857 = vrsqrt.f32 %v1017_v60  ;;  %v896_v63 = vpop.xlane.xlu0 %895  ;;  %v569_v11 = vpop.f32.mrf.mxu1 }
  0xd3   :  { %3859 = vrsqrt.f32 %v1016_v1  ;;  %v899_v46 = vpop.xlane.xlu1 %898  ;;  %v1018_v4 = vmax.f32 %v896_v63, 1e-24  ;;  %v3747_v62 = vpop.f32.mrf.mxu0 }
  0xd4   :  { %3861 = vrsqrt.f32 %v987_v42  ;;  %v1019_v2 = vmax.f32 %v899_v46, 1e-24  ;;  %v3792_v15 = vpop.f32.mrf.mxu1 }
  0xd5   :  { %3863 = vrsqrt.f32 %v986_v52 }
  0xd6   :  { %3865 = vrsqrt.f32 %v1019_v2  ;;  %v902_v10 = vpop.xlane.xlu0 %901  ;;  %v579_v26 = vpop.f32.mrf.mxu1  ;;  %v993_v2 = vmax.f32 %v4839_v23, 1e-24 }
  0xd7   :  { %3867 = vrsqrt.f32 %v1018_v4  ;;  %v905_v7 = vpop.xlane.xlu1 %904  ;;  %v1020_v12 = vmax.f32 %v902_v10, 1e-24  ;;  %v429_v10 = vpop.f32.mrf.mxu0 }
  0xd8   :  { %v1021_v3 = vmax.f32 %v905_v7, 1e-24  ;;  %3869 = vrsqrt.f32 %v989_v57  ;;  %v3795_v4 = vpop.f32.mrf.mxu1  ;;  %v992_v7 = vmax.f32 %v4841_v45, 1e-24 }
  0xd9   :  { %3871 = vrsqrt.f32 %v988_v6 }
  0xda   :  { %3873 = vrsqrt.f32 %v1021_v3  ;;  %v908_v17 = vpop.xlane.xlu0 %907  ;;  %v589_v45 = vpop.f32.mrf.mxu1 }
  0xdb   :  { %3875 = vrsqrt.f32 %v1020_v12  ;;  %v911_v29 = vpop.xlane.xlu1 %910  ;;  %v1022_v54 = vmax.f32 %v908_v17, 1e-24 }
  0xdc   :  { %v1023_v41 = vmax.f32 %v911_v29, 1e-24  ;;  %3877 = vrsqrt.f32 %v991_v22 }
  0xdd   :  { %3879 = vrsqrt.f32 %v990_v19 }
  0xde   :  { %3881 = vrsqrt.f32 %v1023_v41  ;;  %v914_v57 = vpop.xlane.xlu0 %913  ;;  %v995_v41 = vmax.f32 %v4843_v27, 1e-24 }
  0xdf   :  { %v3858_v18 = vpop.eup %3857  ;;  %3883 = vrsqrt.f32 %v1022_v54  ;;  %v917_v46 = vpop.xlane.xlu1 %916  ;;  %v1024_v29 = vmax.f32 %v914_v57, 1e-24 }
  0xe0   :  { %v3860_v37 = vpop.eup %3859  ;;  %v4899_v32 = vmul.f32 %v3858_v18, %v3789_v9  ;;  %3885 = vrsqrt.f32 %v993_v2  ;;  %v3750_v18 = vpop.f32.mrf.mxu0 }
  0xe1   :  { %v3862_v8 = vpop.eup %3861  ;;  %v4901_v51 = vmul.f32 %v3860_v37, %v569_v11  ;;  %3887 = vrsqrt.f32 %v992_v7 }
  0xe2   :  { %7409 = vst [vmem:[#allocation9_spill] sm:$0xff] %v4899_v32  ;;  %v3864_v31 = vpop.eup %3863  ;;  %v4903_v24 = vmul.f32 %v3862_v8, %v3744_v14  ;;  %v1276_v25 = vsel %vm1176_vm1, %v4899_v32, -inf  ;;  %v1025_v14 = vmax.f32 %v917_v46, 1e-24  ;;  %v3798_v8 = vpop.f32.mrf.mxu1 }
  0xe3   :  { %7410 = vst [vmem:[#allocation10_spill] sm:$0xff] %v4901_v51  ;;  %v3866_v59 = vpop.eup %3865  ;;  %v4907_v42 = vmul.f32 %v3864_v31, %v419_v20  ;;  %1277 = vmax.xlane.f32.xlu1 %v1276_v25  ;;  %v1273_v60 = vsel %vm1176_vm1, %v4901_v51, -inf  ;;  %v923_v20 = vpop.xlane.xlu1 %922  ;;  %v994_v25 = vmax.f32 %v4845_v28, 1e-24 }
  0xe4   :  { %v3868_v35 = vpop.eup %3867  ;;  %1274 = vmax.xlane.f32.xlu0 %v1273_v60  ;;  %v4911_v52 = vmul.f32 %v3866_v59, %v3792_v15  ;;  %v1186_v63 = vsel %vm1176_vm1, %v4903_v24, -inf  ;;  %3889 = vrsqrt.f32 %v1025_v14  ;;  %v920_v54 = vpop.xlane.xlu0 %919 }
  0xe5   :  { %7411 = vst [vmem:[#allocation11_spill] sm:$0xff] %v4907_v42  ;;  %v4913_v1 = vmul.f32 %v3868_v35, %v579_v26  ;;  %v3870_v6 = vpop.eup %3869  ;;  %v1183_v9 = vsel %vm1176_vm1, %v4907_v42, -inf  ;;  %3891 = vrsqrt.f32 %v1024_v29  ;;  %v439_v60 = vpop.f32.mrf.mxu0  ;;  %v1026_v2 = vmax.f32 %v920_v54, 1e-24 }
  0xe6   :  { %7412 = vst [vmem:[#allocation12_spill] sm:$0xff] %v4911_v52  ;;  %v3872_v3 = vpop.eup %3871  ;;  %v1282_v12 = vsel %vm1176_vm1, %v4911_v52, -inf  ;;  %v4925_v15 = vmul.f32 %v3870_v6, %v3747_v62  ;;  %v1027_v62 = vmax.f32 %v923_v20, 1e-24  ;;  %3893 = vrsqrt.f32 %v995_v41  ;;  %v599_v28 = vpop.f32.mrf.mxu1 }
  0xe7   :  { %7413 = vst [vmem:[#allocation13_spill] sm:$0xff] %v4913_v1  ;;  %1187 = vmax.xlane.f32.xlu1 %v1186_v63  ;;  %v3874_v23 = vpop.eup %3873  ;;  %v1279_v11 = vsel %vm1176_vm1, %v4913_v1, -inf  ;;  %v4927_v17 = vmul.f32 %v3872_v3, %v429_v10  ;;  %3895 = vrsqrt.f32 %v994_v25  ;;  %v3753_v6 = vpop.f32.mrf.mxu0  ;;  %v997_v10 = vmax.f32 %v4847_v40, 1e-24 }
  0xe8   :  { %1184 = vmax.xlane.f32.xlu0 %v1183_v9  ;;  %v3876_v22 = vpop.eup %3875  ;;  %v4929_v19 = vmul.f32 %v3874_v23, %v3795_v4  ;;  %v1192_v43 = vsel %vm1176_vm1, %v4925_v15, -inf  ;;  %3897 = vrsqrt.f32 %v1027_v62  ;;  %v929_v3 = vpop.xlane.xlu1 %928  ;;  %v996_v29 = vmax.f32 %v4849_v30, 1e-24 }
  0xe9   :  { %v4931_v37 = vmul.f32 %v3876_v22, %v589_v45  ;;  %v3878_v31 = vpop.eup %3877  ;;  %v1189_v26 = vsel %vm1176_vm1, %v4927_v17, -inf  ;;  %3899 = vrsqrt.f32 %v1026_v2  ;;  %v3801_v14 = vpop.f32.mrf.mxu1  ;;  %v1029_v41 = vmax.f32 %v929_v3, 1e-24 }
  0xea   :  { %7414 = vst [vmem:[#allocation14_spill] sm:$0xff] %v4929_v19  ;;  %v3880_v59 = vpop.eup %3879  ;;  %v1288_v35 = vsel %vm1176_vm1, %v4929_v19, -inf  ;;  %v4943_v4 = vmul.f32 %v3878_v31, %v3750_v18  ;;  %v926_v23 = vpop.xlane.xlu0 %925  ;;  %3901 = vrsqrt.f32 %v997_v10  ;;  %v999_v62 = vmax.f32 %v4851_v33, 1e-24 }
  0xeb   :  { %1283 = vmax.xlane.f32.xlu1 %v1282_v12  ;;  %7415 = vst [vmem:[#allocation15_spill] sm:$0xff] %v4931_v37  ;;  %v3882_v27 = vpop.eup %3881  ;;  %v1285_v46 = vsel %vm1176_vm1, %v4931_v37, -inf  ;;  %v4945_v57 = vmul.f32 %v3880_v59, %v439_v60  ;;  %v449_v18 = vpop.f32.mrf.mxu0  ;;  %3903 = vrsqrt.f32 %v996_v29 }
  0xec   :  { %1280 = vmax.xlane.f32.xlu0 %v1279_v11  ;;  %v3884_v63 = vpop.eup %3883  ;;  %v4947_v7 = vmul.f32 %v3882_v27, %v3798_v8  ;;  %v1198_v12 = vsel %vm1176_vm1, %v4943_v4, -inf  ;;  %v1028_v8 = vmax.f32 %v926_v23, 1e-24  ;;  %v609_v30 = vpop.f32.mrf.mxu1  ;;  %3905 = vrsqrt.f32 %v1029_v41 }
  0xed   :  { %v4949_v9 = vmul.f32 %v3884_v63, %v599_v28  ;;  %v3886_v11 = vpop.eup %3885  ;;  %v1195_v22 = vsel %vm1176_vm1, %v4945_v57, -inf  ;;  %v998_v28 = vmax.f32 %v4853_v34, 1e-24 }
  0xee   :  { %v3888_v45 = vpop.eup %3887  ;;  %v1294_v20 = vsel %vm1176_vm1, %v4947_v7, -inf  ;;  %v4961_v31 = vmul.f32 %v3886_v11, %v3753_v6  ;;  %3907 = vrsqrt.f32 %v1028_v8  ;;  %v932_v2 = vpop.xlane.xlu0 %931 }
  0xef   :  { %1193 = vmax.xlane.f32.xlu1 %v1192_v43  ;;  %7416 = vst [vmem:[#allocation16_spill] sm:$0xff] %v4949_v9  ;;  %v1291_v43 = vsel %vm1176_vm1, %v4949_v9, -inf  ;;  %v4963_v25 = vmul.f32 %v3888_v45, %v449_v18  ;;  %v1030_v11 = vmax.f32 %v932_v2, 1e-24  ;;  %3909 = vrsqrt.f32 %v999_v62 }
  0xf0   :  { %1190 = vmax.xlane.f32.xlu0 %v1189_v26  ;;  %v3756_v26 = vpop.f32.mrf.mxu0  ;;  %v1204_v27 = vsel %vm1176_vm1, %v4961_v31, -inf  ;;  %3911 = vrsqrt.f32 %v998_v28 }
  0xf1   :  { %v3890_v40 = vpop.eup %3889  ;;  %v1201_v6 = vsel %vm1176_vm1, %v4963_v25, -inf }
  0xf2   :  { %v3892_v54 = vpop.eup %3891  ;;  %v4965_v59 = vmul.f32 %v3890_v40, %v3801_v14  ;;  %v459_v10 = vpop.f32.mrf.mxu0 }
  0xf3   :  { %1289 = vmax.xlane.f32.xlu1 %v1288_v35  ;;  %v4967_v60 = vmul.f32 %v3892_v54, %v609_v30  ;;  %v935_v35 = vpop.xlane.xlu1 %934  ;;  %v3894_v63 = vpop.eup %3893 }
  0xf4   :  { %1286 = vmax.xlane.f32.xlu0 %v1285_v46  ;;  %v3804_v46 = vpop.f32.mrf.mxu1  ;;  %v3896_v3 = vpop.eup %3895  ;;  %v1031_v14 = vmax.f32 %v935_v35, 1e-24  ;;  %v1000_v35 = vmax.f32 %v4857_v53, 1e-24 }
  0xf5   :  { %7417 = vst [vmem:[#allocation17_spill] sm:$0xff] %v4967_v60  ;;  %v3898_v33 = vpop.eup %3897  ;;  %v1297_v23 = vsel %vm1176_vm1, %v4967_v60, -inf  ;;  %v4981_v45 = vmul.f32 %v3896_v3, %v459_v10  ;;  %v3759_v18 = vpop.f32.mrf.mxu0 }
  0xf6   :  { %v3900_v29 = vpop.eup %3899  ;;  %v619_v34 = vpop.f32.mrf.mxu1  ;;  %3913 = vrsqrt.f32 %v1031_v14 }
  0xf7   :  { %1199 = vmax.xlane.f32.xlu1 %v1198_v12  ;;  %v1300_v12 = vsel %vm1176_vm1, %v4965_v59, -inf  ;;  %v4985_v41 = vmul.f32 %v3900_v29, %v619_v34  ;;  %3915 = vrsqrt.f32 %v1030_v11  ;;  %v941_v40 = vpop.xlane.xlu1 %940  ;;  %v938_v30 = vpop.xlane.xlu0 %937  ;;  %v1207_v62 = vsel %vm1176_vm1, %v4981_v45, -inf }
  0xf8   :  { %1196 = vmax.xlane.f32.xlu0 %v1195_v22  ;;  %v4979_v22 = vmul.f32 %v3894_v63, %v3756_v26  ;;  %v3807_v54 = vpop.f32.mrf.mxu1  ;;  %v3902_v26 = vpop.eup %3901  ;;  %v1033_v63 = vmax.f32 %v941_v40, 1e-24  ;;  %v1003_v29 = vmax.f32 %v4859_v38, 1e-24 }
  0xf9   :  { %7418 = vst [vmem:[#allocation18_spill] sm:$0xff] %v4985_v41  ;;  %v1303_v28 = vsel %vm1176_vm1, %v4985_v41, -inf  ;;  %v4997_v10 = vmul.f32 %v3902_v26, %v3759_v18 }
  0xfa   :  { %v1210_v8 = vsel %vm1176_vm1, %v4979_v22, -inf  ;;  %v629_v53 = vpop.f32.mrf.mxu1 }
  0xfb   :  { %1295 = vmax.xlane.f32.xlu1 %v1294_v20  ;;  %v4983_v20 = vmul.f32 %v3898_v33, %v3804_v46  ;;  %v469_v46 = vpop.f32.mrf.mxu0  ;;  %v947_v11 = vpop.xlane.xlu1 %946  ;;  %v1216_v34 = vsel %vm1176_vm1, %v4997_v10, -inf }
  0xfc   :  { %1292 = vmax.xlane.f32.xlu0 %v1291_v43  ;;  %v1001_v43 = vmax.f32 %v4855_v36, 1e-24  ;;  %v3810_v18 = vpop.f32.mrf.mxu1  ;;  %v944_v40 = vpop.xlane.xlu0 %943 }
  0xfd   :  { %v1306_v2 = vsel %vm1176_vm1, %v4983_v20, -inf  ;;  %v3762_v14 = vpop.f32.mrf.mxu0 }
  0xfe   :  { %3917 = vrsqrt.f32 %v1001_v43 }
  0xff   :  { %1205 = vmax.xlane.f32.xlu1 %v1204_v27  ;;  %v3904_v27 = vpop.eup %3903  ;;  %3919 = vrsqrt.f32 %v1000_v35  ;;  %v479_v26 = vpop.f32.mrf.mxu0 }
 0x100   :  { %1202 = vmax.xlane.f32.xlu0 %v1201_v6  ;;  %v3906_v36 = vpop.eup %3905  ;;  %v1032_v6 = vmax.f32 %v938_v30, 1e-24  ;;  %3921 = vrsqrt.f32 %v1033_v63 }
 0x101   :  { %v3908_v3 = vpop.eup %3907  ;;  %v5001_v33 = vmul.f32 %v3906_v36, %v3807_v54 }
 0x102   :  { %3923 = vrsqrt.f32 %v1032_v6  ;;  %v3910_v43 = vpop.eup %3909 }
 0x103   :  { %1301 = vmax.xlane.f32.xlu1 %v1300_v12  ;;  %v4999_v12 = vmul.f32 %v3904_v27, %v469_v46  ;;  %7419 = vst [vmem:[#allocation19_spill] sm:$0xff] %v5001_v33  ;;  %v3912_v30 = vpop.eup %3911  ;;  %v1312_v35 = vsel %vm1176_vm1, %v5001_v33, -inf  ;;  %v1034_v46 = vmax.f32 %v944_v40, 1e-24  ;;  %3925 = vrsqrt.f32 %v1003_v29 }
 0x104   :  { %1298 = vmax.xlane.f32.xlu0 %v1297_v23  ;;  %v5003_v23 = vmul.f32 %v3908_v3, %v629_v53  ;;  %v3914_v38 = vpop.eup %3913  ;;  %v5015_v63 = vmul.f32 %v3910_v43, %v3762_v14  ;;  %v5017_v36 = vmul.f32 %v3912_v30, %v479_v26  ;;  %v953_v53 = vpop.xlane.xlu1 %952  ;;  %v1004_v43 = vmax.f32 %v4865_v61, 1e-24 }
 0x105   :  { %v1213_v54 = vsel %vm1176_vm1, %v4999_v12, -inf  ;;  %v5019_v6 = vmul.f32 %v3914_v38, %v3810_v18  ;;  %v1037_v26 = vmax.f32 %v953_v53, 1e-24 }
 0x106   :  { %7420 = vst [vmem:[#allocation20_spill] sm:$0xff] %v5003_v23  ;;  %v1309_v27 = vsel %vm1176_vm1, %v5003_v23, -inf  ;;  %v1222_v14 = vsel %vm1176_vm1, %v5015_v63, -inf  ;;  %v1219_v18 = vsel %vm1176_vm1, %v5017_v36, -inf }
 0x107   :  { %1211 = vmax.xlane.f32.xlu1 %v1210_v8  ;;  %v1002_v8 = vmax.f32 %v4861_v48, 1e-24  ;;  %v639_v48 = vpop.f32.mrf.mxu1  ;;  %7421 = vst [vmem:[#allocation21_spill] sm:$0xff] %v5019_v6  ;;  %v1318_v30 = vsel %vm1176_vm1, %v5019_v6, -inf }
 0x108   :  { %1208 = vmax.xlane.f32.xlu0 %v1207_v62  ;;  %v1035_v62 = vmax.f32 %v947_v11, 1e-24  ;;  %v1005_v11 = vmax.f32 %v4863_v39, 1e-24 }
 0x109   :  { %3927 = vrsqrt.f32 %v1002_v8  ;;  %v3813_v29 = vpop.f32.mrf.mxu1 }
 0x10a   :  { %3929 = vrsqrt.f32 %v1035_v62 }
 0x10b   :  { %1307 = vmax.xlane.f32.xlu1 %v1306_v2  ;;  %v3916_v2 = vpop.eup %3915  ;;  %3931 = vrsqrt.f32 %v1034_v46  ;;  %v649_v61 = vpop.f32.mrf.mxu1 }
 0x10c   :  { %1304 = vmax.xlane.f32.xlu0 %v1303_v28  ;;  %v3765_v28 = vpop.f32.mrf.mxu0  ;;  %v5021_v3 = vmul.f32 %v3916_v2, %v639_v48  ;;  %v3918_v40 = vpop.eup %3917  ;;  %3933 = vrsqrt.f32 %v1005_v11 }
 0x10d   :  { %v3920_v8 = vpop.eup %3919  ;;  %3935 = vrsqrt.f32 %v1004_v43  ;;  %v3816_v11 = vpop.f32.mrf.mxu1 }
 0x10e   :  { %7422 = vst [vmem:[#allocation22_spill] sm:$0xff] %v5021_v3  ;;  %v3922_v39 = vpop.eup %3921  ;;  %3937 = vrsqrt.f32 %v1037_v26 }
 0x10f   :  { %1217 = vmax.xlane.f32.xlu1 %v1216_v34  ;;  %v950_v34 = vpop.xlane.xlu0 %949  ;;  %v3924_v38 = vpop.eup %3923  ;;  %v5037_v48 = vmul.f32 %v3922_v39, %v3813_v29 }
 0x110   :  { %1214 = vmax.xlane.f32.xlu0 %v1213_v54  ;;  %v489_v54 = vpop.f32.mrf.mxu0  ;;  %v1036_v62 = vmax.f32 %v950_v34, 1e-24  ;;  %v5039_v53 = vmul.f32 %v3924_v38, %v649_v61  ;;  %v1007_v34 = vmax.f32 %v4867_v56, 1e-24  ;;  %v3926_v43 = vpop.eup %3925 }
 0x111   :  { %v5035_v46 = vmul.f32 %v3920_v8, %v489_v54  ;;  %7423 = vst [vmem:[#allocation23_spill] sm:$0xff] %v5037_v48 }
 0x112   :  { %v3768_v2 = vpop.f32.mrf.mxu0  ;;  %7424 = vst [vmem:[#allocation24_spill] sm:$0xff] %v5039_v53  ;;  %3939 = vrsqrt.f32 %v1036_v62  ;;  %v1321_v39 = vsel %vm1176_vm1, %v5039_v53, -inf }
 0x113   :  { %1313 = vmax.xlane.f32.xlu1 %v1312_v35  ;;  %v1315_v35 = vsel %vm1176_vm1, %v5021_v3, -inf  ;;  %v1225_v29 = vsel %vm1176_vm1, %v5035_v46, -inf  ;;  %3941 = vrsqrt.f32 %v1007_v34  ;;  %v5051_v38 = vmul.f32 %v3926_v43, %v3768_v2 }
 0x114   :  { %1310 = vmax.xlane.f32.xlu0 %v1309_v27  ;;  %v5033_v27 = vmul.f32 %v3918_v40, %v3765_v28  ;;  %v956_v40 = vpop.xlane.xlu0 %955  ;;  %v499_v54 = vpop.f32.mrf.mxu0 }
 0x115   :  { %7425 = vst [vmem:[#allocation25_spill] sm:$0xff] %v5051_v38  ;;  %v1234_v2 = vsel %vm1176_vm1, %v5051_v38, -inf }
 0x116   :  { %v1228_v28 = vsel %vm1176_vm1, %v5033_v27, -inf  ;;  %v3928_v8 = vpop.eup %3927 }
 0x117   :  { %1223 = vmax.xlane.f32.xlu1 %v1222_v14  ;;  %v959_v14 = vpop.xlane.xlu1 %958  ;;  %v3930_v56 = vpop.eup %3929  ;;  %v5053_v61 = vmul.f32 %v3928_v8, %v499_v54  ;;  %v1008_v8 = vmax.f32 %v4873_v47, 1e-24 }
 0x118   :  { %1220 = vmax.xlane.f32.xlu0 %v1219_v18  ;;  %v1006_v18 = vmax.f32 %v4869_v44, 1e-24  ;;  %v1039_v26 = vmax.f32 %v959_v14, 1e-24  ;;  %v3932_v62 = vpop.eup %3931  ;;  %v659_v44 = vpop.f32.mrf.mxu1 }
 0x119   :  { %v5057_v14 = vmul.f32 %v3932_v62, %v659_v44  ;;  %v962_v43 = vpop.xlane.xlu0 %961 }
 0x11a   :  { %3943 = vrsqrt.f32 %v1006_v18  ;;  %v3819_v34 = vpop.f32.mrf.mxu1  ;;  %v3934_v18 = vpop.eup %3933 }
 0x11b   :  { %1319 = vmax.xlane.f32.xlu1 %v1318_v30  ;;  %v1324_v30 = vsel %vm1176_vm1, %v5037_v48, -inf  ;;  %3945 = vrsqrt.f32 %v1039_v26  ;;  %7427 = vst [vmem:[#allocation27_spill] sm:$0xff] %v5057_v14  ;;  %v965_v48 = vpop.xlane.xlu1 %964  ;;  %v3936_v54 = vpop.eup %3935 }
 0x11c   :  { %1316 = vmax.xlane.f32.xlu0 %v1315_v35  ;;  %v1038_v35 = vmax.f32 %v956_v40, 1e-24  ;;  %v1009_v40 = vmax.f32 %v4871_v5, 1e-24  ;;  %v3938_v5 = vpop.eup %3937  ;;  %v669_v47 = vpop.f32.mrf.mxu1 }
 0x11e   :  { %3947 = vrsqrt.f32 %v1038_v35  ;;  %v1040_v35 = vmax.f32 %v962_v43, 1e-24  ;;  %v1011_v43 = vmax.f32 %v4875_v0, 1e-24 }
 0x11f   :  { %1229 = vmax.xlane.f32.xlu1 %v1228_v28  ;;  %v3771_v28 = vpop.f32.mrf.mxu0  ;;  %v3940_v62 = vpop.eup %3939  ;;  %3949 = vrsqrt.f32 %v1009_v40 }
 0x120   :  { %1226 = vmax.xlane.f32.xlu0 %v1225_v29  ;;  %v5055_v29 = vmul.f32 %v3930_v56, %v3816_v11  ;;  %v1231_v11 = vsel %vm1176_vm1, %v5053_v61, -inf  ;;  %v1041_v56 = vmax.f32 %v965_v48, 1e-24  ;;  %v5069_v44 = vmul.f32 %v3934_v18, %v3771_v28  ;;  %v3822_v40 = vpop.f32.mrf.mxu1  ;;  %v968_v18 = vpop.xlane.xlu0 %967 }
 0x121   :  { %3951 = vrsqrt.f32 %v1008_v8  ;;  %v5075_v48 = vmul.f32 %v3940_v62, %v669_v47  ;;  %v3942_v8 = vpop.eup %3941 }
 0x122   :  { %7426 = vst [vmem:[#allocation26_spill] sm:$0xff] %v5055_v29  ;;  %v1330_v26 = vsel %vm1176_vm1, %v5055_v29, -inf  ;;  %7428 = vst [vmem:[#allocation28_spill] sm:$0xff] %v5069_v44  ;;  %3953 = vrsqrt.f32 %v1041_v56  ;;  %v971_v29 = vpop.xlane.xlu1 %970  ;;  %v1240_v28 = vsel %vm1176_vm1, %v5069_v44, -inf }
 0x123   :  { %1325 = vmax.xlane.f32.xlu1 %v1324_v30  ;;  %v509_v30 = vpop.f32.mrf.mxu0  ;;  %7430 = vst [vmem:[#allocation30_spill] sm:$0xff] %v5075_v48  ;;  %3955 = vrsqrt.f32 %v1040_v35  ;;  %v1042_v35 = vmax.f32 %v968_v18, 1e-24  ;;  %v1013_v18 = vmax.f32 %v4879_v13, 1e-24 }
 0x124   :  { %1322 = vmax.xlane.f32.xlu0 %v1321_v39  ;;  %v1327_v39 = vsel %vm1176_vm1, %v5057_v14, -inf  ;;  %3957 = vrsqrt.f32 %v1011_v43 }
 0x125   :  { %v3774_v38 = vpop.f32.mrf.mxu0 }
 0x126   :  { %v5087_v47 = vmul.f32 %v3942_v8, %v3774_v38  ;;  %v974_v8 = vpop.xlane.xlu0 %973 }
 0x127   :  { %1235 = vmax.xlane.f32.xlu1 %v1234_v2  ;;  %v5071_v2 = vmul.f32 %v3936_v54, %v509_v30  ;;  %v1010_v54 = vmax.f32 %v4877_v49, 1e-24  ;;  %v3944_v30 = vpop.eup %3943  ;;  %v679_v49 = vpop.f32.mrf.mxu1 }
 0x128   :  { %1232 = vmax.xlane.f32.xlu0 %v1231_v11  ;;  %v5073_v11 = vmul.f32 %v3938_v5, %v3819_v34  ;;  %v1043_v5 = vmax.f32 %v971_v29, 1e-24  ;;  %v3946_v0 = vpop.eup %3945  ;;  %7431 = vst [vmem:[#allocation31_spill] sm:$0xff] %v5087_v47  ;;  %v1246_v38 = vsel %vm1176_vm1, %v5087_v47, -inf }
 0x129   :  { %v1237_v34 = vsel %vm1176_vm1, %v5071_v2, -inf  ;;  %3959 = vrsqrt.f32 %v1010_v54  ;;  %v3825_v43 = vpop.f32.mrf.mxu1 }
 0x12a   :  { %7429 = vst [vmem:[#allocation29_spill] sm:$0xff] %v5073_v11  ;;  %v1336_v56 = vsel %vm1176_vm1, %v5073_v11, -inf  ;;  %3961 = vrsqrt.f32 %v1043_v5  ;;  %v977_v11 = vpop.xlane.xlu1 %976 }
 0x12b   :  { %1331 = vmax.xlane.f32.xlu1 %v1330_v26  ;;  %v519_v26 = vpop.f32.mrf.mxu0  ;;  %v3948_v62 = vpop.eup %3947  ;;  %3963 = vrsqrt.f32 %v1042_v35  ;;  %v1044_v35 = vmax.f32 %v974_v8, 1e-24  ;;  %v1015_v8 = vmax.f32 %v4883_v21, 1e-24 }
 0x12c   :  { %1328 = vmax.xlane.f32.xlu0 %v1327_v39  ;;  %v1333_v39 = vsel %vm1176_vm1, %v5075_v48, -inf  ;;  %v5093_v29 = vmul.f32 %v3948_v62, %v679_v49  ;;  %v3950_v54 = vpop.eup %3949  ;;  %3965 = vrsqrt.f32 %v1013_v18 }
 0x12d   :  { %v3777_v44 = vpop.f32.mrf.mxu0 }
 0x12e   :  { %7433 = vst [vmem:[#allocation33_spill] sm:$0xff] %v5093_v29  ;;  %v5105_v49 = vmul.f32 %v3950_v54, %v3777_v44  ;;  %v980_v54 = vpop.xlane.xlu0 %979 }
 0x12f   :  { %1241 = vmax.xlane.f32.xlu1 %v1240_v28  ;;  %v5089_v28 = vmul.f32 %v3944_v30, %v519_v26  ;;  %v1012_v30 = vmax.f32 %v4881_v50, 1e-24  ;;  %v3952_v26 = vpop.eup %3951  ;;  %v689_v50 = vpop.f32.mrf.mxu1 }
 0x130   :  { %1238 = vmax.xlane.f32.xlu0 %v1237_v34  ;;  %v5091_v34 = vmul.f32 %v3946_v0, %v3822_v40  ;;  %v1045_v0 = vmax.f32 %v977_v11, 1e-24  ;;  %v3954_v13 = vpop.eup %3953  ;;  %7434 = vst [vmem:[#allocation34_spill] sm:$0xff] %v5105_v49  ;;  %v1252_v44 = vsel %vm1176_vm1, %v5105_v49, -inf }
 0x131   :  { %v1243_v40 = vsel %vm1176_vm1, %v5089_v28, -inf  ;;  %v3956_v62 = vpop.eup %3955  ;;  %3967 = vrsqrt.f32 %v1012_v30  ;;  %v3828_v18 = vpop.f32.mrf.mxu1 }
 0x132   :  { %7432 = vst [vmem:[#allocation32_spill] sm:$0xff] %v5091_v34  ;;  %v1342_v5 = vsel %vm1176_vm1, %v5091_v34, -inf  ;;  %3969 = vrsqrt.f32 %v1045_v0  ;;  %v5111_v11 = vmul.f32 %v3956_v62, %v689_v50  ;;  %v983_v34 = vpop.xlane.xlu1 %982  ;;  %v3958_v30 = vpop.eup %3957 }
 0x133   :  { %1337 = vmax.xlane.f32.xlu1 %v1336_v56  ;;  %v529_v56 = vpop.f32.mrf.mxu0  ;;  %3971 = vrsqrt.f32 %v1044_v35  ;;  %v1046_v35 = vmax.f32 %v980_v54, 1e-24 }
 0x134   :  { %1334 = vmax.xlane.f32.xlu0 %v1333_v39  ;;  %v1339_v39 = vsel %vm1176_vm1, %v5093_v29, -inf  ;;  %7436 = vst [vmem:[#allocation36_spill] sm:$0xff] %v5111_v11  ;;  %3973 = vrsqrt.f32 %v1015_v8 }
 0x135   :  { %v3780_v47 = vpop.f32.mrf.mxu0 }
 0x136   :  { %v5123_v50 = vmul.f32 %v3958_v30, %v3780_v47 }
 0x137   :  { %1247 = vmax.xlane.f32.xlu1 %v1246_v38  ;;  %v5107_v38 = vmul.f32 %v3952_v26, %v529_v56  ;;  %v1014_v26 = vmax.f32 %v4885_v16, 1e-24  ;;  %v3960_v56 = vpop.eup %3959  ;;  %v699_v16 = vpop.f32.mrf.mxu1 }
 0x138   :  { %1244 = vmax.xlane.f32.xlu0 %v1243_v40  ;;  %v5109_v40 = vmul.f32 %v3954_v13, %v3825_v43  ;;  %v1047_v13 = vmax.f32 %v983_v34, 1e-24  ;;  %v3962_v21 = vpop.eup %3961  ;;  %7437 = vst [vmem:[#allocation37_spill] sm:$0xff] %v5123_v50  ;;  %v1258_v54 = vsel %vm1176_vm1, %v5123_v50, -inf }
 0x139   :  { %v1249_v43 = vsel %vm1176_vm1, %v5107_v38, -inf  ;;  %v3964_v62 = vpop.eup %3963  ;;  %3975 = vrsqrt.f32 %v1014_v26 }
 0x13a   :  { %7435 = vst [vmem:[#allocation35_spill] sm:$0xff] %v5109_v40  ;;  %v1348_v0 = vsel %vm1176_vm1, %v5109_v40, -inf  ;;  %3977 = vrsqrt.f32 %v1047_v13  ;;  %v5129_v34 = vmul.f32 %v3964_v62, %v699_v16  ;;  %v3831_v40 = vpop.f32.mrf.mxu1  ;;  %v3966_v8 = vpop.eup %3965 }
 0x13b   :  { %1343 = vmax.xlane.f32.xlu1 %v1342_v5  ;;  %v539_v5 = vpop.f32.mrf.mxu0  ;;  %3979 = vrsqrt.f32 %v1046_v35 }
 0x13c   :  { %1340 = vmax.xlane.f32.xlu0 %v1339_v39  ;;  %v1345_v39 = vsel %vm1176_vm1, %v5111_v11, -inf  ;;  %7439 = vst [vmem:[#allocation39_spill] sm:$0xff] %v5129_v34 }
 0x13d   :  { %v3783_v49 = vpop.f32.mrf.mxu0 }
 0x13e   :  { %v3968_v30 = vpop.eup %3967  ;;  %v5139_v13 = vmul.f32 %v3966_v8, %v3783_v49 }
 0x13f   :  { %1253 = vmax.xlane.f32.xlu1 %v1252_v44  ;;  %v5125_v44 = vmul.f32 %v3960_v56, %v539_v5  ;;  %v549_v26 = vpop.f32.mrf.mxu0  ;;  %v3970_v56 = vpop.eup %3969  ;;  %v1351_v5 = vsel %vm1176_vm1, %v5129_v34, -inf }
 0x140   :  { %1250 = vmax.xlane.f32.xlu0 %v1249_v43  ;;  %v5127_v43 = vmul.f32 %v3962_v21, %v3828_v18  ;;  %7440 = vst [vmem:[#allocation40_spill] sm:$0xff] %v5139_v13  ;;  %v709_v21 = vpop.f32.mrf.mxu1  ;;  %v5143_v62 = vmul.f32 %v3970_v56, %v3831_v40 }
 0x141   :  { %v1255_v47 = vsel %vm1176_vm1, %v5125_v44, -inf  ;;  %v3786_v35 = vpop.f32.mrf.mxu0 }
 0x142   :  { %7438 = vst [vmem:[#allocation38_spill] sm:$0xff] %v5127_v43  ;;  %v1354_v18 = vsel %vm1176_vm1, %v5127_v43, -inf  ;;  %7442 = vst [vmem:[#allocation42_spill] sm:$0xff] %v5143_v62 }
 0x143   :  { %1349 = vmax.xlane.f32.xlu1 %v1348_v0  ;;  %v3972_v0 = vpop.eup %3971  ;;  %v559_v50 = vpop.f32.mrf.mxu0 }
 0x144   :  { %1346 = vmax.xlane.f32.xlu0 %v1345_v39  ;;  %v5141_v39 = vmul.f32 %v3968_v30, %v549_v26  ;;  %v5145_v16 = vmul.f32 %v3972_v0, %v709_v21  ;;  %v3974_v43 = vpop.eup %3973  ;;  %v1360_v30 = vsel %vm1176_vm1, %v5143_v62, -inf }
 0x145   :  { %v5155_v56 = vmul.f32 %v3974_v43, %v3786_v35 }
 0x146   :  { %7441 = vst [vmem:[#allocation41_spill] sm:$0xff] %v5141_v39  ;;  %7443 = vst [vmem:[#allocation43_spill] sm:$0xff] %v5145_v16  ;;  %v1261_v49 = vsel %vm1176_vm1, %v5141_v39, -inf  ;;  %v3976_v8 = vpop.eup %3975  ;;  %v1357_v40 = vsel %vm1176_vm1, %v5145_v16, -inf }
 0x147   :  { %1259 = vmax.xlane.f32.xlu1 %v1258_v54  ;;  %v1264_v54 = vsel %vm1176_vm1, %v5139_v13, -inf  ;;  %v3978_v26 = vpop.eup %3977  ;;  %7444 = vst [vmem:[#allocation44_spill] sm:$0xff] %v5155_v56  ;;  %v5157_v0 = vmul.f32 %v3976_v8, %v559_v50  ;;  %v83_v8 = vld [vmem:[%s7155_s1 + $0x8] sm:$0xff] }
 0x148   :  { %1256 = vmax.xlane.f32.xlu0 %v1255_v47  ;;  %v3834_v47 = vpop.f32.mrf.mxu1 }
 0x149   :  { %7445 = vst [vmem:[#allocation45_spill] sm:$0xff] %v5157_v0  ;;  %v5159_v21 = vmul.f32 %v3978_v26, %v3834_v47  ;;  %v1267_v62 = vsel %vm1176_vm1, %v5157_v0, -inf  ;;  %v84_v26 = vld [vmem:[%s7155_s1 + $0x10] sm:$0xff] }
 0x14b   :  { %1355 = vmax.xlane.f32.xlu1 %v1354_v18  ;;  %v3980_v18 = vpop.eup %3979  ;;  %7446 = vst [vmem:[#allocation46_spill] sm:$0xff] %v5159_v21  ;;  %v1366_v43 = vsel %vm1176_vm1, %v5159_v21, -inf }
 0x14c   :  { %1352 = vmax.xlane.f32.xlu0 %v1351_v5  ;;  %v719_v5 = vpop.f32.mrf.mxu1 }
 0x14f   :  { %1265 = vmax.xlane.f32.xlu1 %v1264_v54  ;;  %v5161_v54 = vmul.f32 %v3980_v18, %v719_v5 }
 0x150   :  { %1262 = vmax.xlane.f32.xlu0 %v1261_v49  ;;  %v1270_v49 = vsel %vm1176_vm1, %v5155_v56, -inf }
 0x151   :  { %7447 = vst [vmem:[#allocation47_spill] sm:$0xff] %v5161_v54  ;;  %v1363_v50 = vsel %vm1176_vm1, %v5161_v54, -inf }
 0x153   :  { %1361 = vmax.xlane.f32.xlu1 %v1360_v30 }
 0x154   :  { %1358 = vmax.xlane.f32.xlu0 %v1357_v40  ;;  %v82_v40 = vld [vmem:[%s7155_s1] sm:$0xff] }
 0x157   :  { %1271 = vmax.xlane.f32.xlu1 %v1270_v49  ;;  %v5171_v35 = vpop.xlane.xlu1 %1181  ;;  %v85_v49 = vld [vmem:[%s7155_s1 + $0x18] sm:$0xff] }
 0x158   :  { %1268 = vmax.xlane.f32.xlu0 %v1267_v62  ;;  %7448 = vst [vmem:[#allocation48_spill] sm:$0xff] %v5171_v35 }
 0x159   :  { %v5173_v47 = vpop.xlane.xlu0 %1178 }
 0x15a   :  { %7449 = vst [vmem:[#allocation49_spill] sm:$0xff] %v5173_v47  ;;  %v1369_v21 = vsub.f32 %v4889_v58, %v5173_v47 }
 0x15b   :  { %1367 = vmax.xlane.f32.xlu1 %v1366_v43 }
 0x15c   :  { %1364 = vmax.xlane.f32.xlu0 %v1363_v50  ;;  %v1433_v13 = vmul.f32 1.442695, %v1369_v21 }
 0x15e   :  { %3981 = vpow2.f32 %v1433_v13  ;;  %v1370_v13 = vsub.f32 %v4887_v55, %v5171_v35 }
 0x16c   :  { %v5178_v30 = vpop.xlane.xlu1 %1277  ;;  %1951 = vperm.xlu1 %3852, %v83_v8   ;;  %v86_v8 = vld [vmem:[%s7155_s1 + $0x20] sm:$0xff] }
 0x16d   :  { %7450 = vst [vmem:[#allocation50_spill] sm:$0xff] %v5178_v30  ;;  %v5180_v62 = vpop.xlane.xlu0 %1274 }
 0x16e   :  { %7451 = vst [vmem:[#allocation51_spill] sm:$0xff] %v5180_v62 }
 0x170   :  { %v5188_v18 = vpop.xlane.xlu1 %1187  ;;  %1954 = vperm.xlu1 %3852, %v84_v26  }
 0x171   :  { %7452 = vst [vmem:[#allocation52_spill] sm:$0xff] %v5188_v18  ;;  %v5190_v5 = vpop.xlane.xlu0 %1184  ;;  %v1372_v35 = vsub.f32 %v4903_v24, %v5188_v18 }
 0x172   :  { %7453 = vst [vmem:[#allocation53_spill] sm:$0xff] %v5190_v5  ;;  %1948 = vperm.xlu0 %3851, %v82_v40   ;;  %v87_v40 = vld [vmem:[%s7155_s1 + $0x28] sm:$0xff] }
 0x174   :  { %v5195_v43 = vpop.xlane.xlu1 %1283  ;;  %1957 = vperm.xlu1 %3852, %v85_v49   ;;  %v1401_v49 = vsub.f32 %v4901_v51, %v5180_v62 }
 0x175   :  { %7454 = vst [vmem:[#allocation54_spill] sm:$0xff] %v5195_v43  ;;  %v5197_v50 = vpop.xlane.xlu0 %1280 }
 0x176   :  { %7455 = vst [vmem:[#allocation55_spill] sm:$0xff] %v5197_v50  ;;  %v1497_v47 = vmul.f32 1.442695, %v1401_v49  ;;  %v1403_v21 = vsub.f32 %v4913_v1, %v5197_v50 }
 0x178   :  { %v5204_v26 = vpop.xlane.xlu1 %1193  ;;  %1960 = vperm.xlu1 %3852, %v86_v8   ;;  %v1371_v8 = vsub.f32 %v4907_v42, %v5190_v5  ;;  %3983 = vpow2.f32 %v1497_v47  ;;  %v1435_v47 = vmul.f32 1.442695, %v1370_v13 }
 0x179   :  { %7456 = vst [vmem:[#allocation56_spill] sm:$0xff] %v5204_v26  ;;  %v5206_v56 = vpop.xlane.xlu0 %1190 }
 0x17a   :  { %7457 = vst [vmem:[#allocation57_spill] sm:$0xff] %v5206_v56  ;;  %v1437_v39 = vmul.f32 1.442695, %v1371_v8  ;;  %v1373_v49 = vsub.f32 %v4927_v17, %v5206_v56  ;;  %v1402_v8 = vsub.f32 %v4899_v32, %v5178_v30  ;;  %v1439_v32 = vmul.f32 1.442695, %v1372_v35 }
 0x17c   :  { %v5213_v54 = vpop.xlane.xlu1 %1289  ;;  %1963 = vperm.xlu1 %3852, %v87_v40   ;;  %3985 = vpow2.f32 %v1437_v39  ;;  %v1501_v40 = vmul.f32 1.442695, %v1403_v21  ;;  %v1441_v50 = vmul.f32 1.442695, %v1373_v49  ;;  %v3982_v39 = vpop.eup %3981  ;;  %v1499_v56 = vmul.f32 1.442695, %v1402_v8 }
 0x17d   :  { %7458 = vst [vmem:[#allocation58_spill] sm:$0xff] %v5213_v54  ;;  %v5215_v0 = vpop.xlane.xlu0 %1286  ;;  %v1561_v49 = vsel %vm1176_vm1, %v3982_v39, 0.0 }
 0x17e   :  { %7459 = vst [vmem:[#allocation59_spill] sm:$0xff] %v5215_v0  ;;  %3987 = vpow2.f32 %v1501_v40  ;;  %v1405_v1 = vsub.f32 %v4931_v37, %v5215_v0 }
 0x17f   :  { %3989 = vpow2.f32 %v1435_v47  ;;  %v1404_v47 = vsub.f32 %v4911_v52, %v5195_v43 }
 0x180   :  { %v5219_v58 = vpop.xlane.xlu1 %1199  ;;  %3991 = vpow2.f32 %v1441_v50  ;;  %v1505_v13 = vmul.f32 1.442695, %v1405_v1 }
 0x181   :  { %7460 = vst [vmem:[#allocation60_spill] sm:$0xff] %v5219_v58  ;;  %v5221_v16 = vpop.xlane.xlu0 %1196  ;;  %3993 = vpow2.f32 %v1499_v56  ;;  %v1374_v56 = vsub.f32 %v4925_v15, %v5204_v26 }
 0x182   :  { %7461 = vst [vmem:[#allocation61_spill] sm:$0xff] %v5221_v16  ;;  %v1375_v30 = vsub.f32 %v4945_v57, %v5221_v16  ;;  %3995 = vpow2.f32 %v1505_v13 }
 0x183   :  { %3997 = vpow2.f32 %v1439_v32  ;;  %v1406_v32 = vsub.f32 %v4929_v19, %v5213_v54  ;;  %v5851_v19 = vld [vmem:[%s7155_s1 + $0x118] sm:$0xff] }
 0x184   :  { %v5225_v62 = vpop.xlane.xlu1 %1295  ;;  %v1445_v8 = vmul.f32 1.442695, %v1375_v30  ;;  %7605 = vst [vmem:[#allocation173_spill] sm:$0xff] %v5851_v19 }
 0x185   :  { %7462 = vst [vmem:[#allocation62_spill] sm:$0xff] %v5225_v62  ;;  %v5227_v51 = vpop.xlane.xlu0 %1292  ;;  %v3984_v0 = vpop.eup %3983 }
 0x186   :  { %7463 = vst [vmem:[#allocation63_spill] sm:$0xff] %v5227_v51  ;;  %v1407_v1 = vsub.f32 %v4949_v9, %v5227_v51  ;;  %v1657_v16 = vsel %vm1176_vm1, %v3984_v0, 0.0  ;;  %3999 = vpow2.f32 %v1445_v8 }
 0x188   :  { %v5233_v5 = vpop.xlane.xlu1 %1205  ;;  %v1509_v35 = vmul.f32 1.442695, %v1407_v1 }
 0x189   :  { %7464 = vst [vmem:[#allocation64_spill] sm:$0xff] %v5233_v5  ;;  %v5235_v42 = vpop.xlane.xlu0 %1202  ;;  %v3986_v18 = vpop.eup %3985 }
 0x18a   :  { %7465 = vst [vmem:[#allocation65_spill] sm:$0xff] %v5235_v42  ;;  %v1377_v30 = vsub.f32 %v4963_v25, %v5235_v42  ;;  %v1567_v51 = vsel %vm1176_vm1, %v3986_v18, 0.0 }
 0x18b   :  { %v3988_v43 = vpop.eup %3987 }
 0x18c   :  { %v5241_v34 = vpop.xlane.xlu1 %1301  ;;  %v1449_v8 = vmul.f32 1.442695, %v1377_v30  ;;  %v1663_v26 = vsel %vm1176_vm1, %v3988_v43, 0.0 }
 0x18d   :  { %7466 = vst [vmem:[#allocation66_spill] sm:$0xff] %v5241_v34  ;;  %v5243_v21 = vpop.xlane.xlu0 %1298 }
 0x18e   :  { %7467 = vst [vmem:[#allocation67_spill] sm:$0xff] %v5243_v21  ;;  %v1409_v1 = vsub.f32 %v4967_v60, %v5243_v21 }
 0x190   :  { %v5249_v40 = vpop.xlane.xlu1 %1211  ;;  %v1513_v30 = vmul.f32 1.442695, %v1409_v1 }
 0x191   :  { %7468 = vst [vmem:[#allocation68_spill] sm:$0xff] %v5249_v40  ;;  %v5252_v37 = vpop.xlane.xlu0 %1208  ;;  %1562 = vadd.xlane.f32.xlu0 %v1561_v49  ;;  %v1503_v49 = vmul.f32 1.442695, %v1404_v47  ;;  %v3990_v47 = vpop.eup %3989 }
 0x192   :  { %7469 = vst [vmem:[#allocation69_spill] sm:$0xff] %v5252_v37  ;;  %v3992_v18 = vpop.eup %3991  ;;  %v1379_v21 = vsub.f32 %v4981_v45, %v5252_v37 }
 0x193   :  { %4001 = vpow2.f32 %v1503_v49  ;;  %v1376_v49 = vsub.f32 %v4943_v4, %v5219_v58  ;;  %v1573_v43 = vsel %vm1176_vm1, %v3992_v18, 0.0 }
 0x194   :  { %v5258_v50 = vpop.xlane.xlu1 %1307  ;;  %4003 = vpow2.f32 %v1509_v35  ;;  %v3994_v35 = vpop.eup %3993  ;;  %v1453_v1 = vmul.f32 1.442695, %v1379_v21 }
 0x195   :  { %7470 = vst [vmem:[#allocation70_spill] sm:$0xff] %v5258_v50  ;;  %v5261_v39 = vpop.xlane.xlu0 %1304  ;;  %1658 = vadd.xlane.f32.xlu0 %v1657_v16  ;;  %v1443_v16 = vmul.f32 1.442695, %v1374_v56  ;;  %v1564_v56 = vsel %vm1176_vm1, %v3990_v47, 0.0  ;;  %v3996_v60 = vpop.eup %3995  ;;  %v1660_v47 = vsel %vm1176_vm1, %v3994_v35, 0.0 }
 0x196   :  { %7471 = vst [vmem:[#allocation71_spill] sm:$0xff] %v5261_v39  ;;  %v1411_v37 = vsub.f32 %v4985_v41, %v5261_v39  ;;  %v1669_v18 = vsel %vm1176_vm1, %v3996_v60, 0.0 }
 0x197   :  { %4005 = vpow2.f32 %v1443_v16  ;;  %v1447_v16 = vmul.f32 1.442695, %v1376_v49  ;;  %v1378_v49 = vsub.f32 %v4961_v31, %v5233_v5 }
 0x198   :  { %v5267_v13 = vpop.xlane.xlu1 %1217  ;;  %4007 = vpow2.f32 %v1449_v8  ;;  %v3998_v8 = vpop.eup %3997 }
 0x199   :  { %7472 = vst [vmem:[#allocation72_spill] sm:$0xff] %v5267_v13  ;;  %v5270_v0 = vpop.xlane.xlu0 %1214  ;;  %1568 = vadd.xlane.f32.xlu0 %v1567_v51  ;;  %v1507_v51 = vmul.f32 1.442695, %v1406_v32  ;;  %v1408_v32 = vsub.f32 %v4947_v7, %v5225_v62  ;;  %v4000_v58 = vpop.eup %3999  ;;  %v1570_v35 = vsel %vm1176_vm1, %v3998_v8, 0.0 }
 0x19a   :  { %7473 = vst [vmem:[#allocation73_spill] sm:$0xff] %v5270_v0  ;;  %v1381_v39 = vsub.f32 %v4999_v12, %v5270_v0  ;;  %v1579_v60 = vsel %vm1176_vm1, %v4000_v58, 0.0 }
 0x19b   :  { %4009 = vpow2.f32 %v1507_v51  ;;  %v1511_v51 = vmul.f32 1.442695, %v1408_v32  ;;  %v1410_v32 = vsub.f32 %v4965_v59, %v5241_v34 }
 0x19c   :  { %v5276_v42 = vpop.xlane.xlu1 %1313  ;;  %4011 = vpow2.f32 %v1513_v30  ;;  %v1517_v30 = vmul.f32 1.442695, %v1411_v37 }
 0x19d   :  { %7474 = vst [vmem:[#allocation74_spill] sm:$0xff] %v5276_v42  ;;  %v5279_v9 = vpop.xlane.xlu0 %1310  ;;  %1664 = vadd.xlane.f32.xlu0 %v1663_v26  ;;  %4013 = vpow2.f32 %v1447_v16  ;;  %v1451_v16 = vmul.f32 1.442695, %v1378_v49  ;;  %v1380_v49 = vsub.f32 %v4979_v22, %v5249_v40 }
 0x19e   :  { %7475 = vst [vmem:[#allocation75_spill] sm:$0xff] %v5279_v9  ;;  %4015 = vpow2.f32 %v1453_v1  ;;  %v1457_v1 = vmul.f32 1.442695, %v1381_v39  ;;  %v1413_v0 = vsub.f32 %v5003_v23, %v5279_v9 }
 0x19f   :  { %4017 = vpow2.f32 %v1511_v51  ;;  %v1515_v51 = vmul.f32 1.442695, %v1410_v32  ;;  %v1412_v32 = vsub.f32 %v4983_v20, %v5258_v50 }
 0x1a0   :  { %v5286_v54 = vpop.xlane.xlu1 %1223  ;;  %1565 = vadd.xlane.f32.xlu1 %v1564_v56  ;;  %v4002_v21 = vpop.eup %4001  ;;  %4019 = vpow2.f32 %v1517_v30  ;;  %v1521_v30 = vmul.f32 1.442695, %v1413_v0 }
 0x1a1   :  { %7476 = vst [vmem:[#allocation76_spill] sm:$0xff] %v5286_v54  ;;  %v5289_v26 = vpop.xlane.xlu0 %1220  ;;  %1574 = vadd.xlane.f32.xlu0 %v1573_v43  ;;  %v4004_v62 = vpop.eup %4003  ;;  %v1666_v8 = vsel %vm1176_vm1, %v4002_v21, 0.0  ;;  %4021 = vpow2.f32 %v1451_v16  ;;  %v1455_v16 = vmul.f32 1.442695, %v1380_v49  ;;  %v1382_v49 = vsub.f32 %v4997_v10, %v5267_v13 }
 0x1a2   :  { %7477 = vst [vmem:[#allocation77_spill] sm:$0xff] %v5289_v26  ;;  %v1675_v58 = vsel %vm1176_vm1, %v4004_v62, 0.0  ;;  %4023 = vpow2.f32 %v1457_v1  ;;  %v1383_v9 = vsub.f32 %v5017_v36, %v5289_v26 }
 0x1a3   :  { %4025 = vpow2.f32 %v1515_v51  ;;  %v1519_v51 = vmul.f32 1.442695, %v1412_v32  ;;  %v1414_v32 = vsub.f32 %v5001_v33, %v5276_v42 }
 0x1a4   :  { %v5296_v56 = vpop.xlane.xlu1 %1319  ;;  %1661 = vadd.xlane.f32.xlu1 %v1660_v47  ;;  %v4006_v37 = vpop.eup %4005  ;;  %4027 = vpow2.f32 %v1521_v30  ;;  %v1461_v1 = vmul.f32 1.442695, %v1383_v9 }
 0x1a5   :  { %7478 = vst [vmem:[#allocation78_spill] sm:$0xff] %v5296_v56  ;;  %v5299_v43 = vpop.xlane.xlu0 %1316  ;;  %1670 = vadd.xlane.f32.xlu0 %v1669_v18  ;;  %v4008_v5 = vpop.eup %4007  ;;  %v1576_v21 = vsel %vm1176_vm1, %v4006_v37, 0.0  ;;  %4029 = vpow2.f32 %v1455_v16  ;;  %v1459_v16 = vmul.f32 1.442695, %v1382_v49  ;;  %v1384_v49 = vsub.f32 %v5015_v63, %v5286_v54 }
 0x1a6   :  { %7479 = vst [vmem:[#allocation79_spill] sm:$0xff] %v5299_v43  ;;  %v1585_v62 = vsel %vm1176_vm1, %v4008_v5, 0.0  ;;  %v1415_v26 = vsub.f32 %v5021_v3, %v5299_v43  ;;  %4031 = vpow2.f32 %v1461_v1 }
 0x1a7   :  { %4033 = vpow2.f32 %v1519_v51  ;;  %v1523_v51 = vmul.f32 1.442695, %v1414_v32  ;;  %v1416_v32 = vsub.f32 %v5019_v6, %v5296_v56 }
 0x1a8   :  { %v5306_v47 = vpop.xlane.xlu1 %1229  ;;  %1571 = vadd.xlane.f32.xlu1 %v1570_v35  ;;  %v4010_v39 = vpop.eup %4009  ;;  %v1525_v30 = vmul.f32 1.442695, %v1415_v26 }
 0x1a9   :  { %7480 = vst [vmem:[#allocation80_spill] sm:$0xff] %v5306_v47  ;;  %v5309_v18 = vpop.xlane.xlu0 %1226  ;;  %1580 = vadd.xlane.f32.xlu0 %v1579_v60  ;;  %v4012_v34 = vpop.eup %4011  ;;  %v1672_v37 = vsel %vm1176_vm1, %v4010_v39, 0.0 }
 0x1aa   :  { %7481 = vst [vmem:[#allocation81_spill] sm:$0xff] %v5309_v18  ;;  %v4014_v0 = vpop.eup %4013  ;;  %v1681_v5 = vsel %vm1176_vm1, %v4012_v34, 0.0  ;;  %v1385_v43 = vsub.f32 %v5035_v46, %v5309_v18  ;;  %4035 = vpow2.f32 %v1525_v30 }
 0x1ab   :  { %v4016_v40 = vpop.eup %4015  ;;  %v1582_v39 = vsel %vm1176_vm1, %v4014_v0, 0.0  ;;  %4037 = vpow2.f32 %v1459_v16  ;;  %v1463_v16 = vmul.f32 1.442695, %v1384_v49  ;;  %v1386_v49 = vsub.f32 %v5033_v27, %v5306_v47 }
 0x1ac   :  { %v5316_v35 = vpop.xlane.xlu1 %1325  ;;  %1667 = vadd.xlane.f32.xlu1 %v1666_v8  ;;  %v4018_v9 = vpop.eup %4017  ;;  %v1591_v34 = vsel %vm1176_vm1, %v4016_v40, 0.0  ;;  %v1465_v1 = vmul.f32 1.442695, %v1385_v43 }
 0x1ad   :  { %7482 = vst [vmem:[#allocation82_spill] sm:$0xff] %v5316_v35  ;;  %v5319_v60 = vpop.xlane.xlu0 %1322  ;;  %1676 = vadd.xlane.f32.xlu0 %v1675_v58  ;;  %v4020_v50 = vpop.eup %4019  ;;  %v1678_v0 = vsel %vm1176_vm1, %v4018_v9, 0.0 }
 0x1ae   :  { %7483 = vst [vmem:[#allocation83_spill] sm:$0xff] %v5319_v60  ;;  %v4022_v26 = vpop.eup %4021  ;;  %v1417_v18 = vsub.f32 %v5039_v53, %v5319_v60  ;;  %v1687_v40 = vsel %vm1176_vm1, %v4020_v50, 0.0  ;;  %4039 = vpow2.f32 %v1465_v1 }
 0x1af   :  { %v4024_v13 = vpop.eup %4023  ;;  %v1588_v9 = vsel %vm1176_vm1, %v4022_v26, 0.0  ;;  %4041 = vpow2.f32 %v1523_v51  ;;  %v1527_v51 = vmul.f32 1.442695, %v1416_v32  ;;  %v7497_v32 = vld [vmem:[#allocation23_spill] sm:$0xff] }
 0x1b0   :  { %v5326_v8 = vpop.xlane.xlu1 %1235  ;;  %1577 = vadd.xlane.f32.xlu1 %v1576_v21  ;;  %v4026_v43 = vpop.eup %4025  ;;  %v1529_v30 = vmul.f32 1.442695, %v1417_v18  ;;  %v1597_v50 = vsel %vm1176_vm1, %v4024_v13, 0.0 }
 0x1b1   :  { %7484 = vst [vmem:[#allocation84_spill] sm:$0xff] %v5326_v8  ;;  %v5329_v58 = vpop.xlane.xlu0 %1232  ;;  %1586 = vadd.xlane.f32.xlu0 %v1585_v62  ;;  %v4028_v42 = vpop.eup %4027  ;;  %v1684_v26 = vsel %vm1176_vm1, %v4026_v43, 0.0 }
 0x1b2   :  { %7485 = vst [vmem:[#allocation85_spill] sm:$0xff] %v5329_v58  ;;  %v1387_v60 = vsub.f32 %v5053_v61, %v5329_v58  ;;  %v4030_v18 = vpop.eup %4029  ;;  %4043 = vpow2.f32 %v1529_v30  ;;  %v1693_v13 = vsel %vm1176_vm1, %v4028_v42, 0.0 }
 0x1b3   :  { %4045 = vpow2.f32 %v1463_v16  ;;  %v1594_v43 = vsel %vm1176_vm1, %v4030_v18, 0.0  ;;  %v1467_v16 = vmul.f32 1.442695, %v1386_v49  ;;  %v7500_v49 = vld [vmem:[#allocation25_spill] sm:$0xff] }
 0x1b4   :  { %v5336_v21 = vpop.xlane.xlu1 %1331  ;;  %1673 = vadd.xlane.f32.xlu1 %v1672_v37  ;;  %v1469_v1 = vmul.f32 1.442695, %v1387_v60 }
 0x1b5   :  { %7486 = vst [vmem:[#allocation86_spill] sm:$0xff] %v5336_v21  ;;  %v5339_v62 = vpop.xlane.xlu0 %1328  ;;  %1682 = vadd.xlane.f32.xlu0 %v1681_v5 }
 0x1b6   :  { %7487 = vst [vmem:[#allocation87_spill] sm:$0xff] %v5339_v62  ;;  %v1419_v58 = vsub.f32 %v5057_v14, %v5339_v62  ;;  %4047 = vpow2.f32 %v1469_v1 }
 0x1b7   :  { %4049 = vpow2.f32 %v1527_v51 }
 0x1b8   :  { %v5346_v37 = vpop.xlane.xlu1 %1241  ;;  %1583 = vadd.xlane.f32.xlu1 %v1582_v39  ;;  %v1533_v30 = vmul.f32 1.442695, %v1419_v58 }
 0x1b9   :  { %7488 = vst [vmem:[#allocation88_spill] sm:$0xff] %v5346_v37  ;;  %v5349_v5 = vpop.xlane.xlu0 %1238  ;;  %1592 = vadd.xlane.f32.xlu0 %v1591_v34 }
 0x1ba   :  { %7489 = vst [vmem:[#allocation89_spill] sm:$0xff] %v5349_v5  ;;  %4051 = vpow2.f32 %v1533_v30 }
 0x1bb   :  { %4053 = vpow2.f32 %v1467_v16 }
 0x1bc   :  { %v5356_v39 = vpop.xlane.xlu1 %1337  ;;  %1679 = vadd.xlane.f32.xlu1 %v1678_v0 }
 0x1bd   :  { %7490 = vst [vmem:[#allocation90_spill] sm:$0xff] %v5356_v39  ;;  %v5359_v34 = vpop.xlane.xlu0 %1334  ;;  %1688 = vadd.xlane.f32.xlu0 %v1687_v40 }
 0x1be   :  { %7491 = vst [vmem:[#allocation91_spill] sm:$0xff] %v5359_v34 }
 0x1c0   :  { %v5366_v0 = vpop.xlane.xlu1 %1247  ;;  %1589 = vadd.xlane.f32.xlu1 %v1588_v9  ;;  %v4032_v9 = vpop.eup %4031 }
 0x1c1   :  { %7492 = vst [vmem:[#allocation92_spill] sm:$0xff] %v5366_v0  ;;  %v5369_v40 = vpop.xlane.xlu0 %1244  ;;  %1598 = vadd.xlane.f32.xlu0 %v1597_v50  ;;  %v4034_v60 = vpop.eup %4033  ;;  %v1603_v42 = vsel %vm1176_vm1, %v4032_v9, 0.0 }
 0x1c2   :  { %7493 = vst [vmem:[#allocation93_spill] sm:$0xff] %v5369_v40  ;;  %v4036_v62 = vpop.eup %4035  ;;  %v1690_v18 = vsel %vm1176_vm1, %v4034_v60, 0.0 }
 0x1c3   :  { %v4038_v58 = vpop.eup %4037  ;;  %v1699_v9 = vsel %vm1176_vm1, %v4036_v62, 0.0 }
 0x1c4   :  { %1685 = vadd.xlane.f32.xlu1 %v1684_v26  ;;  %v5377_v54 = vpop.xlane.xlu1 %1343  ;;  %v1389_v26 = vsub.f32 %v5071_v2, %v5349_v5  ;;  %v4040_v5 = vpop.eup %4039  ;;  %v1600_v60 = vsel %vm1176_vm1, %v4038_v58, 0.0 }
 0x1c5   :  { %7494 = vst [vmem:[#allocation94_spill] sm:$0xff] %v5377_v54  ;;  %v5379_v50 = vpop.xlane.xlu0 %1340  ;;  %1694 = vadd.xlane.f32.xlu0 %v1693_v13  ;;  %v1418_v13 = vsub.f32 %v7497_v32, %v5316_v35  ;;  %v1388_v35 = vsub.f32 %v7500_v49, %v5326_v8  ;;  %v4042_v14 = vpop.eup %4041  ;;  %v1609_v62 = vsel %vm1176_vm1, %v4040_v5, 0.0  ;;  %v5940_v32 = vld [vmem:[%s7155_s1 + $0x8] sm:$0xff] }
 0x1c6   :  { %7495 = vst [vmem:[#allocation95_spill] sm:$0xff] %v5379_v50  ;;  %v1473_v1 = vmul.f32 1.442695, %v1389_v26  ;;  %v1391_v26 = vsub.f32 %v5089_v28, %v5369_v40  ;;  %v1696_v58 = vsel %vm1176_vm1, %v4042_v14, 0.0  ;;  %7621 = vst [vmem:[#allocation189_spill] sm:$0xff] %v5940_v32  ;;  %vm2783_vm11 = vcmp.ne.s32.totalorder %v5940_v32, 255 }
 0x1c7   :  { %v1531_v51 = vmul.f32 1.442695, %v1418_v13  ;;  %v1471_v16 = vmul.f32 1.442695, %v1388_v35  ;;  %v7502_v13 = vld [vmem:[#allocation26_spill] sm:$0xff] }
 0x1c8   :  { %1595 = vadd.xlane.f32.xlu1 %v1594_v43  ;;  %v5391_v47 = vpop.xlane.xlu1 %1253  ;;  %v1421_v43 = vsub.f32 %v5075_v48, %v5359_v34  ;;  %4055 = vpow2.f32 %v1473_v1 }
 0x1c9   :  { %v5387_v56 = vpop.xlane.xlu0 %1250  ;;  %1604 = vadd.xlane.f32.xlu0 %v1603_v42  ;;  %7498 = vst [vmem:[#allocation97_spill] sm:$0xff] %v5391_v47  ;;  %4057 = vpow2.f32 %v1531_v51  ;;  %v7504_v51 = vld [vmem:[#allocation28_spill] sm:$0xff] }
 0x1ca   :  { %7496 = vst [vmem:[#allocation96_spill] sm:$0xff] %v5387_v56  ;;  %v1537_v30 = vmul.f32 1.442695, %v1421_v43  ;;  %v1477_v43 = vmul.f32 1.442695, %v1391_v26  ;;  %v1393_v26 = vsub.f32 %v5107_v38, %v5387_v56 }
 0x1cc   :  { %1691 = vadd.xlane.f32.xlu1 %v1690_v18  ;;  %v4044_v18 = vpop.eup %4043  ;;  %v5405_v34 = vpop.xlane.xlu1 %1349  ;;  %4059 = vpow2.f32 %v1537_v30 }
 0x1cd   :  { %v5397_v42 = vpop.xlane.xlu0 %1346  ;;  %1700 = vadd.xlane.f32.xlu0 %v1699_v9  ;;  %7501 = vst [vmem:[#allocation25_spill] sm:$0xff] %v5405_v34  ;;  %v1420_v9 = vsub.f32 %v7502_v13, %v5336_v21  ;;  %v4046_v1 = vpop.eup %4045  ;;  %v1705_v5 = vsel %vm1176_vm1, %v4044_v18, 0.0  ;;  %4061 = vpow2.f32 %v1471_v16 }
 0x1ce   :  { %7499 = vst [vmem:[#allocation98_spill] sm:$0xff] %v5397_v42  ;;  %v4048_v40 = vpop.eup %4047  ;;  %v1606_v14 = vsel %vm1176_vm1, %v4046_v1, 0.0  ;;  %4063 = vpow2.f32 %v1477_v43  ;;  %v1481_v43 = vmul.f32 1.442695, %v1393_v26 }
 0x1cf   :  { %v1535_v35 = vmul.f32 1.442695, %v1420_v9  ;;  %v4050_v48 = vpop.eup %4049  ;;  %v1615_v18 = vsel %vm1176_vm1, %v4048_v40, 0.0  ;;  %v7507_v9 = vld [vmem:[#allocation29_spill] sm:$0xff] }
 0x1d0   :  { %1601 = vadd.xlane.f32.xlu1 %v1600_v60  ;;  %v1423_v60 = vsub.f32 %v5093_v29, %v5379_v50  ;;  %v5417_v21 = vpop.xlane.xlu1 %1259  ;;  %v1422_v50 = vsub.f32 %v7507_v9, %v5356_v39  ;;  %v1702_v1 = vsel %vm1176_vm1, %v4050_v48, 0.0 }
 0x1d1   :  { %1610 = vadd.xlane.f32.xlu0 %v1609_v62  ;;  %v5409_v8 = vpop.xlane.xlu0 %1256  ;;  %v1390_v62 = vsub.f32 %v7504_v51, %v5346_v37  ;;  %7505 = vst [vmem:[#allocation28_spill] sm:$0xff] %v5417_v21  ;;  %4065 = vpow2.f32 %v1535_v35 }
 0x1d2   :  { %7503 = vst [vmem:[#allocation99_spill] sm:$0xff] %v5409_v8  ;;  %v1541_v30 = vmul.f32 1.442695, %v1423_v60  ;;  %v1425_v60 = vsub.f32 %v5111_v11, %v5397_v42  ;;  %v1539_v35 = vmul.f32 1.442695, %v1422_v50 }
 0x1d3   :  { %v1475_v16 = vmul.f32 1.442695, %v1390_v62  ;;  %v7509_v62 = vld [vmem:[#allocation31_spill] sm:$0xff] }
 0x1d4   :  { %1697 = vadd.xlane.f32.xlu1 %v1696_v58  ;;  %v4052_v58 = vpop.eup %4051  ;;  %4067 = vpow2.f32 %v1541_v30  ;;  %v5431_v56 = vpop.xlane.xlu1 %1355  ;;  %v1545_v26 = vmul.f32 1.442695, %v1425_v60  ;;  %v7513_v60 = vld [vmem:[#allocation39_spill] sm:$0xff] }
 0x1d5   :  { %1706 = vadd.xlane.f32.xlu0 %v1705_v5  ;;  %v5423_v5 = vpop.xlane.xlu0 %1352  ;;  %v4054_v37 = vpop.eup %4053  ;;  %v1711_v40 = vsel %vm1176_vm1, %v4052_v58, 0.0  ;;  %7508 = vst [vmem:[#allocation101_spill] sm:$0xff] %v5431_v56  ;;  %4069 = vpow2.f32 %v1475_v16  ;;  %v7511_v16 = vld [vmem:[#allocation32_spill] sm:$0xff] }
 0x1d6   :  { %7506 = vst [vmem:[#allocation100_spill] sm:$0xff] %v5423_v5  ;;  %v1612_v48 = vsel %vm1176_vm1, %v4054_v37, 0.0  ;;  %4071 = vpow2.f32 %v1481_v43 }
 0x1d7   :  { %4073 = vpow2.f32 %v1539_v35 }
 0x1d8   :  { %1607 = vadd.xlane.f32.xlu1 %v1606_v14  ;;  %v4056_v14 = vpop.eup %4055  ;;  %4075 = vpow2.f32 %v1545_v26 }
 0x1d9   :  { %1616 = vadd.xlane.f32.xlu0 %v1615_v18  ;;  %v1392_v18 = vsub.f32 %v7509_v62, %v5366_v0  ;;  %v5435_v39 = vpop.xlane.xlu0 %1262  ;;  %v4058_v30 = vpop.eup %4057  ;;  %v1621_v58 = vsel %vm1176_vm1, %v4056_v14, 0.0 }
 0x1da   :  { %7510 = vst [vmem:[#allocation31_spill] sm:$0xff] %v5435_v39  ;;  %v4060_v42 = vpop.eup %4059  ;;  %v5443_v0 = vpop.xlane.xlu1 %1265  ;;  %v1708_v37 = vsel %vm1176_vm1, %v4058_v30, 0.0 }
 0x1db   :  { %v1479_v50 = vmul.f32 1.442695, %v1392_v18  ;;  %7512 = vst [vmem:[#allocation102_spill] sm:$0xff] %v5443_v0  ;;  %v4062_v11 = vpop.eup %4061  ;;  %v1717_v14 = vsel %vm1176_vm1, %v4060_v42, 0.0  ;;  %v7515_v18 = vld [vmem:[#allocation34_spill] sm:$0xff] }
 0x1dc   :  { %1703 = vadd.xlane.f32.xlu1 %v1702_v1  ;;  %v1395_v1 = vsub.f32 %v5125_v44, %v5409_v8  ;;  %v1427_v8 = vsub.f32 %v7513_v60, %v5423_v5  ;;  %v1618_v30 = vsel %vm1176_vm1, %v4062_v11, 0.0 }
 0x1dd   :  { %1712 = vadd.xlane.f32.xlu0 %v1711_v40  ;;  %v1424_v40 = vsub.f32 %v7511_v16, %v5377_v54  ;;  %4077 = vpow2.f32 %v1479_v50  ;;  %v1394_v54 = vsub.f32 %v7515_v18, %v5391_v47 }
 0x1de   :  { %v1485_v43 = vmul.f32 1.442695, %v1395_v1  ;;  %v1549_v26 = vmul.f32 1.442695, %v1427_v8  ;;  %v7516_v1 = vld [vmem:[#allocation41_spill] sm:$0xff]  ;;  %v5457_v60 = vpop.xlane.xlu1 %1361 }
 0x1df   :  { %v1543_v35 = vmul.f32 1.442695, %v1424_v40  ;;  %v1397_v5 = vsub.f32 %v7516_v1, %v5435_v39  ;;  %7517 = vst [vmem:[#allocation34_spill] sm:$0xff] %v5457_v60  ;;  %v1483_v50 = vmul.f32 1.442695, %v1394_v54  ;;  %v7518_v40 = vld [vmem:[#allocation35_spill] sm:$0xff] }
 0x1e0   :  { %1613 = vadd.xlane.f32.xlu1 %v1612_v48  ;;  %v4064_v48 = vpop.eup %4063  ;;  %4079 = vpow2.f32 %v1485_v43 }
 0x1e1   :  { %1622 = vadd.xlane.f32.xlu0 %v1621_v58  ;;  %v5449_v58 = vpop.xlane.xlu0 %1358  ;;  %v4066_v29 = vpop.eup %4065  ;;  %v1627_v42 = vsel %vm1176_vm1, %v4064_v48, 0.0  ;;  %4081 = vpow2.f32 %v1543_v35  ;;  %v1489_v43 = vmul.f32 1.442695, %v1397_v5  ;;  %v7521_v35 = vld [vmem:[#allocation37_spill] sm:$0xff] }
 0x1e2   :  { %7514 = vst [vmem:[#allocation103_spill] sm:$0xff] %v5449_v58  ;;  %v1714_v11 = vsel %vm1176_vm1, %v4066_v29, 0.0  ;;  %4083 = vpow2.f32 %v1549_v26  ;;  %v7523_v26 = vld [vmem:[#allocation45_spill] sm:$0xff] }
 0x1e3   :  { %4085 = vpow2.f32 %v1483_v50 }
 0x1e4   :  { %1709 = vadd.xlane.f32.xlu1 %v1708_v37  ;;  %v4068_v37 = vpop.eup %4067  ;;  %4087 = vpow2.f32 %v1489_v43  ;;  %v7526_v43 = vld [vmem:[#allocation47_spill] sm:$0xff] }
 0x1e5   :  { %1718 = vadd.xlane.f32.xlu0 %v1717_v14  ;;  %v1426_v14 = vsub.f32 %v7518_v40, %v5405_v34  ;;  %v5461_v47 = vpop.xlane.xlu0 %1268  ;;  %v4070_v8 = vpop.eup %4069  ;;  %v1723_v48 = vsel %vm1176_vm1, %v4068_v37, 0.0 }
 0x1e6   :  { %7519 = vst [vmem:[#allocation41_spill] sm:$0xff] %v5461_v47  ;;  %v4072_v53 = vpop.eup %4071  ;;  %v5469_v34 = vpop.xlane.xlu1 %1271  ;;  %v1624_v29 = vsel %vm1176_vm1, %v4070_v8, 0.0 }
 0x1e7   :  { %v1547_v54 = vmul.f32 1.442695, %v1426_v14  ;;  %7522 = vst [vmem:[#allocation37_spill] sm:$0xff] %v5469_v34  ;;  %v4074_v3 = vpop.eup %4073  ;;  %v1633_v37 = vsel %vm1176_vm1, %v4072_v53, 0.0  ;;  %v7525_v14 = vld [vmem:[#allocation38_spill] sm:$0xff] }
 0x1e8   :  { %1619 = vadd.xlane.f32.xlu1 %v1618_v30  ;;  %v7520_v30 = vld [vmem:[#allocation43_spill] sm:$0xff]  ;;  %v1720_v8 = vsel %vm1176_vm1, %v4074_v3, 0.0 }
 0x1e9   :  { %1628 = vadd.xlane.f32.xlu0 %v1627_v42  ;;  %v1429_v39 = vsub.f32 %v7520_v30, %v5449_v58  ;;  %v1396_v42 = vsub.f32 %v7521_v35, %v5417_v21  ;;  %v1399_v58 = vsub.f32 %v7523_v26, %v5461_v47  ;;  %4089 = vpow2.f32 %v1547_v54 }
 0x1ea   :  { %v1428_v21 = vsub.f32 %v7525_v14, %v5431_v56  ;;  %v5483_v40 = vpop.xlane.xlu1 %1367 }
 0x1eb   :  { %v1553_v5 = vmul.f32 1.442695, %v1429_v39  ;;  %v1487_v50 = vmul.f32 1.442695, %v1396_v42  ;;  %v1493_v39 = vmul.f32 1.442695, %v1399_v58 }
 0x1ec   :  { %1715 = vadd.xlane.f32.xlu1 %v1714_v11  ;;  %v4076_v11 = vpop.eup %4075  ;;  %7527 = vst [vmem:[#allocation104_spill] sm:$0xff] %v5483_v40  ;;  %v1551_v54 = vmul.f32 1.442695, %v1428_v21  ;;  %v7528_v42 = vld [vmem:[#allocation40_spill] sm:$0xff] }
 0x1ed   :  { %1724 = vadd.xlane.f32.xlu0 %v1723_v48  ;;  %v5475_v48 = vpop.xlane.xlu0 %1364  ;;  %v4078_v30 = vpop.eup %4077  ;;  %4091 = vpow2.f32 %v1553_v5  ;;  %v1729_v53 = vsel %vm1176_vm1, %v4076_v11, 0.0 }
 0x1ee   :  { %7524 = vst [vmem:[#allocation45_spill] sm:$0xff] %v5475_v48  ;;  %v1431_v47 = vsub.f32 %v7526_v43, %v5475_v48  ;;  %4093 = vpow2.f32 %v1487_v50  ;;  %v1630_v3 = vsel %vm1176_vm1, %v4078_v30, 0.0  ;;  %v7529_v48 = vld [vmem:[#allocation42_spill] sm:$0xff]  ;;  %v1952_v50 = vpop.permute.xlu1 %1951 }
 0x1ef   :  { %4095 = vpow2.f32 %v1493_v39 }
 0x1f0   :  { %1625 = vadd.xlane.f32.xlu1 %v1624_v29  ;;  %v4080_v29 = vpop.eup %4079  ;;  %v1557_v58 = vmul.f32 1.442695, %v1431_v47  ;;  %4097 = vpow2.f32 %v1551_v54  ;;  %v1945_v47 = vlaneseq }
 0x1f1   :  { %1634 = vadd.xlane.f32.xlu0 %v1633_v37  ;;  %v1398_v37 = vsub.f32 %v7528_v42, %v5443_v0  ;;  %v4082_v56 = vpop.eup %4081  ;;  %v1639_v5 = vsel %vm1176_vm1, %v4080_v29, 0.0  ;;  %v6014_v42 = vld [vmem:[%s7155_s1 + $0x28] sm:$0xff] }
 0x1f2   :  { %v1726_v21 = vsel %vm1176_vm1, %v4082_v56, 0.0  ;;  %4099 = vpow2.f32 %v1557_v58  ;;  %v1955_v0 = vpop.permute.xlu1 %1954  ;;  %v5497_v58 = vand.u32 127, %v1945_v47  ;;  %7629 = vst [vmem:[#allocation197_spill] sm:$0xff] %v6014_v42 }
 0x1f3   :  { %v1491_v11 = vmul.f32 1.442695, %v1398_v37 }
 0x1f4   :  { %1721 = vadd.xlane.f32.xlu1 %v1720_v8  ;;  %v4084_v8 = vpop.eup %4083  ;;  %vm2140_vm2 = vcmp.eq.s32.totalorder %v5497_v58, %v1952_v50  ;;  %vm2141_vm5 = vcmp.eq.s32.totalorder %v5497_v58, %v1955_v0 }
 0x1f5   :  { %1730 = vadd.xlane.f32.xlu0 %v1729_v53  ;;  %v1430_v53 = vsub.f32 %v7529_v48, %v5457_v60  ;;  %v4086_v43 = vpop.eup %4085  ;;  %v1735_v30 = vsel %vm1176_vm1, %v4084_v8, 0.0  ;;  %4101 = vpow2.f32 %v1491_v11 }
 0x1f6   :  { %v4088_v39 = vpop.eup %4087  ;;  %v1636_v37 = vsel %vm1176_vm1, %v4086_v43, 0.0 }
 0x1f7   :  { %v1555_v29 = vmul.f32 1.442695, %v1430_v53  ;;  %v1645_v60 = vsel %vm1176_vm1, %v4088_v39, 0.0 }
 0x1f8   :  { %1631 = vadd.xlane.f32.xlu1 %v1630_v3  ;;  %v7530_v3 = vld [vmem:[#allocation44_spill] sm:$0xff] }
 0x1f9   :  { %1640 = vadd.xlane.f32.xlu0 %v1639_v5  ;;  %v1400_v54 = vsub.f32 %v7530_v3, %v5469_v34  ;;  %v4090_v5 = vpop.eup %4089  ;;  %4103 = vpow2.f32 %v1555_v29 }
 0x1fa   :  { %v4092_v56 = vpop.eup %4091  ;;  %v1732_v53 = vsel %vm1176_vm1, %v4090_v5, 0.0 }
 0x1fb   :  { %v1495_v8 = vmul.f32 1.442695, %v1400_v54  ;;  %v1741_v43 = vsel %vm1176_vm1, %v4092_v56, 0.0 }
 0x1fc   :  { %1727 = vadd.xlane.f32.xlu1 %v1726_v21  ;;  %v7531_v21 = vld [vmem:[#allocation46_spill] sm:$0xff] }
 0x1fd   :  { %1736 = vadd.xlane.f32.xlu0 %v1735_v30  ;;  %v1432_v11 = vsub.f32 %v7531_v21, %v5483_v40  ;;  %v4094_v30 = vpop.eup %4093  ;;  %4105 = vpow2.f32 %v1495_v8  ;;  %v7277_v40 = vmov 0.0  }
 0x1fe   :  { %v4096_v34 = vpop.eup %4095  ;;  %v1642_v47 = vsel %vm1176_vm1, %v4094_v30, 0.0  ;;  %v3536_v5 = vsel %vm2140_vm2, 1.0, %v7277_v40  ;;  %vm2787_vm2 = vcmp.ne.s32.totalorder %v6014_v42, 255 }
 0x1ff   :  { %v1559_v39 = vmul.f32 1.442695, %v1432_v11  ;;  %v4098_v29 = vpop.eup %4097  ;;  %v1651_v54 = vsel %vm1176_vm1, %v4096_v34, 0.0  ;;  %v2332_v11 = vmul.f32 %v3536_v5, %v4887_v55 }
 0x200   :  { %1637 = vadd.xlane.f32.xlu1 %v1636_v37  ;;  %v4100_v37 = vpop.eup %4099  ;;  %v1738_v56 = vsel %vm1176_vm1, %v4098_v29, 0.0 }
 0x201   :  { %1646 = vadd.xlane.f32.xlu0 %v1645_v60  ;;  %v1958_v60 = vpop.permute.xlu1 %1957  ;;  %4107 = vpow2.f32 %v1559_v39  ;;  %v1747_v8 = vsel %vm1176_vm1, %v4100_v37, 0.0  ;;  %v1949_v39 = vpop.permute.xlu0 %1948 }
 0x202   :  { %vm2142_vm3 = vcmp.eq.s32.totalorder %v5497_v58, %v1958_v60  ;;  %v4102_v50 = vpop.eup %4101  ;;  %vm2139_vm4 = vcmp.eq.s32.totalorder %v5497_v58, %v1949_v39 }
 0x203   :  { %v1648_v34 = vsel %vm1176_vm1, %v4102_v50, 0.0  ;;  %v3535_v5 = vsel %vm2139_vm4, 1.0, %v7277_v40  ;;  %v7532_v50 = vld [vmem:[#allocation8_spill] sm:$0xff] }
 0x204   :  { %1733 = vadd.xlane.f32.xlu1 %v1732_v53  ;;  %v3538_v53 = vsel %vm2142_vm3, 1.0, %v7277_v40 }
 0x205   :  { %1742 = vadd.xlane.f32.xlu0 %v1741_v43  ;;  %v2398_v43 = vsel %vm1176_vm1, %v2332_v11, 0.0  ;;  %v2334_v60 = vmul.f32 %v3538_v53, %v4903_v24  ;;  %v3537_v11 = vsel %vm2141_vm5, 1.0, %v7277_v40 }
 0x206   :  { %v4104_v30 = vpop.eup %4103 }
 0x208   :  { %1643 = vadd.xlane.f32.xlu1 %v1642_v47  ;;  %v1744_v47 = vsel %vm1176_vm1, %v4104_v30, 0.0  ;;  %v7533_v30 = vld [vmem:[#allocation11_spill] sm:$0xff] }
 0x209   :  { %1652 = vadd.xlane.f32.xlu0 %v1651_v54  ;;  %v2404_v54 = vsel %vm1176_vm1, %v2334_v60, 0.0 }
 0x20a   :  { %v4106_v29 = vpop.eup %4105 }
 0x20b   :  { %v1654_v55 = vsel %vm1176_vm1, %v4106_v29, 0.0 }
 0x20c   :  { %1739 = vadd.xlane.f32.xlu1 %v1738_v56  ;;  %v1961_v56 = vpop.permute.xlu1 %1960 }
 0x20d   :  { %1748 = vadd.xlane.f32.xlu0 %v1747_v8  ;;  %v2331_v8 = vmul.f32 %v3535_v5, %v7532_v50  ;;  %vm2143_vm6 = vcmp.eq.s32.totalorder %v5497_v58, %v1961_v56  ;;  %v5548_v50 = vld [vmem:[%s7155_s1 + $0x30] sm:$0xff] }
 0x20e   :  { %v4108_v37 = vpop.eup %4107  ;;  %v3539_v60 = vsel %vm2143_vm6, 1.0, %v7277_v40  ;;  %7539 = vst [vmem:[#allocation108_spill] sm:$0xff] %v5548_v50  ;;  %vm2788_vm4 = vcmp.ne.s32.totalorder %v5548_v50, 255 }
 0x20f   :  { %v1750_v24 = vsel %vm1176_vm1, %v4108_v37, 0.0  ;;  %v2335_v39 = vmul.f32 %v3539_v60, %v4927_v17  ;;  %v5580_v60 = vld [vmem:[%s7155_s1 + $0x60] sm:$0xff] }
 0x210   :  { %1649 = vadd.xlane.f32.xlu1 %v1648_v34  ;;  %v1964_v53 = vpop.permute.xlu1 %1963  ;;  %v2395_v34 = vsel %vm1176_vm1, %v2331_v8, 0.0  ;;  %v5556_v8 = vld [vmem:[%s7155_s1 + $0x38] sm:$0xff] }
 0x211   :  { %2399 = vadd.xlane.f32.xlu0 %v2398_v43  ;;  %v2333_v43 = vmul.f32 %v3537_v11, %v7533_v30  ;;  %vm2144_vm7 = vcmp.eq.s32.totalorder %v5497_v58, %v1964_v53  ;;  %v2407_v29 = vsel %vm1176_vm1, %v2335_v39, 0.0  ;;  %v5564_v53 = vld [vmem:[%s7155_s1 + $0x40] sm:$0xff]  ;;  %v5572_v30 = vld [vmem:[%s7155_s1 + $0x50] sm:$0xff]  ;;  %vm2789_vm6 = vcmp.ne.s32.totalorder %v5556_v8, 255 }
 0x212   :  { %v5588_v39 = vld [vmem:[%s7155_s1 + $0x70] sm:$0xff] }
 0x213   :  { %v2401_v0 = vsel %vm1176_vm1, %v2333_v43, 0.0 }
 0x214   :  { %1745 = vadd.xlane.f32.xlu1 %v1744_v47  ;;  %v3540_v47 = vsel %vm2144_vm7, 1.0, %v7277_v40 }
 0x215   :  { %2405 = vadd.xlane.f32.xlu0 %v2404_v54  ;;  %v2336_v54 = vmul.f32 %v3540_v47, %v4925_v15 }
 0x217   :  { %v2410_v37 = vsel %vm1176_vm1, %v2336_v54, 0.0 }
 0x218   :  { %1655 = vadd.xlane.f32.xlu1 %v1654_v55 }
 0x21c   :  { %1751 = vadd.xlane.f32.xlu1 %v1750_v24 }
 0x220   :  { %2396 = vadd.xlane.f32.xlu1 %v2395_v34 }
 0x224   :  { %2402 = vadd.xlane.f32.xlu1 %v2401_v0 }
 0x228   :  { %2408 = vadd.xlane.f32.xlu1 %v2407_v29  ;;  %v5596_v29 = vld [vmem:[%s7155_s1 + $0x80] sm:$0xff] }
 0x229   :  { %v5534_v55 = vpop.xlane.xlu1 %1565 }
 0x22a   :  { %7534 = vst [vmem:[#allocation8_spill] sm:$0xff] %v5534_v55  ;;  %v5680_v55 = vpop.xlane.xlu0 %1562 }
 0x22b   :  { %7563 = vst [vmem:[#allocation132_spill] sm:$0xff] %v5680_v55 }
 0x22c   :  { %2411 = vadd.xlane.f32.xlu1 %v2410_v37  ;;  %v5604_v37 = vld [vmem:[%s7155_s1 + $0x90] sm:$0xff] }
 0x22d   :  { %v5537_v5 = vpop.xlane.xlu1 %1661 }
 0x22e   :  { %7535 = vst [vmem:[#allocation11_spill] sm:$0xff] %v5537_v5 }
 0x231   :  { %v5539_v56 = vpop.xlane.xlu1 %1571 }
 0x232   :  { %7536 = vst [vmem:[#allocation105_spill] sm:$0xff] %v5539_v56 }
 0x235   :  { %v5541_v24 = vpop.xlane.xlu1 %1667 }
 0x236   :  { %7537 = vst [vmem:[#allocation106_spill] sm:$0xff] %v5541_v24  ;;  %v5628_v24 = vld [vmem:[%s7155_s1 + $0xc0] sm:$0xff] }
 0x237   :  { %7550 = vst [vmem:[#allocation119_spill] sm:$0xff] %v5628_v24 }
 0x239   :  { %v5543_v17 = vpop.xlane.xlu1 %1577 }
 0x23a   :  { %7538 = vst [vmem:[#allocation107_spill] sm:$0xff] %v5543_v17 }
 0x23d   :  { %v5550_v15 = vpop.xlane.xlu1 %1673  ;;  %1966 = vperm.xlu1 %3852, %v5548_v50  }
 0x23e   :  { %7540 = vst [vmem:[#allocation109_spill] sm:$0xff] %v5550_v15 }
 0x241   :  { %v5558_v11 = vpop.xlane.xlu1 %1583  ;;  %1969 = vperm.xlu1 %3852, %v5556_v8  }
 0x242   :  { %7541 = vst [vmem:[#allocation110_spill] sm:$0xff] %v5558_v11 }
 0x245   :  { %v5566_v34 = vpop.xlane.xlu1 %1679  ;;  %1972 = vperm.xlu1 %3852, %v5564_v53  }
 0x246   :  { %7542 = vst [vmem:[#allocation111_spill] sm:$0xff] %v5566_v34 }
 0x249   :  { %v5574_v43 = vpop.xlane.xlu1 %1589  ;;  %1978 = vperm.xlu1 %3852, %v5572_v30  }
 0x24a   :  { %7543 = vst [vmem:[#allocation112_spill] sm:$0xff] %v5574_v43 }
 0x24d   :  { %v5582_v0 = vpop.xlane.xlu1 %1685  ;;  %1984 = vperm.xlu1 %3852, %v5580_v60  }
 0x24e   :  { %7544 = vst [vmem:[#allocation113_spill] sm:$0xff] %v5582_v0  ;;  %v5612_v0 = vld [vmem:[%s7155_s1 + $0xa0] sm:$0xff] }
 0x251   :  { %v5590_v47 = vpop.xlane.xlu1 %1595  ;;  %1990 = vperm.xlu1 %3852, %v5588_v39  }
 0x252   :  { %7545 = vst [vmem:[#allocation114_spill] sm:$0xff] %v5590_v47 }
 0x255   :  { %v5598_v54 = vpop.xlane.xlu1 %1691  ;;  %1996 = vperm.xlu1 %3852, %v5596_v29  }
 0x256   :  { %7546 = vst [vmem:[#allocation115_spill] sm:$0xff] %v5598_v54  ;;  %v5620_v54 = vld [vmem:[%s7155_s1 + $0xb0] sm:$0xff] }
 0x259   :  { %v5606_v40 = vpop.xlane.xlu1 %1601  ;;  %2002 = vperm.xlu1 %3852, %v5604_v37  }
 0x25a   :  { %7547 = vst [vmem:[#allocation116_spill] sm:$0xff] %v5606_v40 }
 0x25d   :  { %v5614_v34 = vpop.xlane.xlu1 %1697  ;;  %2008 = vperm.xlu1 %3852, %v5612_v0  }
 0x25e   :  { %7548 = vst [vmem:[#allocation117_spill] sm:$0xff] %v5614_v34  ;;  %v5636_v34 = vld [vmem:[%s7155_s1 + $0xd0] sm:$0xff] }
 0x25f   :  { %7552 = vst [vmem:[#allocation121_spill] sm:$0xff] %v5636_v34 }
 0x261   :  { %v5622_v15 = vpop.xlane.xlu1 %1607  ;;  %2014 = vperm.xlu1 %3852, %v5620_v54  }
 0x262   :  { %7549 = vst [vmem:[#allocation118_spill] sm:$0xff] %v5622_v15  ;;  %v5644_v15 = vld [vmem:[%s7155_s1 + $0xe0] sm:$0xff] }
 0x263   :  { %7554 = vst [vmem:[#allocation123_spill] sm:$0xff] %v5644_v15 }
 0x265   :  { %v5630_v5 = vpop.xlane.xlu1 %1703  ;;  %2020 = vperm.xlu1 %3852, %v5628_v24  }
 0x266   :  { %7551 = vst [vmem:[#allocation120_spill] sm:$0xff] %v5630_v5  ;;  %v5652_v5 = vld [vmem:[%s7155_s1 + $0xf0] sm:$0xff] }
 0x267   :  { %7556 = vst [vmem:[#allocation125_spill] sm:$0xff] %v5652_v5 }
 0x269   :  { %v5638_v40 = vpop.xlane.xlu1 %1613  ;;  %2026 = vperm.xlu1 %3852, %v5636_v34   ;;  %v5980_v34 = vld [vmem:[%s7155_s1 + $0x18] sm:$0xff] }
 0x26a   :  { %7553 = vst [vmem:[#allocation122_spill] sm:$0xff] %v5638_v40  ;;  %v5660_v40 = vld [vmem:[%s7155_s1 + $0x100] sm:$0xff]  ;;  %7625 = vst [vmem:[#allocation193_spill] sm:$0xff] %v5980_v34  ;;  %vm2785_vm15 = vcmp.ne.s32.totalorder %v5980_v34, 255 }
 0x26b   :  { %7558 = vst [vmem:[#allocation127_spill] sm:$0xff] %v5660_v40 }
 0x26d   :  { %v5646_v47 = vpop.xlane.xlu1 %1709  ;;  %2032 = vperm.xlu1 %3852, %v5644_v15  }
 0x26e   :  { %7555 = vst [vmem:[#allocation124_spill] sm:$0xff] %v5646_v47  ;;  %v116_v47 = vld [vmem:[%s7155_s1 + $0x110] sm:$0xff] }
 0x271   :  { %v5654_v43 = vpop.xlane.xlu1 %1619  ;;  %2038 = vperm.xlu1 %3852, %v5652_v5  }
 0x272   :  { %7557 = vst [vmem:[#allocation126_spill] sm:$0xff] %v5654_v43  ;;  %v119_v43 = vld [vmem:[%s7155_s1 + $0x128] sm:$0xff] }
 0x275   :  { %v5662_v11 = vpop.xlane.xlu1 %1715  ;;  %2044 = vperm.xlu1 %3852, %v5660_v40  }
 0x276   :  { %7559 = vst [vmem:[#allocation128_spill] sm:$0xff] %v5662_v11  ;;  %v120_v11 = vld [vmem:[%s7155_s1 + $0x130] sm:$0xff] }
 0x279   :  { %v5668_v17 = vpop.xlane.xlu1 %1625  ;;  %2050 = vperm.xlu1 %3852, %v116_v47   ;;  %v122_v47 = vld [vmem:[%s7155_s1 + $0x140] sm:$0xff] }
 0x27a   :  { %7560 = vst [vmem:[#allocation129_spill] sm:$0xff] %v5668_v17 }
 0x27d   :  { %v5673_v21 = vpop.xlane.xlu1 %1721  ;;  %2059 = vperm.xlu1 %3852, %v119_v43   ;;  %v123_v43 = vld [vmem:[%s7155_s1 + $0x148] sm:$0xff] }
 0x27e   :  { %7561 = vst [vmem:[#allocation130_spill] sm:$0xff] %v5673_v21  ;;  %v5690_v21 = vpop.xlane.xlu0 %1658 }
 0x27f   :  { %7565 = vst [vmem:[#allocation134_spill] sm:$0xff] %v5690_v21 }
 0x281   :  { %v5678_v56 = vpop.xlane.xlu1 %1631  ;;  %2062 = vperm.xlu1 %3852, %v120_v11  }
 0x282   :  { %7562 = vst [vmem:[#allocation131_spill] sm:$0xff] %v5678_v56  ;;  %v5696_v11 = vpop.xlane.xlu0 %1568 }
 0x283   :  { %7568 = vst [vmem:[#allocation137_spill] sm:$0xff] %v5696_v11 }
 0x285   :  { %v5685_v17 = vpop.xlane.xlu1 %1727  ;;  %2068 = vperm.xlu1 %3852, %v122_v47  }
 0x286   :  { %7564 = vst [vmem:[#allocation133_spill] sm:$0xff] %v5685_v17  ;;  %v5700_v14 = vpop.xlane.xlu0 %1664 }
 0x287   :  { %7570 = vst [vmem:[#allocation139_spill] sm:$0xff] %v5700_v14 }
 0x289   :  { %v5692_v48 = vpop.xlane.xlu1 %1637  ;;  %2071 = vperm.xlu1 %3852, %v123_v43  }
 0x28a   :  { %7566 = vst [vmem:[#allocation135_spill] sm:$0xff] %v5692_v48  ;;  %v5706_v17 = vpop.xlane.xlu0 %1574 }
 0x28b   :  { %7573 = vst [vmem:[#allocation142_spill] sm:$0xff] %v5706_v17 }
 0x28d   :  { %v5694_v56 = vpop.xlane.xlu1 %1733 }
 0x28e   :  { %7567 = vst [vmem:[#allocation136_spill] sm:$0xff] %v5694_v56  ;;  %v5710_v21 = vpop.xlane.xlu0 %1670 }
 0x28f   :  { %7575 = vst [vmem:[#allocation144_spill] sm:$0xff] %v5710_v21 }
 0x291   :  { %v5698_v55 = vpop.xlane.xlu1 %1643 }
 0x292   :  { %7569 = vst [vmem:[#allocation138_spill] sm:$0xff] %v5698_v55  ;;  %v5716_v56 = vpop.xlane.xlu0 %1580 }
 0x293   :  { %7578 = vst [vmem:[#allocation147_spill] sm:$0xff] %v5716_v56 }
 0x295   :  { %v5702_v23 = vpop.xlane.xlu1 %1739 }
 0x296   :  { %7571 = vst [vmem:[#allocation140_spill] sm:$0xff] %v5702_v23  ;;  %v5720_v55 = vpop.xlane.xlu0 %1676 }
 0x297   :  { %7580 = vst [vmem:[#allocation149_spill] sm:$0xff] %v5720_v55 }
 0x299   :  { %v5704_v47 = vpop.xlane.xlu1 %1649 }
 0x29a   :  { %7572 = vst [vmem:[#allocation141_spill] sm:$0xff] %v5704_v47  ;;  %v5726_v47 = vpop.xlane.xlu0 %1586 }
 0x29b   :  { %7583 = vst [vmem:[#allocation152_spill] sm:$0xff] %v5726_v47 }
 0x29d   :  { %v5708_v41 = vpop.xlane.xlu1 %1745 }
 0x29e   :  { %7574 = vst [vmem:[#allocation143_spill] sm:$0xff] %v5708_v41  ;;  %v5730_v41 = vpop.xlane.xlu0 %1682 }
 0x29f   :  { %7585 = vst [vmem:[#allocation154_spill] sm:$0xff] %v5730_v41 }
 0x2a1   :  { %v5712_v48 = vpop.xlane.xlu1 %1655 }
 0x2a2   :  { %7576 = vst [vmem:[#allocation145_spill] sm:$0xff] %v5712_v48  ;;  %v5735_v16 = vpop.xlane.xlu0 %1592 }
 0x2a3   :  { %7587 = vst [vmem:[#allocation155_spill] sm:$0xff] %v5735_v16  ;;  %v5829_v16 = vld [vmem:[%s7155_s1 + $0xe8] sm:$0xff] }
 0x2a4   :  { %7600 = vst [vmem:[#allocation168_spill] sm:$0xff] %v5829_v16 }
 0x2a5   :  { %v5714_v43 = vpop.xlane.xlu1 %1751 }
 0x2a6   :  { %7577 = vst [vmem:[#allocation146_spill] sm:$0xff] %v5714_v43  ;;  %v7586_v43 = vmov 0.0  }
 0x2a7   :  { %v3606_v33 = vsel %vm2789_vm6, 1.0, %v7586_v43 }
 0x2a9   :  { %v5718_v11 = vpop.xlane.xlu1 %2396 }
 0x2aa   :  { %7579 = vst [vmem:[#allocation148_spill] sm:$0xff] %v5718_v11 }
 0x2ad   :  { %v5722_v14 = vpop.xlane.xlu1 %2402 }
 0x2ae   :  { %7581 = vst [vmem:[#allocation150_spill] sm:$0xff] %v5722_v14 }
 0x2b1   :  { %v5724_v23 = vpop.xlane.xlu1 %2408 }
 0x2b2   :  { %7582 = vst [vmem:[#allocation151_spill] sm:$0xff] %v5724_v23 }
 0x2b5   :  { %v5728_v17 = vpop.xlane.xlu1 %2411 }
 0x2b6   :  { %7584 = vst [vmem:[#allocation153_spill] sm:$0xff] %v5728_v17 }
 0x2b9   :  { %v1967_v21 = vpop.permute.xlu1 %1966 }
 0x2ba   :  { %vm2145_vm8 = vcmp.eq.s32.totalorder %v5497_v58, %v1967_v21 }
 0x2bb   :  { %v3541_v48 = vsel %vm2145_vm8, 1.0, %v7586_v43 }
 0x2bc   :  { %v2337_v56 = vmul.f32 %v3541_v48, %v4945_v57  ;;  %v5744_v57 = vpop.xlane.xlu0 %1688 }
 0x2bd   :  { %v1970_v11 = vpop.permute.xlu1 %1969  ;;  %7588 = vst [vmem:[#allocation156_spill] sm:$0xff] %v5744_v57 }
 0x2be   :  { %vm2146_vm9 = vcmp.eq.s32.totalorder %v5497_v58, %v1970_v11  ;;  %v2413_v55 = vsel %vm1176_vm1, %v2337_v56, 0.0 }
 0x2bf   :  { %v3542_v23 = vsel %vm2146_vm9, 1.0, %v7586_v43  ;;  %2414 = vadd.xlane.f32.xlu0 %v2413_v55  ;;  %vm7336_vm9 = vcmp.ne.s32.totalorder %v5564_v53, 255 }
 0x2c0   :  { %v2338_v17 = vmul.f32 %v3542_v23, %v4943_v4  ;;  %v5748_v56 = vpop.xlane.xlu0 %1598  ;;  %v5755_v4 = vld [vmem:[%s7155_s1 + $0x48] sm:$0xff] }
 0x2c1   :  { %v1973_v41 = vpop.permute.xlu1 %1972  ;;  %7589 = vst [vmem:[#allocation157_spill] sm:$0xff] %v5748_v56  ;;  %v5769_v23 = vld [vmem:[%s7155_s1 + $0x68] sm:$0xff] }
 0x2c2   :  { %vm2147_vm10 = vcmp.eq.s32.totalorder %v5497_v58, %v1973_v41  ;;  %v2416_v21 = vsel %vm1176_vm1, %v2338_v17, 0.0  ;;  %v5777_v17 = vld [vmem:[%s7155_s1 + $0x78] sm:$0xff] }
 0x2c3   :  { %v3543_v14 = vsel %vm2147_vm10, 1.0, %v7586_v43  ;;  %2417 = vadd.xlane.f32.xlu1 %v2416_v21 }
 0x2c4   :  { %v2339_v48 = vmul.f32 %v3543_v14, %v4963_v25  ;;  %v5750_v55 = vpop.xlane.xlu0 %1694  ;;  %v5763_v25 = vld [vmem:[%s7155_s1 + $0x58] sm:$0xff] }
 0x2c5   :  { %7590 = vst [vmem:[#allocation158_spill] sm:$0xff] %v5750_v55  ;;  %v5799_v55 = vld [vmem:[%s7155_s1 + $0xa8] sm:$0xff]  ;;  %v5906_v13 = vpop.permute.xlu1 %1978 }
 0x2c6   :  { %v2419_v11 = vsel %vm1176_vm1, %v2339_v48, 0.0  ;;  %v5785_v48 = vld [vmem:[%s7155_s1 + $0x88] sm:$0xff]  ;;  %vm2149_vm3 = vcmp.eq.s32.totalorder %v5497_v58, %v5906_v13  ;;  %v140_v13 = vld [vmem:[%s7155_s1 + $0x1d0] sm:$0xff] }
 0x2c7   :  { %2420 = vadd.xlane.f32.xlu1 %v2419_v11  ;;  %v5791_v11 = vld [vmem:[%s7155_s1 + $0x98] sm:$0xff]  ;;  %v3545_v42 = vsel %vm2149_vm3, 1.0, %v7586_v43 }
 0x2c8   :  { %v5758_v41 = vpop.xlane.xlu0 %1604 }
 0x2c9   :  { %7591 = vst [vmem:[#allocation159_spill] sm:$0xff] %v5758_v41  ;;  %v5913_v52 = vpop.permute.xlu1 %1984 }
 0x2ca   :  { %vm2151_vm8 = vcmp.eq.s32.totalorder %v5497_v58, %v5913_v52  ;;  %v142_v52 = vld [vmem:[%s7155_s1 + $0x1e0] sm:$0xff] }
 0x2cc   :  { %v5771_v14 = vpop.xlane.xlu0 %1700 }
 0x2cd   :  { %7592 = vst [vmem:[#allocation160_spill] sm:$0xff] %v5771_v14 }
 0x2d0   :  { %v5780_v21 = vpop.xlane.xlu0 %1610 }
 0x2d1   :  { %7593 = vst [vmem:[#allocation161_spill] sm:$0xff] %v5780_v21  ;;  %v5807_v21 = vld [vmem:[%s7155_s1 + $0xb8] sm:$0xff] }
 0x2d4   :  { %v5793_v14 = vpop.xlane.xlu0 %1706 }
 0x2d5   :  { %1975 = vperm.xlu0 %3851, %v5755_v4   ;;  %7594 = vst [vmem:[#allocation162_spill] sm:$0xff] %v5793_v14  ;;  %v5813_v14 = vld [vmem:[%s7155_s1 + $0xc8] sm:$0xff] }
 0x2d6   :  { %7596 = vst [vmem:[#allocation164_spill] sm:$0xff] %v5813_v14 }
 0x2d8   :  { %v5802_v57 = vpop.xlane.xlu0 %1616 }
 0x2d9   :  { %1981 = vperm.xlu0 %3851, %v5763_v25   ;;  %7595 = vst [vmem:[#allocation163_spill] sm:$0xff] %v5802_v57  ;;  %v5821_v57 = vld [vmem:[%s7155_s1 + $0xd8] sm:$0xff] }
 0x2da   :  { %7598 = vst [vmem:[#allocation166_spill] sm:$0xff] %v5821_v57 }
 0x2dc   :  { %v5815_v41 = vpop.xlane.xlu0 %1712 }
 0x2dd   :  { %1987 = vperm.xlu0 %3851, %v5769_v23   ;;  %7597 = vst [vmem:[#allocation165_spill] sm:$0xff] %v5815_v41  ;;  %v5835_v41 = vld [vmem:[%s7155_s1 + $0xf8] sm:$0xff] }
 0x2de   :  { %7601 = vst [vmem:[#allocation169_spill] sm:$0xff] %v5835_v41 }
 0x2e0   :  { %v5824_v56 = vpop.xlane.xlu0 %1622 }
 0x2e1   :  { %1993 = vperm.xlu0 %3851, %v5777_v17   ;;  %7599 = vst [vmem:[#allocation167_spill] sm:$0xff] %v5824_v56  ;;  %v5843_v56 = vld [vmem:[%s7155_s1 + $0x108] sm:$0xff] }
 0x2e2   :  { %7603 = vst [vmem:[#allocation171_spill] sm:$0xff] %v5843_v56 }
 0x2e4   :  { %v5837_v47 = vpop.xlane.xlu0 %1718 }
 0x2e5   :  { %1999 = vperm.xlu0 %3851, %v5785_v48   ;;  %7602 = vst [vmem:[#allocation170_spill] sm:$0xff] %v5837_v47  ;;  %v5857_v47 = vld [vmem:[%s7155_s1 + $0x120] sm:$0xff] }
 0x2e6   :  { %7606 = vst [vmem:[#allocation174_spill] sm:$0xff] %v5857_v47 }
 0x2e8   :  { %v5846_v9 = vpop.xlane.xlu0 %1628 }
 0x2e9   :  { %2005 = vperm.xlu0 %3851, %v5791_v11   ;;  %7604 = vst [vmem:[#allocation172_spill] sm:$0xff] %v5846_v9  ;;  %v5865_v9 = vld [vmem:[%s7155_s1 + $0x138] sm:$0xff] }
 0x2ea   :  { %7608 = vst [vmem:[#allocation176_spill] sm:$0xff] %v5865_v9 }
 0x2ec   :  { %v5859_v40 = vpop.xlane.xlu0 %1724 }
 0x2ed   :  { %2011 = vperm.xlu0 %3851, %v5799_v55   ;;  %7607 = vst [vmem:[#allocation175_spill] sm:$0xff] %v5859_v40  ;;  %v5879_v40 = vld [vmem:[%s7155_s1 + $0x158] sm:$0xff] }
 0x2ee   :  { %7611 = vst [vmem:[#allocation179_spill] sm:$0xff] %v5879_v40 }
 0x2f1   :  { %2017 = vperm.xlu0 %3851, %v5807_v21  }
 0x2f5   :  { %2023 = vperm.xlu0 %3851, %v5813_v14  }
 0x2f9   :  { %2029 = vperm.xlu0 %3851, %v5821_v57  }
 0x2fd   :  { %2035 = vperm.xlu0 %3851, %v5829_v16  }
 0x301   :  { %2041 = vperm.xlu0 %3851, %v5835_v41   ;;  %v5923_v41 = vpop.permute.xlu1 %1990 }
 0x302   :  { %vm2153_vm3 = vcmp.eq.s32.totalorder %v5497_v58, %v5923_v41  ;;  %v144_v41 = vld [vmem:[%s7155_s1 + $0x1f0] sm:$0xff] }
 0x305   :  { %2047 = vperm.xlu0 %3851, %v5843_v56   ;;  %v5868_v56 = vpop.xlane.xlu0 %1634  ;;  %v5930_v16 = vpop.permute.xlu1 %1996 }
 0x306   :  { %7609 = vst [vmem:[#allocation177_spill] sm:$0xff] %v5868_v56  ;;  %v5887_v56 = vld [vmem:[%s7155_s1 + $0x160] sm:$0xff] }
 0x307   :  { %7613 = vst [vmem:[#allocation181_spill] sm:$0xff] %v5887_v56 }
 0x309   :  { %2053 = vperm.xlu0 %3851, %v5851_v19   ;;  %v5873_v19 = vld [vmem:[%s7155_s1 + $0x150] sm:$0xff]  ;;  %v5958_v5 = vpop.permute.xlu1 %2002 }
 0x30a   :  { %7610 = vst [vmem:[#allocation178_spill] sm:$0xff] %v5873_v19 }
 0x30d   :  { %2056 = vperm.xlu0 %3851, %v5857_v47   ;;  %v5881_v47 = vpop.xlane.xlu0 %1730 }
 0x30e   :  { %7612 = vst [vmem:[#allocation180_spill] sm:$0xff] %v5881_v47  ;;  %v128_v47 = vld [vmem:[%s7155_s1 + $0x170] sm:$0xff] }
 0x311   :  { %2065 = vperm.xlu0 %3851, %v5865_v9   ;;  %v5890_v9 = vpop.xlane.xlu0 %1640 }
 0x312   :  { %7614 = vst [vmem:[#allocation182_spill] sm:$0xff] %v5890_v9 }
 0x315   :  { %2074 = vperm.xlu0 %3851, %v5873_v19   ;;  %v5895_v19 = vld [vmem:[%s7155_s1 + $0x168] sm:$0xff] }
 0x316   :  { %7615 = vst [vmem:[#allocation183_spill] sm:$0xff] %v5895_v19 }
 0x319   :  { %2077 = vperm.xlu0 %3851, %v5879_v40   ;;  %v5901_v40 = vpop.xlane.xlu0 %1736 }
 0x31a   :  { %7616 = vst [vmem:[#allocation184_spill] sm:$0xff] %v5901_v40 }
 0x31d   :  { %2080 = vperm.xlu0 %3851, %v5887_v56   ;;  %v129_v56 = vld [vmem:[%s7155_s1 + $0x178] sm:$0xff]  ;;  %v5908_v9 = vpop.xlane.xlu0 %1646 }
 0x31e   :  { %7617 = vst [vmem:[#allocation185_spill] sm:$0xff] %v5908_v9 }
 0x321   :  { %2083 = vperm.xlu0 %3851, %v5895_v19   ;;  %v130_v19 = vld [vmem:[%s7155_s1 + $0x180] sm:$0xff]  ;;  %v5918_v40 = vpop.xlane.xlu0 %1742 }
 0x322   :  { %7618 = vst [vmem:[#allocation186_spill] sm:$0xff] %v5918_v40 }
 0x325   :  { %2086 = vperm.xlu0 %3851, %v128_v47   ;;  %v131_v47 = vld [vmem:[%s7155_s1 + $0x188] sm:$0xff]  ;;  %v5925_v9 = vpop.xlane.xlu0 %1652 }
 0x326   :  { %7619 = vst [vmem:[#allocation187_spill] sm:$0xff] %v5925_v9  ;;  %v135_v9 = vld [vmem:[%s7155_s1 + $0x1a8] sm:$0xff] }
 0x329   :  { %2089 = vperm.xlu0 %3851, %v129_v56   ;;  %v132_v56 = vld [vmem:[%s7155_s1 + $0x190] sm:$0xff]  ;;  %v5935_v40 = vpop.xlane.xlu0 %1748 }
 0x32a   :  { %7620 = vst [vmem:[#allocation188_spill] sm:$0xff] %v5935_v40 }
 0x32d   :  { %2092 = vperm.xlu0 %3851, %v130_v19   ;;  %v133_v19 = vld [vmem:[%s7155_s1 + $0x198] sm:$0xff]  ;;  %v5971_v57 = vpop.xlane.xlu0 %2399 }
 0x32e   :  { %7624 = vst [vmem:[#allocation192_spill] sm:$0xff] %v5971_v57  ;;  %v5997_v57 = vld [vmem:[%s7155_s1 + $0x20] sm:$0xff] }
 0x32f   :  { %7627 = vst [vmem:[#allocation195_spill] sm:$0xff] %v5997_v57  ;;  %vm2786_vm0 = vcmp.ne.s32.totalorder %v5997_v57, 255 }
 0x331   :  { %2095 = vperm.xlu0 %3851, %v131_v47   ;;  %v134_v47 = vld [vmem:[%s7155_s1 + $0x1a0] sm:$0xff] }
 0x335   :  { %2098 = vperm.xlu0 %3851, %v132_v56   ;;  %v5946_v56 = vld [vmem:[%s7155_s1] sm:$0xff] }
 0x336   :  { %7622 = vst [vmem:[#allocation190_spill] sm:$0xff] %v5946_v56  ;;  %vm2782_vm12 = vcmp.ne.s32.totalorder %v5946_v56, 255 }
 0x337   :  { %v3599_v40 = vsel %vm2782_vm12, 1.0, %v7586_v43 }
 0x338   :  { %v3303_v32 = vsel %vm3038_vm13, %v3599_v40, 0.0  ;;  %v5986_v40 = vpop.permute.xlu1 %2008 }
 0x339   :  { %2101 = vperm.xlu0 %3851, %v133_v19   ;;  %v3600_v19 = vsel %vm2783_vm11, 1.0, %v7586_v43 }
 0x33a   :  { %v3304_v15 = vsel %vm3038_vm13, %v3600_v19, 0.0  ;;  %v136_v19 = vld [vmem:[%s7155_s1 + $0x1b0] sm:$0xff] }
 0x33b   :  { %v3305_v6 = vadd.f32 %v3304_v15, %v3303_v32  ;;  %v137_v32 = vld [vmem:[%s7155_s1 + $0x1b8] sm:$0xff] }
 0x33c   :  { %v6006_v34 = vpop.permute.xlu1 %2014 }
 0x33d   :  { %2104 = vperm.xlu0 %3851, %v134_v47   ;;  %v5964_v47 = vld [vmem:[%s7155_s1 + $0x10] sm:$0xff] }
 0x33e   :  { %7623 = vst [vmem:[#allocation191_spill] sm:$0xff] %v5964_v47  ;;  %vm2784_vm14 = vcmp.ne.s32.totalorder %v5964_v47, 255 }
 0x33f   :  { %v3601_v56 = vsel %vm2784_vm14, 1.0, %v7586_v43 }
 0x340   :  { %v3306_v3 = vsel %vm3038_vm13, %v3601_v56, 0.0  ;;  %v5991_v56 = vpop.xlane.xlu0 %2405  ;;  %v6032_v57 = vpop.permute.xlu1 %2020 }
 0x341   :  { %2107 = vperm.xlu0 %3851, %v135_v9   ;;  %v3602_v9 = vsel %vm2785_vm15, 1.0, %v7586_v43  ;;  %v3307_v15 = vadd.f32 %v3306_v3, %v3305_v6  ;;  %7626 = vst [vmem:[#allocation194_spill] sm:$0xff] %v5991_v56  ;;  %v138_v6 = vld [vmem:[%s7155_s1 + $0x1c0] sm:$0xff] }
 0x342   :  { %v3308_v47 = vsel %vm3038_vm13, %v3602_v9, 0.0 }
 0x343   :  { %v3309_v3 = vadd.f32 %v3308_v47, %v3307_v15  ;;  %v139_v47 = vld [vmem:[%s7155_s1 + $0x1c8] sm:$0xff] }
 0x345   :  { %2110 = vperm.xlu0 %3851, %v136_v19   ;;  %v3603_v19 = vsel %vm2786_vm0, 1.0, %v7586_v43 }
 0x346   :  { %v3310_v56 = vsel %vm3038_vm13, %v3603_v19, 0.0 }
 0x347   :  { %v3311_v15 = vadd.f32 %v3310_v56, %v3309_v3 }
 0x348   :  { %v6008_v9 = vpop.xlane.xlu0 %2414 }
 0x349   :  { %2113 = vperm.xlu0 %3851, %v137_v32   ;;  %7628 = vst [vmem:[#allocation196_spill] sm:$0xff] %v6008_v9  ;;  %v3604_v32 = vsel %vm2787_vm2, 1.0, %v7586_v43 }
 0x34a   :  { %v3312_v9 = vsel %vm3038_vm13, %v3604_v32, 0.0 }
 0x34b   :  { %v3313_v3 = vadd.f32 %v3312_v9, %v3311_v15 }
 0x34d   :  { %2116 = vperm.xlu0 %3851, %v138_v6   ;;  %v3605_v6 = vsel %vm2788_vm4, 1.0, %v7586_v43 }
 0x34e   :  { %v3314_v32 = vsel %vm3038_vm13, %v3605_v6, 0.0  ;;  %v3547_v6 = vsel %vm2151_vm8, 1.0, %v7586_v43  ;;  %vm7326_vm8 = vcmp.ne.s32.totalorder %v5572_v30, 255 }
 0x350   :  { %v1976_v19 = vpop.permute.xlu0 %1975 }
 0x351   :  { %vm2148_vm5 = vcmp.eq.s32.totalorder %v5497_v58, %v1976_v19  ;;  %2119 = vperm.xlu0 %3851, %v139_v47   ;;  %v2341_v19 = vmul.f32 %v3545_v42, %v4981_v45  ;;  %v3316_v45 = vsel %vm3038_vm13, %v3606_v33, 0.0 }
 0x352   :  { %v3544_v14 = vsel %vm2148_vm5, 1.0, %v7586_v43  ;;  %vm7331_vm5 = vcmp.ne.s32.totalorder %v5755_v4, 255 }
 0x353   :  { %v2340_v56 = vmul.f32 %v3544_v14, %v4961_v31  ;;  %v141_v31 = vld [vmem:[%s7155_s1 + $0x1d8] sm:$0xff]  ;;  %v6053_v14 = vpop.permute.xlu1 %2026  ;;  %v2425_v42 = vsel %vm1176_vm1, %v2341_v19, 0.0  ;;  %v143_v19 = vld [vmem:[%s7155_s1 + $0x1e8] sm:$0xff] }
 0x354   :  { %v1982_v50 = vpop.permute.xlu0 %1981 }
 0x355   :  { %vm2150_vm7 = vcmp.eq.s32.totalorder %v5497_v58, %v1982_v50  ;;  %2122 = vperm.xlu0 %3851, %v140_v13   ;;  %v2422_v47 = vsel %vm1176_vm1, %v2340_v56, 0.0  ;;  %v3315_v50 = vadd.f32 %v3314_v32, %v3313_v3  ;;  %v3607_v13 = vsel %vm7336_vm9, 1.0, %v7586_v43 }
 0x356   :  { %v3546_v24 = vsel %vm2150_vm7, 1.0, %v7586_v43  ;;  %2423 = vadd.xlane.f32.xlu1 %v2422_v47  ;;  %v3318_v3 = vsel %vm3038_vm13, %v3607_v13, 0.0 }
 0x357   :  { %v2342_v15 = vmul.f32 %v3546_v24, %v4979_v22  ;;  %v3317_v33 = vadd.f32 %v3316_v45, %v3315_v50  ;;  %v2343_v24 = vmul.f32 %v3547_v6, %v4999_v12  ;;  %v6070_v32 = vpop.permute.xlu1 %2032  ;;  %v3608_v12 = vsel %vm7331_vm5, 1.0, %v7586_v43 }
 0x358   :  { %v1988_v9 = vpop.permute.xlu0 %1987 }
 0x359   :  { %2125 = vperm.xlu0 %3851, %v141_v31   ;;  %vm2152_vm10 = vcmp.eq.s32.totalorder %v5497_v58, %v1988_v9  ;;  %v2428_v22 = vsel %vm1176_vm1, %v2342_v15, 0.0  ;;  %v3319_v31 = vadd.f32 %v3318_v3, %v3317_v33  ;;  %v2431_v9 = vsel %vm1176_vm1, %v2343_v24, 0.0 }
 0x35a   :  { %2426 = vadd.xlane.f32.xlu1 %v2425_v42  ;;  %v3548_v47 = vsel %vm2152_vm10, 1.0, %v7586_v43  ;;  %v3320_v42 = vsel %vm3038_vm13, %v3608_v12, 0.0  ;;  %v3549_v15 = vsel %vm2153_vm3, 1.0, %v7586_v43  ;;  %v3609_v3 = vsel %vm7326_vm8, 1.0, %v7586_v43 }
 0x35b   :  { %v2344_v45 = vmul.f32 %v3548_v47, %v4997_v10  ;;  %v6090_v6 = vpop.permute.xlu1 %2038  ;;  %v2345_v33 = vmul.f32 %v3549_v15, %v5017_v36  ;;  %v3322_v24 = vsel %vm3038_vm13, %v3609_v3, 0.0  ;;  %vm2155_vm10 = vcmp.eq.s32.totalorder %v5497_v58, %v5930_v16 }
 0x35c   :  { %v1994_v56 = vpop.permute.xlu0 %1993  ;;  %vm7327_vm3 = vcmp.ne.s32.totalorder %v5763_v25, 255  ;;  %vm7328_vm8 = vcmp.ne.s32.totalorder %v5580_v60, 255  ;;  %vm2169_vm5 = vcmp.eq.s32.totalorder %v5497_v58, %v6090_v6 }
 0x35d   :  { %2128 = vperm.xlu0 %3851, %v142_v52   ;;  %vm2154_vm7 = vcmp.eq.s32.totalorder %v5497_v58, %v1994_v56  ;;  %v3321_v52 = vadd.f32 %v3320_v42, %v3319_v31  ;;  %v2434_v10 = vsel %vm1176_vm1, %v2344_v45, 0.0  ;;  %v145_v56 = vld [vmem:[%s7155_s1 + $0x1f8] sm:$0xff]  ;;  %v2437_v36 = vsel %vm1176_vm1, %v2345_v33, 0.0 }
 0x35e   :  { %2429 = vadd.xlane.f32.xlu1 %v2428_v22  ;;  %v3550_v22 = vsel %vm2154_vm7, 1.0, %v7586_v43  ;;  %v3610_v12 = vsel %vm7327_vm3, 1.0, %v7586_v43  ;;  %vm7329_vm3 = vcmp.ne.s32.totalorder %v5769_v23, 255 }
 0x35f   :  { %v2346_v31 = vmul.f32 %v3550_v22, %v5015_v63  ;;  %v6114_v45 = vpop.permute.xlu1 %2044  ;;  %v3324_v16 = vsel %vm3038_vm13, %v3610_v12, 0.0 }
 0x360   :  { %v2000_v50 = vpop.permute.xlu0 %1999 }
 0x361   :  { %2131 = vperm.xlu0 %3851, %v143_v19   ;;  %v3323_v19 = vadd.f32 %v3322_v24, %v3321_v52  ;;  %vm2156_vm7 = vcmp.eq.s32.totalorder %v5497_v58, %v2000_v50  ;;  %v2440_v63 = vsel %vm1176_vm1, %v2346_v31, 0.0  ;;  %v3611_v52 = vsel %vm7328_vm8, 1.0, %v7586_v43 }
 0x362   :  { %2432 = vadd.xlane.f32.xlu1 %v2431_v9  ;;  %v3551_v9 = vsel %vm2155_vm10, 1.0, %v7586_v43  ;;  %v3326_v33 = vsel %vm3038_vm13, %v3611_v52, 0.0  ;;  %vm2157_vm10 = vcmp.eq.s32.totalorder %v5497_v58, %v5958_v5  ;;  %v3612_v24 = vsel %vm7329_vm3, 1.0, %v7586_v43 }
 0x363   :  { %v3325_v15 = vadd.f32 %v3324_v16, %v3323_v19  ;;  %v6130_v50 = vpop.permute.xlu1 %2050  ;;  %v3553_v19 = vsel %vm2157_vm10, 1.0, %v7586_v43  ;;  %v3328_v5 = vsel %vm3038_vm13, %v3612_v24, 0.0  ;;  %vm7330_vm8 = vcmp.ne.s32.totalorder %v5588_v39, 255 }
 0x364   :  { %v2006_v13 = vpop.permute.xlu0 %2005  ;;  %v2349_v12 = vmul.f32 %v3553_v19, %v5053_v61  ;;  %vm2159_vm10 = vcmp.eq.s32.totalorder %v5497_v58, %v5986_v40  ;;  %vm7332_vm3 = vcmp.ne.s32.totalorder %v5777_v17, 255 }
 0x365   :  { %2134 = vperm.xlu0 %3851, %v144_v41   ;;  %v2347_v41 = vmul.f32 %v3551_v9, %v5035_v46  ;;  %v3327_v22 = vadd.f32 %v3326_v33, %v3325_v15  ;;  %v3613_v9 = vsel %vm7330_vm8, 1.0, %v7586_v43  ;;  %v3555_v33 = vsel %vm2159_vm10, 1.0, %v7586_v43 }
 0x366   :  { %2435 = vadd.xlane.f32.xlu1 %v2434_v10  ;;  %v3552_v10 = vsel %vm2156_vm7, 1.0, %v7586_v43  ;;  %vm2158_vm7 = vcmp.eq.s32.totalorder %v5497_v58, %v2006_v13  ;;  %v3330_v13 = vsel %vm3038_vm13, %v3613_v9, 0.0  ;;  %v2449_v52 = vsel %vm1176_vm1, %v2349_v12, 0.0 }
 0x367   :  { %v2348_v46 = vmul.f32 %v3552_v10, %v5033_v27  ;;  %v3329_v31 = vadd.f32 %v3328_v5, %v3327_v22  ;;  %v6151_v16 = vpop.permute.xlu1 %2059  ;;  %v3554_v15 = vsel %vm2158_vm7, 1.0, %v7586_v43  ;;  %v3614_v10 = vsel %vm7332_vm3, 1.0, %v7586_v43 }
 0x368   :  { %v6105_v47 = vpop.permute.xlu0 %2011  ;;  %v2350_v61 = vmul.f32 %v3554_v15, %v7500_v49  ;;  %v3332_v22 = vsel %vm3038_vm13, %v3614_v10, 0.0  ;;  %vm7335_vm8 = vcmp.ne.s32.totalorder %v5596_v29, 255  ;;  %v2351_v24 = vmul.f32 %v3555_v33, %v5071_v2 }
 0x369   :  { %2137 = vperm.xlu0 %3851, %v145_v56   ;;  %v2443_v56 = vsel %vm1176_vm1, %v2347_v41, 0.0  ;;  %v2446_v27 = vsel %vm1176_vm1, %v2348_v46, 0.0  ;;  %v3331_v41 = vadd.f32 %v3330_v13, %v3329_v31  ;;  %vm2160_vm7 = vcmp.eq.s32.totalorder %v5497_v58, %v6105_v47 }
 0x36a   :  { %2438 = vadd.xlane.f32.xlu1 %v2437_v36  ;;  %v2452_v49 = vsel %vm1176_vm1, %v2350_v61, 0.0  ;;  %v3615_v19 = vsel %vm7335_vm8, 1.0, %v7586_v43  ;;  %v3556_v47 = vsel %vm2160_vm7, 1.0, %v7586_v43  ;;  %vm2161_vm10 = vcmp.eq.s32.totalorder %v5497_v58, %v6006_v34 }
 0x36b   :  { %v6169_v40 = vpop.permute.xlu1 %2062  ;;  %v3334_v5 = vsel %vm3038_vm13, %v3615_v19, 0.0  ;;  %v3565_v31 = vsel %vm2169_vm5, 1.0, %v7586_v43  ;;  %vm7333_vm3 = vcmp.ne.s32.totalorder %v5785_v48, 255  ;;  %v2352_v2 = vmul.f32 %v3556_v47, %v7504_v51 }
 0x36c   :  { %v6118_v42 = vpop.permute.xlu0 %2017  ;;  %v2455_v12 = vsel %vm1176_vm1, %v2351_v24, 0.0  ;;  %v3616_v9 = vsel %vm7333_vm3, 1.0, %v7586_v43  ;;  %v3557_v15 = vsel %vm2161_vm10, 1.0, %v7586_v43  ;;  %vm7334_vm7 = vcmp.ne.s32.totalorder %v5604_v37, 255 }
 0x36d   :  { %v3336_v34 = vsel %vm3038_vm13, %v3616_v9, 0.0  ;;  %vm2162_vm5 = vcmp.eq.s32.totalorder %v5497_v58, %v6118_v42  ;;  %v2353_v10 = vmul.f32 %v3557_v15, %v5089_v28  ;;  %v3617_v33 = vsel %vm7334_vm7, 1.0, %v7586_v43 }
 0x36e   :  { %2441 = vadd.xlane.f32.xlu1 %v2440_v63  ;;  %vm2163_vm10 = vcmp.eq.s32.totalorder %v5497_v58, %v6032_v57  ;;  %v3558_v42 = vsel %vm2162_vm5, 1.0, %v7586_v43  ;;  %vm2801_vm3 = vcmp.ne.s32.totalorder %v5791_v11, 255  ;;  %vm2165_vm8 = vcmp.eq.s32.totalorder %v5497_v58, %v6053_v14 }
 0x36f   :  { %v6195_v13 = vpop.permute.xlu1 %2068  ;;  %v3559_v28 = vsel %vm2163_vm10, 1.0, %v7586_v43  ;;  %v2354_v19 = vmul.f32 %v3558_v42, %v7509_v62  ;;  %v2461_v57 = vsel %vm1176_vm1, %v2353_v10, 0.0  ;;  %v3618_v47 = vsel %vm2801_vm3, 1.0, %v7586_v43 }
 0x370   :  { %v6132_v3 = vpop.permute.xlu0 %2023  ;;  %vm7337_vm10 = vcmp.ne.s32.totalorder %v5612_v0, 255  ;;  %v3561_v14 = vsel %vm2165_vm8, 1.0, %v7586_v43 }
 0x371   :  { %vm2164_vm7 = vcmp.eq.s32.totalorder %v5497_v58, %v6132_v3  ;;  %v2464_v62 = vsel %vm1176_vm1, %v2354_v19, 0.0 }
 0x372   :  { %2444 = vadd.xlane.f32.xlu1 %v2443_v56  ;;  %v3333_v56 = vadd.f32 %v3332_v22, %v3331_v41  ;;  %v2361_v41 = vmul.f32 %v3565_v31, %v7523_v26  ;;  %v3338_v26 = vsel %vm3038_vm13, %v3617_v33, 0.0  ;;  %v3560_v3 = vsel %vm2164_vm7, 1.0, %v7586_v43 }
 0x373   :  { %v2356_v33 = vmul.f32 %v3560_v3, %v7515_v18  ;;  %vm7340_vm7 = vcmp.ne.s32.totalorder %v5620_v54, 255 }
 0x374   :  { %v6143_v36 = vpop.permute.xlu0 %2029  ;;  %v3335_v6 = vadd.f32 %v3334_v5, %v3333_v56  ;;  %v2485_v22 = vsel %vm1176_vm1, %v2361_v41, 0.0  ;;  %v2072_v56 = vpop.permute.xlu1 %2071  ;;  %v3340_v5 = vsel %vm3038_vm13, %v3618_v47, 0.0 }
 0x375   :  { %vm2180_vm5 = vcmp.eq.s32.totalorder %v5497_v58, %v2072_v56  ;;  %v2357_v56 = vmul.f32 %v3561_v14, %v5125_v44  ;;  %v3621_v44 = vsel %vm7340_vm7, 1.0, %v7586_v43 }
 0x376   :  { %2447 = vadd.xlane.f32.xlu1 %v2446_v27  ;;  %v3337_v51 = vadd.f32 %v3336_v34, %v3335_v6  ;;  %v2355_v6 = vmul.f32 %v3559_v28, %v5107_v38  ;;  %v3576_v9 = vsel %vm2180_vm5, 1.0, %v7586_v43  ;;  %vm2167_vm5 = vcmp.eq.s32.totalorder %v5497_v58, %v6070_v32 }
 0x377   :  { %v2372_v10 = vmul.f32 %v3576_v9, %v4965_v59  ;;  %v2470_v59 = vsel %vm1176_vm1, %v2356_v33, 0.0  ;;  %v3563_v32 = vsel %vm2167_vm5, 1.0, %v7586_v43 }
 0x378   :  { %v6157_v63 = vpop.permute.xlu0 %2035  ;;  %v3339_v24 = vadd.f32 %v3338_v26, %v3337_v51  ;;  %v2467_v51 = vsel %vm1176_vm1, %v2355_v6, 0.0  ;;  %v2359_v3 = vmul.f32 %v3563_v32, %v7516_v1  ;;  %v7631_v1 = vld [vmem:[#allocation19_spill] sm:$0xff]  ;;  %v7636_v32 = vld [vmem:[#allocation21_spill] sm:$0xff] }
 0x379   :  { %v2518_v18 = vsel %vm1176_vm1, %v2372_v10, 0.0 }
 0x37a   :  { %2450 = vadd.xlane.f32.xlu1 %v2449_v52  ;;  %v2458_v52 = vsel %vm1176_vm1, %v2352_v2, 0.0  ;;  %v3341_v2 = vadd.f32 %v3340_v5, %v3339_v24  ;;  %v2473_v5 = vsel %vm1176_vm1, %v2357_v56, 0.0  ;;  %v2479_v33 = vsel %vm1176_vm1, %v2359_v3, 0.0 }
 0x37c   :  { %v6171_v46 = vpop.permute.xlu0 %2041 }
 0x37e   :  { %2453 = vadd.xlane.f32.xlu1 %v2452_v49 }
 0x380   :  { %v6186_v27 = vpop.permute.xlu0 %2047 }
 0x382   :  { %2456 = vadd.xlane.f32.xlu1 %v2455_v12  ;;  %v3619_v12 = vsel %vm7337_vm10, 1.0, %v7586_v43  ;;  %vm7338_vm10 = vcmp.ne.s32.totalorder %v5799_v55, 255 }
 0x383   :  { %v3342_v15 = vsel %vm3038_vm13, %v3619_v12, 0.0  ;;  %v3620_v26 = vsel %vm7338_vm10, 1.0, %v7586_v43  ;;  %vm7339_vm10 = vcmp.ne.s32.totalorder %v5807_v21, 255 }
 0x384   :  { %v6201_v61 = vpop.permute.xlu0 %2053 }
 0x386   :  { %2459 = vadd.xlane.f32.xlu1 %v2458_v52  ;;  %v3343_v52 = vadd.f32 %v3342_v15, %v3341_v2 }
 0x388   :  { %2486 = vadd.xlane.f32.xlu0 %v2485_v22  ;;  %v6214_v49 = vpop.permute.xlu0 %2056 }
 0x38a   :  { %2462 = vadd.xlane.f32.xlu1 %v2461_v57  ;;  %v3346_v57 = vsel %vm3038_vm13, %v3621_v44, 0.0 }
 0x38c   :  { %v2066_v31 = vpop.permute.xlu0 %2065 }
 0x38d   :  { %vm2178_vm9 = vcmp.eq.s32.totalorder %v5497_v58, %v2066_v31 }
 0x38e   :  { %v3574_v38 = vsel %vm2178_vm9, 1.0, %v7586_v43  ;;  %2465 = vadd.xlane.f32.xlu1 %v2464_v62  ;;  %vm2166_vm9 = vcmp.eq.s32.totalorder %v5497_v58, %v6143_v36  ;;  %v3622_v62 = vsel %vm7339_vm10, 1.0, %v7586_v43  ;;  %vm2170_vm10 = vcmp.eq.s32.totalorder %v5497_v58, %v6171_v46 }
 0x38f   :  { %v2370_v34 = vmul.f32 %v3574_v38, %v4947_v7  ;;  %v3344_v7 = vsel %vm3038_vm13, %v3620_v26, 0.0  ;;  %v3562_v28 = vsel %vm2166_vm9, 1.0, %v7586_v43  ;;  %vm2168_vm9 = vcmp.eq.s32.totalorder %v5497_v58, %v6157_v63  ;;  %v7630_v38 = vld [vmem:[#allocation119_spill] sm:$0xff]  ;;  %v7633_v26 = vld [vmem:[#allocation40_spill] sm:$0xff] }
 0x390   :  { %v6242_v41 = vpop.permute.xlu0 %2074  ;;  %v3345_v24 = vadd.f32 %v3344_v7, %v3343_v52  ;;  %v2358_v6 = vmul.f32 %v3562_v28, %v7521_v35  ;;  %v3566_v56 = vsel %vm2170_vm10, 1.0, %v7586_v43  ;;  %vm2172_vm10 = vcmp.eq.s32.totalorder %v5497_v58, %v6186_v27 }
 0x391   :  { %v2512_v42 = vsel %vm1176_vm1, %v2370_v34, 0.0  ;;  %v3564_v34 = vsel %vm2168_vm9, 1.0, %v7586_v43  ;;  %vm2171_vm9 = vcmp.eq.s32.totalorder %v5497_v58, %v6114_v45  ;;  %v7635_v45 = vld [vmem:[#allocation44_spill] sm:$0xff]  ;;  %v3568_v27 = vsel %vm2172_vm10, 1.0, %v7586_v43 }
 0x392   :  { %2468 = vadd.xlane.f32.xlu1 %v2467_v51  ;;  %2513 = vadd.xlane.f32.xlu0 %v2512_v42  ;;  %v3347_v31 = vadd.f32 %v3346_v57, %v3345_v24  ;;  %v2476_v35 = vsel %vm1176_vm1, %v2358_v6, 0.0  ;;  %v7632_v42 = vld [vmem:[#allocation164_spill] sm:$0xff]  ;;  %v2360_v7 = vmul.f32 %v3564_v34, %v7633_v26  ;;  %v2362_v44 = vmul.f32 %v3566_v56, %v7635_v45  ;;  %v7642_v56 = vld [vmem:[#allocation23_spill] sm:$0xff] }
 0x393   :  { %vm7344_vm7 = vcmp.ne.s32.totalorder %v7632_v42, 255 }
 0x394   :  { %v2078_v22 = vpop.permute.xlu0 %2077  ;;  %v3624_v46 = vsel %vm7344_vm7, 1.0, %v7586_v43  ;;  %v2488_v3 = vsel %vm1176_vm1, %v2362_v44, 0.0  ;;  %vm2174_vm7 = vcmp.eq.s32.totalorder %v5497_v58, %v6201_v61 }
 0x395   :  { %vm2182_vm8 = vcmp.eq.s32.totalorder %v5497_v58, %v2078_v22  ;;  %v3352_v24 = vsel %vm3038_vm13, %v3624_v46, 0.0 }
 0x396   :  { %v3578_v19 = vsel %vm2182_vm8, 1.0, %v7586_v43  ;;  %2471 = vadd.xlane.f32.xlu1 %v2470_v59  ;;  %2519 = vadd.xlane.f32.xlu0 %v2518_v18  ;;  %vm7341_vm8 = vcmp.ne.s32.totalorder %v7630_v38, 255  ;;  %v3567_v18 = vsel %vm2171_vm9, 1.0, %v7586_v43 }
 0x397   :  { %v2374_v36 = vmul.f32 %v3578_v19, %v4983_v20  ;;  %v3348_v20 = vsel %vm3038_vm13, %v3622_v62, 0.0  ;;  %v3623_v15 = vsel %vm7341_vm8, 1.0, %v7586_v43  ;;  %v7634_v19 = vld [vmem:[#allocation121_spill] sm:$0xff] }
 0x398   :  { %v6269_v47 = vpop.permute.xlu0 %2080  ;;  %v3349_v12 = vadd.f32 %v3348_v20, %v3347_v31  ;;  %v3350_v63 = vsel %vm3038_vm13, %v3623_v15, 0.0  ;;  %v7637_v20 = vld [vmem:[#allocation10_spill] sm:$0xff] }
 0x399   :  { %v2524_v2 = vsel %vm1176_vm1, %v2374_v36, 0.0  ;;  %v2482_v36 = vsel %vm1176_vm1, %v2360_v7, 0.0 }
 0x39a   :  { %2474 = vadd.xlane.f32.xlu1 %v2473_v5  ;;  %2525 = vadd.xlane.f32.xlu0 %v2524_v2  ;;  %v3351_v52 = vadd.f32 %v3350_v63, %v3349_v12  ;;  %v2363_v12 = vmul.f32 %v3567_v18, %v7637_v20 }
 0x39c   :  { %v2084_v9 = vpop.permute.xlu0 %2083  ;;  %v3353_v59 = vadd.f32 %v3352_v24, %v3351_v52 }
 0x39d   :  { %vm2184_vm5 = vcmp.eq.s32.totalorder %v5497_v58, %v2084_v9  ;;  %v7638_v9 = vld [vmem:[#allocation166_spill] sm:$0xff] }
 0x39e   :  { %v3580_v14 = vsel %vm2184_vm5, 1.0, %v7586_v43  ;;  %2477 = vadd.xlane.f32.xlu1 %v2476_v35  ;;  %vm7342_vm5 = vcmp.ne.s32.totalorder %v7634_v19, 255  ;;  %vm7343_vm9 = vcmp.ne.s32.totalorder %v7638_v9, 255 }
 0x39f   :  { %v2376_v51 = vmul.f32 %v3580_v14, %v7631_v1  ;;  %v3625_v57 = vsel %vm7342_vm5, 1.0, %v7586_v43  ;;  %v3626_v15 = vsel %vm7343_vm9, 1.0, %v7586_v43  ;;  %v2491_v1 = vsel %vm1176_vm1, %v2363_v12, 0.0 }
 0x3a0   :  { %v6295_v10 = vpop.permute.xlu0 %2086  ;;  %v3354_v31 = vsel %vm3038_vm13, %v3625_v57, 0.0  ;;  %v3356_v34 = vsel %vm3038_vm13, %v3626_v15, 0.0 }
 0x3a1   :  { %v2530_v22 = vsel %vm1176_vm1, %v2376_v51, 0.0  ;;  %v3355_v2 = vadd.f32 %v3354_v31, %v3353_v59  ;;  %v7639_v51 = vld [vmem:[#allocation123_spill] sm:$0xff]  ;;  %v3570_v31 = vsel %vm2174_vm7, 1.0, %v7586_v43 }
 0x3a2   :  { %2480 = vadd.xlane.f32.xlu1 %v2479_v33  ;;  %2531 = vadd.xlane.f32.xlu0 %v2530_v22  ;;  %vm7347_vm5 = vcmp.ne.s32.totalorder %v7639_v51, 255  ;;  %v7640_v33 = vld [vmem:[#allocation9_spill] sm:$0xff] }
 0x3a3   :  { %v3357_v14 = vadd.f32 %v3356_v34, %v3355_v2  ;;  %v2364_v26 = vmul.f32 %v3568_v27, %v7640_v33  ;;  %v7641_v22 = vld [vmem:[#allocation125_spill] sm:$0xff] }
 0x3a4   :  { %v2090_v28 = vpop.permute.xlu0 %2089  ;;  %vm7345_vm10 = vcmp.ne.s32.totalorder %v7641_v22, 255 }
 0x3a5   :  { %vm2186_vm8 = vcmp.eq.s32.totalorder %v5497_v58, %v2090_v28  ;;  %v3629_v59 = vsel %vm7345_vm10, 1.0, %v7586_v43  ;;  %v7643_v28 = vld [vmem:[#allocation13_spill] sm:$0xff]  ;;  %v2494_v57 = vsel %vm1176_vm1, %v2364_v26, 0.0  ;;  %vm2176_vm10 = vcmp.eq.s32.totalorder %v5497_v58, %v6151_v16 }
 0x3a6   :  { %v3582_v5 = vsel %vm2186_vm8, 1.0, %v7586_v43  ;;  %2483 = vadd.xlane.f32.xlu1 %v2482_v36  ;;  %vm2173_vm8 = vcmp.eq.s32.totalorder %v5497_v58, %v6130_v50  ;;  %v3627_v50 = vsel %vm7347_vm5, 1.0, %v7586_v43  ;;  %v7644_v36 = vld [vmem:[#allocation168_spill] sm:$0xff]  ;;  %v3572_v33 = vsel %vm2176_vm10, 1.0, %v7586_v43 }
 0x3a7   :  { %v2378_v6 = vmul.f32 %v3582_v5, %v7636_v32  ;;  %v3569_v52 = vsel %vm2173_vm8, 1.0, %v7586_v43  ;;  %v3358_v46 = vsel %vm3038_vm13, %v3627_v50, 0.0  ;;  %v3362_v32 = vsel %vm3038_vm13, %v3629_v59, 0.0  ;;  %v7648_v50 = vld [vmem:[#allocation127_spill] sm:$0xff] }
 0x3a8   :  { %v6321_v62 = vpop.permute.xlu0 %2092  ;;  %v3359_v18 = vadd.f32 %v3358_v46, %v3357_v14  ;;  %v2365_v45 = vmul.f32 %v3569_v52, %v7643_v28  ;;  %vm2175_vm8 = vcmp.eq.s32.totalorder %v5497_v58, %v6214_v49  ;;  %vm7348_vm5 = vcmp.ne.s32.totalorder %v7648_v50, 255 }
 0x3a9   :  { %v2536_v35 = vsel %vm1176_vm1, %v2378_v6, 0.0  ;;  %v3571_v49 = vsel %vm2175_vm8, 1.0, %v7586_v43  ;;  %v3631_v59 = vsel %vm7348_vm5, 1.0, %v7586_v43  ;;  %vm2177_vm8 = vcmp.eq.s32.totalorder %v5497_v58, %v6169_v40 }
 0x3aa   :  { %2489 = vadd.xlane.f32.xlu1 %v2488_v3  ;;  %2537 = vadd.xlane.f32.xlu0 %v2536_v35  ;;  %v2497_v12 = vsel %vm1176_vm1, %v2365_v45, 0.0  ;;  %v7645_v3 = vld [vmem:[#allocation169_spill] sm:$0xff]  ;;  %v7646_v35 = vld [vmem:[#allocation12_spill] sm:$0xff]  ;;  %v7650_v45 = vld [vmem:[#allocation14_spill] sm:$0xff]  ;;  %vm2179_vm5 = vcmp.eq.s32.totalorder %v5497_v58, %v6195_v13 }
 0x3ab   :  { %v2366_v15 = vmul.f32 %v3570_v31, %v7646_v35  ;;  %v3573_v31 = vsel %vm2177_vm8, 1.0, %v7586_v43 }
 0x3ac   :  { %v2096_v63 = vpop.permute.xlu0 %2095 }
 0x3ad   :  { %vm2188_vm9 = vcmp.eq.s32.totalorder %v5497_v58, %v2096_v63  ;;  %v7647_v63 = vld [vmem:[#allocation26_spill] sm:$0xff] }
 0x3ae   :  { %v3584_v7 = vsel %vm2188_vm9, 1.0, %v7586_v43  ;;  %2492 = vadd.xlane.f32.xlu1 %v2491_v1  ;;  %vm7346_vm9 = vcmp.ne.s32.totalorder %v7644_v36, 255 }
 0x3af   :  { %v2380_v24 = vmul.f32 %v3584_v7, %v7642_v56  ;;  %v3628_v61 = vsel %vm7346_vm9, 1.0, %v7586_v43  ;;  %vm7352_vm9 = vcmp.ne.s32.totalorder %v7645_v3, 255  ;;  %v7649_v7 = vld [vmem:[#allocation15_spill] sm:$0xff]  ;;  %v2500_v56 = vsel %vm1176_vm1, %v2366_v15, 0.0  ;;  %v7653_v15 = vld [vmem:[#allocation16_spill] sm:$0xff] }
 0x3b0   :  { %v6352_v44 = vpop.permute.xlu0 %2098  ;;  %v3360_v6 = vsel %vm3038_vm13, %v3628_v61, 0.0  ;;  %v3630_v27 = vsel %vm7352_vm9, 1.0, %v7586_v43  ;;  %v2367_v46 = vmul.f32 %v3571_v49, %v7649_v7  ;;  %v7651_v61 = vld [vmem:[#allocation171_spill] sm:$0xff]  ;;  %v6410_v49 = vld [vmem:[%s7155_s1 + $0x110] sm:$0xff]  ;;  %vm2185_vm9 = vcmp.eq.s32.totalorder %v5497_v58, %v6295_v10 }
 0x3b1   :  { %v2542_v5 = vsel %vm1176_vm1, %v2380_v24, 0.0  ;;  %v3361_v2 = vadd.f32 %v3360_v6, %v3359_v18  ;;  %v3364_v16 = vsel %vm3038_vm13, %v3630_v27, 0.0  ;;  %v3366_v18 = vsel %vm3038_vm13, %v3631_v59, 0.0  ;;  %7654 = vst [vmem:[#allocation119_spill] sm:$0xff] %v6410_v49  ;;  %v7663_v10 = vld [vmem:[#allocation20_spill] sm:$0xff] }
 0x3b2   :  { %2495 = vadd.xlane.f32.xlu1 %v2494_v57  ;;  %2543 = vadd.xlane.f32.xlu0 %v2542_v5  ;;  %v2368_v57 = vmul.f32 %v3572_v33, %v7650_v45  ;;  %vm7349_vm10 = vcmp.ne.s32.totalorder %v7651_v61, 255  ;;  %v2369_v27 = vmul.f32 %v3573_v31, %v7653_v15  ;;  %vm7350_vm8 = vcmp.ne.s32.totalorder %v6410_v49, 255  ;;  %v7657_v45 = vld [vmem:[#allocation32_spill] sm:$0xff]  ;;  %v7658_v31 = vld [vmem:[#allocation18_spill] sm:$0xff] }
 0x3b3   :  { %v3363_v34 = vadd.f32 %v3362_v32, %v3361_v2  ;;  %v2503_v32 = vsel %vm1176_vm1, %v2367_v46, 0.0  ;;  %v3632_v40 = vsel %vm7349_vm10, 1.0, %v7586_v43  ;;  %v3633_v13 = vsel %vm7350_vm8, 1.0, %v7586_v43  ;;  %v7655_v46 = vld [vmem:[#allocation173_spill] sm:$0xff] }
 0x3b4   :  { %v2102_v20 = vpop.permute.xlu0 %2101  ;;  %v3368_v2 = vsel %vm3038_vm13, %v3632_v40, 0.0  ;;  %v2509_v7 = vsel %vm1176_vm1, %v2369_v27, 0.0  ;;  %vm7351_vm10 = vcmp.ne.s32.totalorder %v7655_v46, 255  ;;  %v6450_v27 = vld [vmem:[%s7155_s1 + $0x128] sm:$0xff]  ;;  %v7727_v46 = vld [vmem:[#allocation57_spill] sm:$0xff] }
 0x3b5   :  { %vm2190_vm7 = vcmp.eq.s32.totalorder %v5497_v58, %v2102_v20  ;;  %v3365_v52 = vadd.f32 %v3364_v16, %v3363_v34  ;;  %v7652_v20 = vld [vmem:[#allocation29_spill] sm:$0xff]  ;;  %7661 = vst [vmem:[#allocation19_spill] sm:$0xff] %v6450_v27 }
 0x3b6   :  { %v3586_v14 = vsel %vm2190_vm7, 1.0, %v7586_v43  ;;  %2498 = vadd.xlane.f32.xlu1 %v2497_v12 }
 0x3b7   :  { %v2382_v1 = vmul.f32 %v3586_v14, %v7647_v63  ;;  %v3367_v28 = vadd.f32 %v3366_v18, %v3365_v52  ;;  %v2506_v14 = vsel %vm1176_vm1, %v2368_v57, 0.0  ;;  %v3575_v63 = vsel %vm2179_vm5, 1.0, %v7586_v43 }
 0x3b8   :  { %v6379_v26 = vpop.permute.xlu0 %2104  ;;  %vm2183_vm5 = vcmp.eq.s32.totalorder %v5497_v58, %v6269_v47  ;;  %v7660_v47 = vld [vmem:[#allocation176_spill] sm:$0xff] }
 0x3b9   :  { %v2548_v24 = vsel %vm1176_vm1, %v2382_v1, 0.0  ;;  %v3369_v35 = vadd.f32 %v3368_v2, %v3367_v28  ;;  %v3370_v1 = vsel %vm3038_vm13, %v3633_v13, 0.0 }
 0x3ba   :  { %2501 = vadd.xlane.f32.xlu1 %v2500_v56  ;;  %2549 = vadd.xlane.f32.xlu0 %v2548_v24  ;;  %v7656_v56 = vld [vmem:[#allocation17_spill] sm:$0xff] }
 0x3bb   :  { %v3371_v52 = vadd.f32 %v3370_v1, %v3369_v35  ;;  %v2371_v24 = vmul.f32 %v3575_v63, %v7656_v56  ;;  %v3579_v35 = vsel %vm2183_vm5, 1.0, %v7586_v43 }
 0x3bc   :  { %v2108_v5 = vpop.permute.xlu0 %2107 }
 0x3bd   :  { %vm2192_vm7 = vcmp.eq.s32.totalorder %v5497_v58, %v2108_v5  ;;  %v2515_v2 = vsel %vm1176_vm1, %v2371_v24, 0.0 }
 0x3be   :  { %v3588_v6 = vsel %vm2192_vm7, 1.0, %v7586_v43  ;;  %2504 = vadd.xlane.f32.xlu1 %v2503_v32  ;;  %vm2181_vm7 = vcmp.eq.s32.totalorder %v5497_v58, %v6242_v41  ;;  %v3634_v41 = vsel %vm7351_vm10, 1.0, %v7586_v43  ;;  %vm7354_vm10 = vcmp.ne.s32.totalorder %v6450_v27, 255 }
 0x3bf   :  { %v2384_v12 = vmul.f32 %v3588_v6, %v7652_v20  ;;  %v3577_v59 = vsel %vm2181_vm7, 1.0, %v7586_v43  ;;  %v3372_v28 = vsel %vm3038_vm13, %v3634_v41, 0.0  ;;  %v7659_v6 = vld [vmem:[#allocation174_spill] sm:$0xff]  ;;  %v3636_v13 = vsel %vm7354_vm10, 1.0, %v7586_v43 }
 0x3c0   :  { %v6405_v34 = vpop.permute.xlu0 %2110  ;;  %v3373_v5 = vadd.f32 %v3372_v28, %v3371_v52  ;;  %v2373_v32 = vmul.f32 %v3577_v59, %v7658_v31  ;;  %vm7359_vm7 = vcmp.ne.s32.totalorder %v7659_v6, 255  ;;  %v3376_v52 = vsel %vm3038_vm13, %v3636_v13, 0.0 }
 0x3c1   :  { %v2554_v16 = vsel %vm1176_vm1, %v2384_v12, 0.0  ;;  %v3635_v12 = vsel %vm7359_vm7, 1.0, %v7586_v43  ;;  %v3581_v59 = vsel %vm2185_vm9, 1.0, %v7586_v43  ;;  %vm2187_vm10 = vcmp.eq.s32.totalorder %v5497_v58, %v6321_v62  ;;  %v6495_v62 = vld [vmem:[%s7155_s1 + $0x140] sm:$0xff] }
 0x3c2   :  { %2507 = vadd.xlane.f32.xlu1 %v2506_v14  ;;  %2555 = vadd.xlane.f32.xlu0 %v2554_v16  ;;  %v3374_v15 = vsel %vm3038_vm13, %v3635_v12, 0.0  ;;  %v2521_v1 = vsel %vm1176_vm1, %v2373_v32, 0.0  ;;  %7666 = vst [vmem:[#allocation121_spill] sm:$0xff] %v6495_v62  ;;  %vm7357_vm9 = vcmp.ne.s32.totalorder %v6495_v62, 255  ;;  %v7709_v62 = vld [vmem:[#allocation155_spill] sm:$0xff] }
 0x3c3   :  { %v3375_v16 = vadd.f32 %v3374_v15, %v3373_v5  ;;  %v6484_v5 = vld [vmem:[%s7155_s1 + $0x148] sm:$0xff] }
 0x3c4   :  { %v2114_v33 = vpop.permute.xlu0 %2113  ;;  %7665 = vst [vmem:[#allocation40_spill] sm:$0xff] %v6484_v5 }
 0x3c5   :  { %vm2194_vm8 = vcmp.eq.s32.totalorder %v5497_v58, %v2114_v33  ;;  %v6466_v33 = vld [vmem:[%s7155_s1 + $0x130] sm:$0xff]  ;;  %v3377_v56 = vadd.f32 %v3376_v52, %v3375_v16  ;;  %v3583_v16 = vsel %vm2187_vm10, 1.0, %v7586_v43  ;;  %v7668_v52 = vld [vmem:[#allocation179_spill] sm:$0xff] }
 0x3c6   :  { %v3590_v18 = vsel %vm2194_vm8, 1.0, %v7586_v43  ;;  %2510 = vadd.xlane.f32.xlu1 %v2509_v7  ;;  %vm7353_vm8 = vcmp.ne.s32.totalorder %v7660_v47, 255  ;;  %7662 = vst [vmem:[#allocation164_spill] sm:$0xff] %v6466_v33  ;;  %vm7355_vm5 = vcmp.ne.s32.totalorder %v6466_v33, 255  ;;  %v2375_v7 = vmul.f32 %v3579_v35, %v7663_v10 }
 0x3c7   :  { %v2386_v57 = vmul.f32 %v3590_v18, %v7657_v45  ;;  %v3638_v14 = vsel %vm7353_vm8, 1.0, %v7586_v43  ;;  %v3637_v24 = vsel %vm7355_vm5, 1.0, %v7586_v43  ;;  %v7664_v45 = vld [vmem:[#allocation35_spill] sm:$0xff]  ;;  %vm7356_vm5 = vcmp.ne.s32.totalorder %v6484_v5, 255 }
 0x3c8   :  { %v6436_v40 = vpop.permute.xlu0 %2116  ;;  %v3380_v18 = vsel %vm3038_vm13, %v3638_v14, 0.0  ;;  %v3378_v28 = vsel %vm3038_vm13, %v3637_v24, 0.0  ;;  %v2527_v35 = vsel %vm1176_vm1, %v2375_v7, 0.0  ;;  %v3639_v14 = vsel %vm7357_vm9, 1.0, %v7586_v43  ;;  %v7669_v24 = vld [vmem:[#allocation178_spill] sm:$0xff] }
 0x3c9   :  { %v2560_v20 = vsel %vm1176_vm1, %v2386_v57, 0.0  ;;  %v3379_v31 = vadd.f32 %v3378_v28, %v3377_v56  ;;  %vm2824_vm10 = vcmp.ne.s32.totalorder %v7669_v24, 255 }
 0x3ca   :  { %2516 = vadd.xlane.f32.xlu1 %v2515_v2  ;;  %2561 = vadd.xlane.f32.xlu0 %v2560_v20  ;;  %v3640_v2 = vsel %vm7356_vm5, 1.0, %v7586_v43  ;;  %v7667_v20 = vld [vmem:[#allocation22_spill] sm:$0xff]  ;;  %vm7358_vm5 = vcmp.ne.s32.totalorder %v7668_v52, 255  ;;  %v3641_v28 = vsel %vm2824_vm10, 1.0, %v7586_v43 }
 0x3cb   :  { %v2377_v12 = vmul.f32 %v3581_v59, %v7667_v20  ;;  %v3381_v13 = vadd.f32 %v3380_v18, %v3379_v31  ;;  %v3642_v7 = vsel %vm7358_vm5, 1.0, %v7586_v43  ;;  %v6514_v59 = vpop.xlane.xlu1 %2417  ;;  %vm2191_vm5 = vcmp.eq.s32.totalorder %v5497_v58, %v6379_v26  ;;  %v7671_v20 = vld [vmem:[#allocation38_spill] sm:$0xff] }
 0x3cc   :  { %v2120_v63 = vpop.permute.xlu0 %2119 }
 0x3cd   :  { %vm2196_vm8 = vcmp.eq.s32.totalorder %v5497_v58, %v2120_v63  ;;  %v3382_v63 = vsel %vm3038_vm13, %v3639_v14, 0.0 }
 0x3ce   :  { %v3592_v41 = vsel %vm2196_vm8, 1.0, %v7586_v43  ;;  %2522 = vadd.xlane.f32.xlu1 %v2521_v1  ;;  %vm2189_vm8 = vcmp.eq.s32.totalorder %v5497_v58, %v6352_v44  ;;  %v3384_v1 = vsel %vm3038_vm13, %v3640_v2, 0.0  ;;  %v3383_v56 = vadd.f32 %v3382_v63, %v3381_v13  ;;  %v7673_v63 = vld [vmem:[#allocation181_spill] sm:$0xff] }
 0x3cf   :  { %v2388_v57 = vmul.f32 %v3592_v41, %v7664_v45  ;;  %v7670_v41 = vld [vmem:[#allocation24_spill] sm:$0xff]  ;;  %v2533_v44 = vsel %vm1176_vm1, %v2377_v12, 0.0  ;;  %v3585_v45 = vsel %vm2189_vm8, 1.0, %v7586_v43  ;;  %v3386_v2 = vsel %vm3038_vm13, %v3641_v28, 0.0  ;;  %v7672_v12 = vld [vmem:[#allocation183_spill] sm:$0xff] }
 0x3d0   :  { %v6487_v32 = vpop.permute.xlu0 %2122  ;;  %v2379_v18 = vmul.f32 %v3583_v16, %v7670_v41  ;;  %v3385_v31 = vadd.f32 %v3384_v1, %v3383_v56  ;;  %vm7361_vm7 = vcmp.ne.s32.totalorder %v7672_v12, 255  ;;  %v7674_v1 = vld [vmem:[#allocation27_spill] sm:$0xff]  ;;  %v3587_v41 = vsel %vm2191_vm5, 1.0, %v7586_v43 }
 0x3d1   :  { %v2566_v15 = vsel %vm1176_vm1, %v2388_v57, 0.0  ;;  %v3644_v16 = vsel %vm7361_vm7, 1.0, %v7586_v43  ;;  %vm2193_vm8 = vcmp.eq.s32.totalorder %v5497_v58, %v6405_v34  ;;  %v6562_v34 = vld [vmem:[%s7155_s1 + $0x170] sm:$0xff] }
 0x3d2   :  { %2528 = vadd.xlane.f32.xlu1 %v2527_v35  ;;  %2567 = vadd.xlane.f32.xlu0 %v2566_v15  ;;  %v3388_v15 = vsel %vm3038_vm13, %v3642_v7, 0.0  ;;  %v3387_v13 = vadd.f32 %v3386_v2, %v3385_v31  ;;  %v2539_v56 = vsel %vm1176_vm1, %v2379_v18, 0.0  ;;  %v3392_v18 = vsel %vm3038_vm13, %v3644_v16, 0.0  ;;  %v7676_v31 = vld [vmem:[#allocation132_spill] sm:$0xff]  ;;  %7677 = vst [vmem:[#allocation21_spill] sm:$0xff] %v6562_v34 }
 0x3d3   :  { %4109 = vlog2.f32 %v7676_v31  ;;  %vm7368_vm5 = vcmp.ne.s32.totalorder %v6562_v34, 255 }
 0x3d4   :  { %v2126_v10 = vpop.permute.xlu0 %2125 }
 0x3d5   :  { %vm2198_vm9 = vcmp.eq.s32.totalorder %v5497_v58, %v2126_v10  ;;  %v2381_v10 = vmul.f32 %v3585_v45, %v7674_v1  ;;  %v6552_v45 = vld [vmem:[%s7155_s1 + $0x178] sm:$0xff]  ;;  %v3645_v1 = vsel %vm7368_vm5, 1.0, %v7586_v43 }
 0x3d6   :  { %v3594_v57 = vsel %vm2198_vm9, 1.0, %v7586_v43  ;;  %2534 = vadd.xlane.f32.xlu1 %v2533_v44  ;;  %vm7360_vm9 = vcmp.ne.s32.totalorder %v7673_v63, 255  ;;  %v3389_v44 = vadd.f32 %v3388_v15, %v3387_v13  ;;  %7675 = vst [vmem:[#allocation44_spill] sm:$0xff] %v6552_v45  ;;  %v7678_v15 = vld [vmem:[#allocation30_spill] sm:$0xff] }
 0x3d7   :  { %v2390_v35 = vmul.f32 %v3594_v57, %v7671_v20  ;;  %v3643_v7 = vsel %vm7360_vm9, 1.0, %v7586_v43  ;;  %v6544_v57 = vpop.xlane.xlu1 %2420  ;;  %vm7362_vm9 = vcmp.ne.s32.totalorder %v6552_v45, 255  ;;  %v2383_v16 = vmul.f32 %v3587_v41, %v7678_v15  ;;  %v7679_v41 = vld [vmem:[#allocation42_spill] sm:$0xff]  ;;  %v7681_v15 = vld [vmem:[#allocation137_spill] sm:$0xff] }
 0x3d8   :  { %v6530_v14 = vpop.permute.xlu0 %2128  ;;  %v3390_v28 = vsel %vm3038_vm13, %v3643_v7, 0.0  ;;  %v3646_v20 = vsel %vm7362_vm9, 1.0, %v7586_v43  ;;  %v2545_v13 = vsel %vm1176_vm1, %v2381_v10, 0.0  ;;  %vm2195_vm9 = vcmp.eq.s32.totalorder %v5497_v58, %v6436_v40  ;;  %v6662_v45 = vld [vmem:[%s7155_s1 + $0x1a0] sm:$0xff] }
 0x3d9   :  { %v2572_v26 = vsel %vm1176_vm1, %v2390_v35, 0.0  ;;  %v3391_v35 = vadd.f32 %v3390_v28, %v3389_v44  ;;  %v3394_v44 = vsel %vm3038_vm13, %v3645_v1, 0.0  ;;  %v3396_v10 = vsel %vm3038_vm13, %v3646_v20, 0.0  ;;  %v6595_v20 = vld [vmem:[%s7155_s1 + $0x180] sm:$0xff]  ;;  %v7683_v1 = vld [vmem:[#allocation33_spill] sm:$0xff]  ;;  %7693 = vst [vmem:[#allocation23_spill] sm:$0xff] %v6662_v45 }
 0x3da   :  { %2540 = vadd.xlane.f32.xlu1 %v2539_v56  ;;  %2573 = vadd.xlane.f32.xlu0 %v2572_v26  ;;  %v3589_v56 = vsel %vm2193_vm8, 1.0, %v7586_v43  ;;  %4111 = vlog2.f32 %v7681_v15  ;;  %7682 = vst [vmem:[#allocation166_spill] sm:$0xff] %v6595_v20  ;;  %vm7365_vm8 = vcmp.ne.s32.totalorder %v6595_v20, 255  ;;  %v6717_v63 = vld [vmem:[%s7155_s1 + $0x1c0] sm:$0xff] }
 0x3db   :  { %v3393_v7 = vadd.f32 %v3392_v18, %v3391_v35  ;;  %v3647_v34 = vsel %vm7365_vm8, 1.0, %v7586_v43  ;;  %vm2197_vm8 = vcmp.eq.s32.totalorder %v5497_v58, %v6487_v32  ;;  %v7688_v32 = vld [vmem:[#allocation36_spill] sm:$0xff]  ;;  %7702 = vst [vmem:[#allocation26_spill] sm:$0xff] %v6717_v63 }
 0x3dc   :  { %v2132_v2 = vpop.permute.xlu0 %2131 }
 0x3dd   :  { %vm2200_vm7 = vcmp.eq.s32.totalorder %v5497_v58, %v2132_v2  ;;  %v6583_v2 = vld [vmem:[%s7155_s1 + $0x188] sm:$0xff] }
 0x3de   :  { %v3596_v26 = vsel %vm2200_vm7, 1.0, %v7586_v43  ;;  %2546 = vadd.xlane.f32.xlu1 %v2545_v13  ;;  %7680 = vst [vmem:[#allocation10_spill] sm:$0xff] %v6583_v2  ;;  %vm7364_vm7 = vcmp.ne.s32.totalorder %v6583_v2, 255  ;;  %v3395_v13 = vadd.f32 %v3394_v44, %v3393_v7  ;;  %v3591_v7 = vsel %vm2195_vm9, 1.0, %v7586_v43  ;;  %v6611_v44 = vld [vmem:[%s7155_s1 + $0x198] sm:$0xff] }
 0x3df   :  { %v2392_v28 = vmul.f32 %v3596_v26, %v7679_v41  ;;  %v6577_v31 = vpop.xlane.xlu1 %2423  ;;  %v3648_v35 = vsel %vm7364_vm7, 1.0, %v7586_v43  ;;  %v2385_v26 = vmul.f32 %v3589_v56, %v7683_v1  ;;  %v2551_v41 = vsel %vm1176_vm1, %v2383_v16, 0.0  ;;  %7684 = vst [vmem:[#allocation123_spill] sm:$0xff] %v6611_v44 }
 0x3e0   :  { %v6587_v18 = vpop.permute.xlu0 %2134  ;;  %vm7369_vm7 = vcmp.ne.s32.totalorder %v6611_v44, 255  ;;  %v3397_v16 = vadd.f32 %v3396_v10, %v3395_v13  ;;  %v3398_v56 = vsel %vm3038_vm13, %v3647_v34, 0.0  ;;  %v3400_v40 = vsel %vm3038_vm13, %v3648_v35, 0.0  ;;  %v6628_v34 = vld [vmem:[%s7155_s1 + $0x190] sm:$0xff] }
 0x3e1   :  { %v2578_v15 = vsel %vm1176_vm1, %v2392_v28, 0.0  ;;  %v7685_v28 = vld [vmem:[#allocation8_spill] sm:$0xff]  ;;  %7687 = vst [vmem:[#allocation9_spill] sm:$0xff] %v6628_v34  ;;  %vm2832_vm9 = vcmp.ne.s32.totalorder %v6628_v34, 255  ;;  %v2387_v10 = vmul.f32 %v3591_v7, %v7688_v32  ;;  %v2557_v35 = vsel %vm1176_vm1, %v2385_v26, 0.0  ;;  %v7689_v7 = vld [vmem:[#allocation46_spill] sm:$0xff] }
 0x3e2   :  { %2552 = vadd.xlane.f32.xlu1 %v2551_v41  ;;  %2579 = vadd.xlane.f32.xlu0 %v2578_v15  ;;  %4113 = vlog2.f32 %v7685_v28  ;;  %v3650_v41 = vsel %vm7369_vm7, 1.0, %v7586_v43  ;;  %v7686_v15 = vld [vmem:[#allocation105_spill] sm:$0xff]  ;;  %v3399_v2 = vadd.f32 %v3398_v56, %v3397_v16  ;;  %v3649_v13 = vsel %vm2832_vm9, 1.0, %v7586_v43  ;;  %v6648_v26 = vld [vmem:[%s7155_s1 + $0x1a8] sm:$0xff] }
 0x3e3   :  { %v6618_v1 = vpop.xlane.xlu1 %2426  ;;  %4115 = vlog2.f32 %v7686_v15  ;;  %v3593_v28 = vsel %vm2197_vm8, 1.0, %v7586_v43  ;;  %v3404_v56 = vsel %vm3038_vm13, %v3650_v41, 0.0  ;;  %vm2199_vm7 = vcmp.eq.s32.totalorder %v5497_v58, %v6530_v14  ;;  %7690 = vst [vmem:[#allocation125_spill] sm:$0xff] %v6648_v26  ;;  %v7692_v41 = vld [vmem:[#allocation39_spill] sm:$0xff] }
 0x3e4   :  { %v2138_v20 = vpop.permute.xlu0 %2137  ;;  %v3401_v15 = vadd.f32 %v3400_v40, %v3399_v2  ;;  %vm7373_vm8 = vcmp.ne.s32.totalorder %v6648_v26, 255  ;;  %v3402_v34 = vsel %vm3038_vm13, %v3649_v13, 0.0  ;;  %v4110_v40 = vpop.eup %4109  ;;  %v3595_v13 = vsel %vm2199_vm7, 1.0, %v7586_v43 }
 0x3e5   :  { %vm2202_vm5 = vcmp.eq.s32.totalorder %v5497_v58, %v2138_v20  ;;  %v3652_v2 = vsel %vm7373_vm8, 1.0, %v7586_v43  ;;  %vm2201_vm8 = vcmp.eq.s32.totalorder %v5497_v58, %v6587_v18  ;;  %v6687_v58 = vld [vmem:[%s7155_s1 + $0x1b0] sm:$0xff] }
 0x3e6   :  { %v3598_v16 = vsel %vm2202_vm5, 1.0, %v7586_v43  ;;  %2558 = vadd.xlane.f32.xlu1 %v2557_v35  ;;  %v7691_v35 = vld [vmem:[#allocation142_spill] sm:$0xff]  ;;  %v3403_v14 = vadd.f32 %v3402_v34, %v3401_v15  ;;  %vm7374_vm5 = vcmp.ne.s32.totalorder %v6662_v45, 255  ;;  %v3408_v15 = vsel %vm3038_vm13, %v3652_v2, 0.0  ;;  %7695 = vst [vmem:[#allocation168_spill] sm:$0xff] %v6687_v58  ;;  %v7696_v2 = vld [vmem:[#allocation107_spill] sm:$0xff] }
 0x3e7   :  { %v2394_v32 = vmul.f32 %v3598_v16, %v7689_v7  ;;  %v6643_v20 = vpop.xlane.xlu1 %2429  ;;  %4117 = vlog2.f32 %v7691_v35  ;;  %v2389_v16 = vmul.f32 %v3593_v28, %v7692_v41  ;;  %v2563_v7 = vsel %vm1176_vm1, %v2387_v10, 0.0  ;;  %v4112_v18 = vpop.eup %4111  ;;  %v7698_v45 = vld [vmem:[#allocation147_spill] sm:$0xff] }
 0x3e8   :  { %v3651_v34 = vsel %vm7374_vm5, 1.0, %v7586_v43  ;;  %v3405_v28 = vadd.f32 %v3404_v56, %v3403_v14  ;;  %vm2836_vm5 = vcmp.ne.s32.totalorder %v6687_v58, 255  ;;  %4119 = vlog2.f32 %v7696_v2  ;;  %v7697_v14 = vld [vmem:[#allocation43_spill] sm:$0xff] }
 0x3e9   :  { %v2584_v44 = vsel %vm1176_vm1, %v2394_v32, 0.0  ;;  %v6677_v32 = vld [vmem:[%s7155_s1 + $0x1b8] sm:$0xff]  ;;  %v2391_v41 = vmul.f32 %v3595_v13, %v7697_v14  ;;  %4121 = vlog2.f32 %v7698_v45  ;;  %v1754_v14 = vmul.f32 0.6931472, %v4110_v40  ;;  %v7700_v45 = vld [vmem:[#allocation110_spill] sm:$0xff] }
 0x3ea   :  { %2564 = vadd.xlane.f32.xlu1 %v2563_v7  ;;  %2585 = vadd.xlane.f32.xlu0 %v2584_v44  ;;  %7694 = vst [vmem:[#allocation13_spill] sm:$0xff] %v6677_v32  ;;  %vm7378_vm7 = vcmp.ne.s32.totalorder %v6677_v32, 255  ;;  %v3406_v44 = vsel %vm3038_vm13, %v3651_v34, 0.0  ;;  %v2569_v7 = vsel %vm1176_vm1, %v2389_v16, 0.0  ;;  %v3653_v34 = vsel %vm2836_vm5, 1.0, %v7586_v43  ;;  %v6705_v16 = vld [vmem:[%s7155_s1 + $0x1c8] sm:$0xff] }
 0x3eb   :  { %v6671_v10 = vpop.xlane.xlu1 %2432  ;;  %v3654_v56 = vsel %vm7378_vm7, 1.0, %v7586_v43  ;;  %v3407_v35 = vadd.f32 %v3406_v44, %v3405_v28  ;;  %v3597_v28 = vsel %vm2201_vm8, 1.0, %v7586_v43  ;;  %v3410_v32 = vsel %vm3038_vm13, %v3653_v34, 0.0  ;;  %7699 = vst [vmem:[#allocation12_spill] sm:$0xff] %v6705_v16  ;;  %v7701_v34 = vld [vmem:[#allocation47_spill] sm:$0xff] }
 0x3ec   :  { %v3412_v2 = vsel %vm3038_vm13, %v3654_v56, 0.0  ;;  %vm7382_vm7 = vcmp.ne.s32.totalorder %v6705_v16, 255  ;;  %4123 = vlog2.f32 %v7700_v45  ;;  %v2393_v58 = vmul.f32 %v3597_v28, %v7701_v34  ;;  %v7703_v16 = vld [vmem:[#allocation152_spill] sm:$0xff]  ;;  %v6730_v28 = vld [vmem:[%s7155_s1 + $0x1d8] sm:$0xff] }
 0x3ed   :  { %v3409_v44 = vadd.f32 %v3408_v15, %v3407_v35  ;;  %v3656_v15 = vsel %vm7382_vm7, 1.0, %v7586_v43  ;;  %v2575_v56 = vsel %vm1176_vm1, %v2391_v41, 0.0  ;;  %vm7383_vm8 = vcmp.ne.s32.totalorder %v6717_v63, 255  ;;  %7704 = vst [vmem:[#allocation15_spill] sm:$0xff] %v6730_v28 }
 0x3ee   :  { %2570 = vadd.xlane.f32.xlu1 %v2569_v7  ;;  %v1758_v40 = vmul.f32 0.6931472, %v4112_v18  ;;  %4125 = vlog2.f32 %v7703_v16  ;;  %v3416_v41 = vsel %vm3038_vm13, %v3656_v15, 0.0  ;;  %vm2841_vm7 = vcmp.ne.s32.totalorder %v6730_v28, 255  ;;  %v6740_v16 = vld [vmem:[%s7155_s1 + $0x1d0] sm:$0xff]  ;;  %v7708_v28 = vld [vmem:[#allocation53_spill] sm:$0xff] }
 0x3ef   :  { %v6699_v26 = vpop.xlane.xlu1 %2435  ;;  %v4114_v13 = vpop.eup %4113  ;;  %v3411_v35 = vadd.f32 %v3410_v32, %v3409_v44  ;;  %v3655_v32 = vsel %vm7383_vm8, 1.0, %v7586_v43  ;;  %7705 = vst [vmem:[#allocation14_spill] sm:$0xff] %v6740_v16  ;;  %vm7391_vm8 = vcmp.ne.s32.totalorder %v6740_v16, 255  ;;  %v2581_v12 = vsel %vm1176_vm1, %v2393_v58, 0.0  ;;  %v6758_v58 = vld [vmem:[%s7155_s1 + $0x1e8] sm:$0xff] }
 0x3f0   :  { %v4116_v7 = vpop.eup %4115  ;;  %v3414_v18 = vsel %vm3038_vm13, %v3655_v32, 0.0  ;;  %v1756_v34 = vmul.f32 0.6931472, %v4114_v13  ;;  %v3657_v13 = vsel %vm7391_vm8, 1.0, %v7586_v43  ;;  %v7707_v32 = vld [vmem:[#allocation112_spill] sm:$0xff]  ;;  %7710 = vst [vmem:[#allocation29_spill] sm:$0xff] %v6758_v58 }
 0x3f1   :  { %v3413_v44 = vadd.f32 %v3412_v2, %v3411_v35  ;;  %v3658_v2 = vsel %vm2841_vm7, 1.0, %v7586_v43  ;;  %4127 = vlog2.f32 %v7707_v32  ;;  %v3418_v24 = vsel %vm3038_vm13, %v3657_v13, 0.0  ;;  %v7715_v32 = vld [vmem:[#allocation192_spill] sm:$0xff] }
 0x3f2   :  { %2576 = vadd.xlane.f32.xlu1 %v2575_v56  ;;  %v7706_v56 = vld [vmem:[#allocation49_spill] sm:$0xff]  ;;  %v1760_v52 = vmul.f32 0.6931472, %v4116_v7  ;;  %4129 = vlog2.f32 %v7709_v62  ;;  %vm7398_vm1 = vcmp.ne.s32.totalorder %v6758_v58, 255 }
 0x3f3   :  { %v6724_v45 = vpop.xlane.xlu1 %2438  ;;  %v3415_v35 = vadd.f32 %v3414_v18, %v3413_v44  ;;  %v1881_v63 = vadd.f32 %v1754_v14, %v7706_v56  ;;  %v1883_v44 = vadd.f32 %v1758_v40, %v7708_v28  ;;  %v3420_v14 = vsel %vm3038_vm13, %v3658_v2, 0.0  ;;  %v7711_v56 = vld [vmem:[#allocation48_spill] sm:$0xff]  ;;  %v6770_v2 = vld [vmem:[%s7155_s1 + $0x1e0] sm:$0xff] }
 0x3f4   :  { %v4118_v15 = vpop.eup %4117  ;;  %v1882_v40 = vadd.f32 %v1756_v34, %v7711_v56  ;;  %v3660_v7 = vsel %vm7398_vm1, 1.0, %v7586_v43  ;;  %7714 = vst [vmem:[#allocation16_spill] sm:$0xff] %v6770_v2  ;;  %vm7397_vm8 = vcmp.ne.s32.totalorder %v6770_v2, 255  ;;  %v7716_v56 = vld [vmem:[#allocation150_spill] sm:$0xff] }
 0x3f5   :  { %v3417_v18 = vadd.f32 %v3416_v41, %v3415_v35  ;;  %v1762_v28 = vmul.f32 0.6931472, %v4118_v15  ;;  %v7713_v35 = vld [vmem:[#allocation114_spill] sm:$0xff]  ;;  %v4120_v13 = vpop.eup %4119  ;;  %v7717_v15 = vld [vmem:[#allocation157_spill] sm:$0xff]  ;;  %v3424_v16 = vsel %vm3038_vm13, %v3660_v7, 0.0 }
 0x3f6   :  { %2582 = vadd.xlane.f32.xlu1 %v2581_v12  ;;  %v7712_v12 = vld [vmem:[#allocation148_spill] sm:$0xff]  ;;  %4131 = vlog2.f32 %v7713_v35  ;;  %v2588_v34 = vsub.f32 %v1882_v40, %v7715_v32  ;;  %v4122_v47 = vpop.eup %4121  ;;  %v1764_v7 = vmul.f32 0.6931472, %v4120_v13 }
 0x3f7   :  { %v6752_v5 = vpop.xlane.xlu1 %2441  ;;  %v2587_v41 = vsub.f32 %v1881_v63, %v7712_v12  ;;  %v3419_v62 = vadd.f32 %v3418_v24, %v3417_v18  ;;  %v2589_v63 = vsub.f32 %v1883_v44, %v7716_v56  ;;  %v3659_v12 = vsel %vm7397_vm8, 1.0, %v7586_v43  ;;  %v7718_v18 = vld [vmem:[#allocation52_spill] sm:$0xff]  ;;  %v6789_v44 = vld [vmem:[%s7155_s1 + $0x1f8] sm:$0xff] }
 0x3f8   :  { %4133 = vlog2.f32 %v7717_v15  ;;  %v1884_v35 = vadd.f32 %v1760_v52, %v7718_v18  ;;  %v3422_v33 = vsel %vm3038_vm13, %v3659_v12, 0.0  ;;  %7720 = vst [vmem:[#allocation17_spill] sm:$0xff] %v6789_v44  ;;  %vm2845_vm8 = vcmp.ne.s32.totalorder %v6789_v44, 255  ;;  %v6795_v52 = vld [vmem:[%s7155_s1 + $0x1f0] sm:$0xff]  ;;  %v7728_v12 = vld [vmem:[#allocation118_spill] sm:$0xff]  ;;  %s4312_s1 = smov [#allocation2]  }
 0x3f9   :  { %v3421_v24 = vadd.f32 %v3420_v14, %v3419_v62  ;;  %v2974_v40 = vsel %vm2782_vm12, %v2587_v41, 0.0  ;;  %7721 = vst [vmem:[#allocation32_spill] sm:$0xff] %v6795_v52  ;;  %vm2844_vm1 = vcmp.ne.s32.totalorder %v6795_v52, 255  ;;  %v7722_v62 = vld [vmem:[#allocation116_spill] sm:$0xff]  ;;  %v3662_v27 = vsel %vm2845_vm8, 1.0, %v7586_v43  ;;  %v4124_v32 = vpop.eup %4123  ;;  %v7726_v52 = vld [vmem:[#allocation194_spill] sm:$0xff] }
 0x3fa   :  { %4135 = vlog2.f32 %v7722_v62  ;;  %v3661_v41 = vsel %vm2844_vm1, 1.0, %v7586_v43  ;;  %v2975_v56 = vsel %vm2783_vm11, %v2588_v34, 0.0  ;;  %v1766_v18 = vmul.f32 0.6931472, %v4122_v47  ;;  %v7725_v62 = vld [vmem:[#allocation159_spill] sm:$0xff]  ;;  %s3449_s7 = sshll.u32 %s4312_s1, 4  ;;  %s3450_s7 = int_to_ptr.vmem [resolvable:$true] %s3449_s7 }
 0x3fb   :  { %v6780_v58 = vpop.xlane.xlu1 %2444  ;;  %v3423_v14 = vadd.f32 %v3422_v33, %v3421_v24  ;;  %v2976_v24 = vsel %vm2784_vm14, %v2589_v63, 0.0  ;;  %v3426_v15 = vsel %vm3038_vm13, %v3661_v41, 0.0  ;;  %4137 = vlog2.f32 %v7725_v62  ;;  %v4126_v6 = vpop.eup %4125  ;;  %v7729_v41 = vld [vmem:[#allocation151_spill] sm:$0xff]  ;;  %v7730_v62 = vld [vmem:[#allocation56_spill] sm:$0xff]  ;;  %s4266_s12 = scalar_lea.vmem %s3450_s7, 128  ;;  %p4271_p1 = scmp.lt.s32.totalorder %s3450_s7, %s3450_s7 }
 0x3fc   :  { %v3039_v44 = vsel %vm3038_vm13, %v2974_v40, 0.0  ;;  %v2590_v43 = vsub.f32 %v1884_v35, %v7726_v52  ;;  %v1885_v49 = vadd.f32 %v1762_v28, %v7727_v46  ;;  %v3428_v34 = vsel %vm3038_vm13, %v3662_v27, 0.0  ;;  %v7731_v35 = vld [vmem:[#allocation61_spill] sm:$0xff]  ;;  %p4267_p0 = scmp.ne.s32.totalorder %s3450_s7, %s4266_s12  ;;  %p4272_p2 = scmp.lt.s32.totalorder %s4266_s12, %s4266_s12 }
 0x3fd   :  { %v3425_v13 = vadd.f32 %v3424_v16, %v3423_v14  ;;  %4139 = vlog2.f32 %v7728_v12  ;;  %v3040_v63 = vsel %vm3038_vm13, %v2975_v56, 0.0  ;;  %v3042_v47 = vsel %vm3038_vm13, %v2976_v24, 0.0 }
 0x3fe   :  { %v1768_v16 = vmul.f32 0.6931472, %v4124_v32  ;;  %v3041_v14 = vadd.f32 %v3040_v63, %v3039_v44  ;;  %v2591_v40 = vsub.f32 %v1885_v49, %v7729_v41  ;;  %v1886_v61 = vadd.f32 %v1764_v7, %v7730_v62  ;;  %v4128_v3 = vpop.eup %4127  ;;  %v7734_v32 = vld [vmem:[#allocation153_spill] sm:$0xff]  ;;  %v7735_v49 = vld [vmem:[#allocation60_spill] sm:$0xff]  ;;  %v7739_v62 = vld [vmem:[#allocation163_spill] sm:$0xff]  ;;  %p4273_p3 = por %p4272_p2, %p4271_p1 }
 0x3ff   :  { %v6812_v2 = vpop.xlane.xlu1 %2447  ;;  %v3427_v33 = vadd.f32 %v3426_v15, %v3425_v13  ;;  %v1887_v52 = vadd.f32 %v1766_v18, %v7731_v35  ;;  %v1770_v46 = vmul.f32 0.6931472, %v4126_v6  ;;  %v4130_v27 = vpop.eup %4129  ;;  %v7732_v15 = vld [vmem:[#allocation161_spill] sm:$0xff]  ;;  %v2977_v56 = vsel %vm2785_vm15, %v2590_v43, 0.0  ;;  %v7738_v18 = vld [vmem:[#allocation196_spill] sm:$0xff] }
 0x400   :  { %4141 = vlog2.f32 %v7732_v15  ;;  %v3043_v24 = vadd.f32 %v3042_v47, %v3041_v14  ;;  %v2592_v44 = vsub.f32 %v1886_v61, %v7734_v32  ;;  %v1888_v12 = vadd.f32 %v1768_v16, %v7735_v49  ;;  %v7741_v13 = vld [vmem:[#allocation65_spill] sm:$0xff]  ;;  %p4274_p4 = pnand %p4273_p3, %p4267_p0 }
 0x401   :  { %v3429_v50 = vadd.f32 %v3428_v34, %v3427_v33  ;;  %v7736_v33 = vld [vmem:[#allocation122_spill] sm:$0xff]  ;;  %v2978_v6 = vsel %vm2786_vm0, %v2591_v40, 0.0  ;;  %v2593_v63 = vsub.f32 %v1887_v52, %v7738_v18  ;;  %v1772_v41 = vmul.f32 0.6931472, %v4128_v3  ;;  %v7744_v34 = vld [vmem:[#allocation64_spill] sm:$0xff]  ;;  %v7745_v18 = vld [vmem:[#allocation167_spill] sm:$0xff] }
 0x402   :  { %4143 = vlog2.f32 %v7736_v33  ;;  %v3044_v35 = vsel %vm3038_vm13, %v2977_v56, 0.0  ;;  %v1774_v43 = vmul.f32 0.6931472, %v4130_v27  ;;  %v2979_v16 = vsel %vm2787_vm2, %v2592_v44, 0.0  ;;  %v7742_v40 = vld [vmem:[#allocation126_spill] sm:$0xff]  ;;  %v7747_v14 = vld [vmem:[#allocation129_spill] sm:$0xff] }
 0x403   :  { %v6823_v28 = vpop.xlane.xlu1 %2450  ;;  %3430 = vadd.xlane.f32.xlu0 %v3429_v50  ;;  %v4132_v7 = vpop.eup %4131  ;;  %4145 = vlog2.f32 %v7739_v62  ;;  %v3045_v50 = vadd.f32 %v3044_v35, %v3043_v24  ;;  %v2594_v15 = vsub.f32 %v1888_v12, %v6514_v59  ;;  %v1889_v32 = vadd.f32 %v1770_v46, %v7741_v13  ;;  %v7746_v59 = vld [vmem:[#allocation69_spill] sm:$0xff] }
 0x404   :  { %4147 = vlog2.f32 %v7742_v40  ;;  %v3046_v3 = vsel %vm3038_vm13, %v2978_v6, 0.0  ;;  %v1776_v52 = vmul.f32 0.6931472, %v4132_v7  ;;  %v2980_v27 = vsel %vm2788_vm4, %v2593_v63, 0.0 }
 0x405   :  { %v4134_v61 = vpop.eup %4133  ;;  %v2595_v56 = vsub.f32 %v1889_v32, %v6544_v57  ;;  %v1890_v24 = vadd.f32 %v1772_v41, %v7744_v34  ;;  %4149 = vlog2.f32 %v7745_v18  ;;  %v3048_v44 = vsel %vm3038_vm13, %v2979_v16, 0.0  ;;  %v7748_v41 = vld [vmem:[#allocation68_spill] sm:$0xff] }
 0x406   :  { %v1891_v12 = vadd.f32 %v1774_v43, %v7746_v59  ;;  %v3047_v35 = vadd.f32 %v3046_v3, %v3045_v50  ;;  %v2981_v7 = vsel %vm2789_vm6, %v2594_v15, 0.0  ;;  %v1778_v63 = vmul.f32 0.6931472, %v4134_v61  ;;  %v7750_v3 = vld [vmem:[#allocation172_spill] sm:$0xff] }
 0x407   :  { %v6836_v47 = vpop.xlane.xlu1 %2453  ;;  %v4136_v49 = vpop.eup %4135  ;;  %v2596_v6 = vsub.f32 %v1890_v24, %v6577_v31  ;;  %4151 = vlog2.f32 %v7747_v14  ;;  %v3050_v57 = vsel %vm3038_vm13, %v2980_v27, 0.0  ;;  %v1892_v13 = vadd.f32 %v1776_v52, %v7748_v41  ;;  %v7752_v27 = vld [vmem:[#allocation73_spill] sm:$0xff]  ;;  %v7755_v59 = vld [vmem:[#allocation72_spill] sm:$0xff] }
 0x408   :  { %v4138_v62 = vpop.eup %4137  ;;  %v3049_v16 = vadd.f32 %v3048_v44, %v3047_v35  ;;  %vm7749_vm11 = vcmp.ne.s32.totalorder %v5564_v53, 255  ;;  %v2597_v40 = vsub.f32 %v1891_v12, %v6618_v1  ;;  %v1780_v50 = vmul.f32 0.6931472, %v4136_v49  ;;  %v7757_v35 = vld [vmem:[#allocation77_spill] sm:$0xff] }
 0x409   :  { %v2982_v43 = vsel %vm7749_vm11, %v2595_v56, 0.0  ;;  %4153 = vlog2.f32 %v7750_v3  ;;  %v3052_v8 = vsel %vm3038_vm13, %v2981_v7, 0.0  ;;  %v1782_v31 = vmul.f32 0.6931472, %v4138_v62  ;;  %v7753_v56 = vld [vmem:[#allocation131_spill] sm:$0xff]  ;;  %v7756_v62 = vld [vmem:[#allocation177_spill] sm:$0xff] }
 0x40a   :  { %v4140_v32 = vpop.eup %4139  ;;  %v3051_v15 = vadd.f32 %v3050_v57, %v3049_v16  ;;  %vm7751_vm12 = vcmp.ne.s32.totalorder %v5755_v4, 255  ;;  %v2598_v52 = vsub.f32 %v1892_v13, %v6643_v20  ;;  %v1893_v34 = vadd.f32 %v1778_v63, %v7752_v27 }
 0x40b   :  { %v6851_v46 = vpop.xlane.xlu1 %2456  ;;  %v2983_v33 = vsel %vm7751_vm12, %v2596_v6, 0.0  ;;  %4155 = vlog2.f32 %v7753_v56  ;;  %v3054_v1 = vsel %vm3038_vm13, %v2982_v43, 0.0  ;;  %v1784_v49 = vmul.f32 0.6931472, %v4140_v32  ;;  %v7760_v32 = vld [vmem:[#allocation76_spill] sm:$0xff]  ;;  %v7765_v56 = vld [vmem:[#allocation138_spill] sm:$0xff] }
 0x40c   :  { %v3053_v24 = vadd.f32 %v3052_v8, %v3051_v15  ;;  %vm7754_vm14 = vcmp.ne.s32.totalorder %v5572_v30, 255  ;;  %v2599_v44 = vsub.f32 %v1893_v34, %v6671_v10  ;;  %v1894_v12 = vadd.f32 %v1780_v50, %v7755_v59  ;;  %v7759_v10 = vld [vmem:[#allocation135_spill] sm:$0xff]  ;;  %v7767_v59 = vld [vmem:[#allocation80_spill] sm:$0xff] }
 0x40d   :  { %v4142_v53 = vpop.eup %4141  ;;  %v2984_v18 = vsel %vm7754_vm14, %v2597_v40, 0.0  ;;  %4157 = vlog2.f32 %v7756_v62  ;;  %v3056_v20 = vsel %vm3038_vm13, %v2983_v33, 0.0  ;;  %v1895_v7 = vadd.f32 %v1782_v31, %v7757_v35  ;;  %v7762_v31 = vld [vmem:[#allocation182_spill] sm:$0xff] }
 0x40e   :  { %v3055_v14 = vadd.f32 %v3054_v1, %v3053_v24  ;;  %vm7758_vm15 = vcmp.ne.s32.totalorder %v5763_v25, 255  ;;  %v2600_v30 = vsub.f32 %v1894_v12, %v6699_v26  ;;  %v1786_v41 = vmul.f32 0.6931472, %v4142_v53  ;;  %v7764_v53 = vld [vmem:[#allocation81_spill] sm:$0xff] }
 0x40f   :  { %v6864_v61 = vpop.xlane.xlu1 %2459  ;;  %v4144_v4 = vpop.eup %4143  ;;  %v2985_v57 = vsel %vm7758_vm15, %v2598_v52, 0.0  ;;  %4159 = vlog2.f32 %v7759_v10  ;;  %v3058_v13 = vsel %vm3038_vm13, %v2984_v18, 0.0  ;;  %v1896_v16 = vadd.f32 %v1784_v49, %v7760_v32 }
 0x410   :  { %v4146_v63 = vpop.eup %4145  ;;  %v3057_v40 = vadd.f32 %v3056_v20, %v3055_v14  ;;  %vm7761_vm0 = vcmp.ne.s32.totalorder %v5580_v60, 255  ;;  %v2601_v3 = vsub.f32 %v1895_v7, %v6724_v45  ;;  %v1788_v8 = vmul.f32 0.6931472, %v4144_v4  ;;  %v7768_v4 = vld [vmem:[#allocation85_spill] sm:$0xff] }
 0x411   :  { %v4148_v43 = vpop.eup %4147  ;;  %v2986_v50 = vsel %vm7761_vm0, %v2599_v44, 0.0  ;;  %4161 = vlog2.f32 %v7762_v31  ;;  %v3060_v25 = vsel %vm3038_vm13, %v2985_v57, 0.0  ;;  %v1790_v26 = vmul.f32 0.6931472, %v4146_v63  ;;  %v7769_v7 = vld [vmem:[#allocation185_spill] sm:$0xff]  ;;  %v7771_v57 = vld [vmem:[#allocation84_spill] sm:$0xff] }
 0x412   :  { %v4150_v33 = vpop.eup %4149  ;;  %v3059_v52 = vadd.f32 %v3058_v13, %v3057_v40  ;;  %vm7763_vm2 = vcmp.ne.s32.totalorder %v5769_v23, 255  ;;  %v2602_v34 = vsub.f32 %v1896_v16, %v6752_v5  ;;  %v1897_v60 = vadd.f32 %v1786_v41, %v7764_v53  ;;  %v7772_v13 = vld [vmem:[#allocation141_spill] sm:$0xff]  ;;  %v7777_v53 = vld [vmem:[#allocation88_spill] sm:$0xff] }
 0x413   :  { %v6879_v6 = vpop.xlane.xlu1 %2462  ;;  %v2987_v27 = vsel %vm7763_vm2, %v2600_v30, 0.0  ;;  %4163 = vlog2.f32 %v7765_v56  ;;  %v3062_v45 = vsel %vm3038_vm13, %v2986_v50, 0.0  ;;  %v1792_v1 = vmul.f32 0.6931472, %v4148_v43 }
 0x414   :  { %v4152_v49 = vpop.eup %4151  ;;  %v3061_v24 = vadd.f32 %v3060_v25, %v3059_v52  ;;  %vm7766_vm4 = vcmp.ne.s32.totalorder %v5588_v39, 255  ;;  %v2603_v44 = vsub.f32 %v1897_v60, %v6780_v58  ;;  %v1898_v12 = vadd.f32 %v1788_v8, %v7767_v59  ;;  %v7775_v25 = vld [vmem:[#allocation89_spill] sm:$0xff] }
 0x415   :  { %v2988_v18 = vsel %vm7766_vm4, %v2601_v3, 0.0  ;;  %v3064_v23 = vsel %vm3038_vm13, %v2987_v27, 0.0  ;;  %v1899_v5 = vadd.f32 %v1790_v26, %v7768_v4  ;;  %v1794_v62 = vmul.f32 0.6931472, %v4150_v33 }
 0x416   :  { %v4154_v35 = vpop.eup %4153  ;;  %4165 = vlog2.f32 %v7769_v7  ;;  %v3063_v63 = vadd.f32 %v3062_v45, %v3061_v24  ;;  %vm7770_vm6 = vcmp.ne.s32.totalorder %v5777_v17, 255  ;;  %v2604_v39 = vsub.f32 %v1898_v12, %v6812_v2  ;;  %v7779_v24 = vld [vmem:[#allocation187_spill] sm:$0xff] }
 0x417   :  { %v6892_v15 = vpop.xlane.xlu1 %2465  ;;  %v2989_v14 = vsel %vm7770_vm6, %v2602_v34, 0.0  ;;  %v3066_v58 = vsel %vm3038_vm13, %v2988_v18, 0.0  ;;  %v1900_v30 = vadd.f32 %v1792_v1, %v7771_v57  ;;  %v1796_v41 = vmul.f32 0.6931472, %v4152_v49 }
 0x418   :  { %v4156_v10 = vpop.eup %4155  ;;  %4167 = vlog2.f32 %v7772_v13  ;;  %v3065_v32 = vadd.f32 %v3064_v23, %v3063_v63  ;;  %vm7773_vm11 = vcmp.ne.s32.totalorder %v5596_v29, 255  ;;  %v2605_v43 = vsub.f32 %v1899_v5, %v6823_v28  ;;  %v7781_v5 = vld [vmem:[#allocation145_spill] sm:$0xff]  ;;  %v7783_v63 = vld [vmem:[#allocation134_spill] sm:$0xff]  ;;  %v7786_v13 = vld [vmem:[#allocation11_spill] sm:$0xff] }
 0x419   :  { %v2990_v16 = vsel %vm7773_vm11, %v2603_v44, 0.0  ;;  %v3068_v40 = vsel %vm3038_vm13, %v2989_v14, 0.0  ;;  %v1798_v17 = vmul.f32 0.6931472, %v4154_v35  ;;  %vm7774_vm12 = vcmp.ne.s32.totalorder %v5785_v48, 255  ;;  %v7778_v48 = vld [vmem:[#allocation93_spill] sm:$0xff] }
 0x41a   :  { %v4158_v2 = vpop.eup %4157  ;;  %v3067_v3 = vadd.f32 %v3066_v58, %v3065_v32  ;;  %v2991_v8 = vsel %vm7774_vm12, %v2604_v39, 0.0  ;;  %v2606_v31 = vsub.f32 %v1900_v30, %v6836_v47  ;;  %v1901_v26 = vadd.f32 %v1794_v62, %v7775_v25  ;;  %v7785_v30 = vld [vmem:[#allocation96_spill] sm:$0xff] }
 0x41b   :  { %v6906_v20 = vpop.xlane.xlu1 %2468  ;;  %v3070_v33 = vsel %vm3038_vm13, %v2990_v16, 0.0  ;;  %v1800_v29 = vmul.f32 0.6931472, %v4156_v10  ;;  %vm7776_vm14 = vcmp.ne.s32.totalorder %v5604_v37, 255  ;;  %v1902_v60 = vadd.f32 %v1796_v41, %v7777_v53 }
 0x41c   :  { %v4160_v52 = vpop.eup %4159  ;;  %v3069_v27 = vadd.f32 %v3068_v40, %v3067_v3  ;;  %v2992_v28 = vsel %vm7776_vm14, %v2605_v43, 0.0  ;;  %v2607_v34 = vsub.f32 %v1901_v26, %v6851_v46  ;;  %v3072_v56 = vsel %vm3038_vm13, %v2991_v8, 0.0  ;;  %v7780_v46 = vld [vmem:[#allocation92_spill] sm:$0xff]  ;;  %v7788_v40 = vld [vmem:[#allocation97_spill] sm:$0xff]  ;;  %v7790_v3 = vld [vmem:[#allocation99_spill] sm:$0xff] }
 0x41d   :  { %v1903_v45 = vadd.f32 %v1798_v17, %v7778_v48  ;;  %v1802_v1 = vmul.f32 0.6931472, %v4158_v2  ;;  %4169 = vlog2.f32 %v7779_v24  ;;  %v2993_v44 = vsel %vm2801_vm3, %v2606_v31, 0.0  ;;  %v7789_v2 = vld [vmem:[#allocation139_spill] sm:$0xff] }
 0x41e   :  { %v4162_v49 = vpop.eup %4161  ;;  %v3071_v18 = vadd.f32 %v3070_v33, %v3069_v27  ;;  %v2608_v37 = vsub.f32 %v1902_v60, %v6864_v61  ;;  %v3074_v59 = vsel %vm3038_vm13, %v2992_v28, 0.0  ;;  %v1904_v12 = vadd.f32 %v1800_v29, %v7780_v46  ;;  %v7792_v29 = vld [vmem:[#allocation106_spill] sm:$0xff] }
 0x41f   :  { %v6919_v50 = vpop.xlane.xlu1 %2471  ;;  %v1804_v23 = vmul.f32 0.6931472, %v4160_v52  ;;  %4171 = vlog2.f32 %v7781_v5  ;;  %vm7782_vm15 = vcmp.ne.s32.totalorder %v5612_v0, 255  ;;  %v2609_v7 = vsub.f32 %v1903_v45, %v6879_v6  ;;  %v7793_v52 = vld [vmem:[#allocation28_spill] sm:$0xff] }
 0x420   :  { %v4164_v4 = vpop.eup %4163  ;;  %v3073_v62 = vadd.f32 %v3072_v56, %v3071_v18  ;;  %v2994_v35 = vsel %vm7782_vm15, %v2607_v34, 0.0  ;;  %4173 = vlog2.f32 %v7783_v63  ;;  %v3076_v11 = vsel %vm3038_vm13, %v2993_v44, 0.0  ;;  %v7797_v18 = vld [vmem:[#allocation144_spill] sm:$0xff] }
 0x421   :  { %v1806_v14 = vmul.f32 0.6931472, %v4162_v49  ;;  %vm7784_vm3 = vcmp.ne.s32.totalorder %v5799_v55, 255  ;;  %v2610_v57 = vsub.f32 %v1904_v12, %v6892_v15  ;;  %v1905_v41 = vadd.f32 %v1802_v1, %v7785_v30  ;;  %v7796_v1 = vld [vmem:[#allocation31_spill] sm:$0xff] }
 0x422   :  { %v3075_v39 = vadd.f32 %v3074_v59, %v3073_v62  ;;  %v2995_v58 = vsel %vm7784_vm3, %v2608_v37, 0.0  ;;  %4175 = vlog2.f32 %v7786_v13  ;;  %v3078_v0 = vsel %vm3038_vm13, %v2994_v35, 0.0  ;;  %v7799_v59 = vld [vmem:[#allocation102_spill] sm:$0xff] }
 0x423   :  { %v2475_v47 = vpop.xlane.xlu1 %2474  ;;  %v4166_v10 = vpop.eup %4165  ;;  %v1808_v6 = vmul.f32 0.6931472, %v4164_v4  ;;  %vm7787_vm0 = vcmp.ne.s32.totalorder %v5620_v54, 255  ;;  %v2611_v43 = vsub.f32 %v1905_v41, %v6906_v20  ;;  %v1906_v17 = vadd.f32 %v1804_v23, %v7788_v40  ;;  %v7806_v40 = vld [vmem:[#allocation149_spill] sm:$0xff] }
 0x424   :  { %v3077_v32 = vadd.f32 %v3076_v11, %v3075_v39  ;;  %v2996_v16 = vsel %vm7787_vm0, %v2609_v7, 0.0  ;;  %4177 = vlog2.f32 %v7789_v2  ;;  %v3080_v15 = vsel %vm3038_vm13, %v2995_v58, 0.0  ;;  %v7803_v58 = vld [vmem:[#allocation111_spill] sm:$0xff]  ;;  %v7807_v2 = vld [vmem:[#allocation37_spill] sm:$0xff] }
 0x425   :  { %v4168_v55 = vpop.eup %4167  ;;  %v1907_v8 = vadd.f32 %v1806_v14, %v7790_v3  ;;  %vm7791_vm2 = vcmp.ne.s32.totalorder %v5807_v21, 255  ;;  %v2612_v33 = vsub.f32 %v1906_v17, %v6919_v50  ;;  %v1810_v54 = vmul.f32 0.6931472, %v4166_v10  ;;  %v7801_v14 = vld [vmem:[#allocation109_spill] sm:$0xff] }
 0x426   :  { %v3079_v25 = vadd.f32 %v3078_v0, %v3077_v32  ;;  %v2997_v26 = vsel %vm7791_vm2, %v2610_v57, 0.0  ;;  %4179 = vlog2.f32 %v7792_v29  ;;  %v3082_v20 = vsel %vm3038_vm13, %v2996_v16, 0.0  ;;  %v2487_v57 = vpop.xlane.xlu0 %2486  ;;  %v7808_v3 = vld [vmem:[#allocation113_spill] sm:$0xff]  ;;  %v7810_v29 = vld [vmem:[#allocation154_spill] sm:$0xff] }
 0x427   :  { %v2478_v61 = vpop.xlane.xlu1 %2477  ;;  %v1908_v27 = vadd.f32 %v1808_v6, %v7793_v52  ;;  %vm7794_vm4 = vcmp.ne.s32.totalorder %v7630_v38, 255  ;;  %v2613_v53 = vsub.f32 %v1907_v8, %v2475_v47  ;;  %v1812_v60 = vmul.f32 0.6931472, %v4168_v55 }
 0x428   :  { %v3081_v28 = vadd.f32 %v3080_v15, %v3079_v25  ;;  %v2998_v34 = vsel %vm7794_vm4, %v2611_v43, 0.0  ;;  %v3084_v56 = vsel %vm3038_vm13, %v2997_v26, 0.0  ;;  %vm7795_vm6 = vcmp.ne.s32.totalorder %v7632_v42, 255 }
 0x429   :  { %v2999_v50 = vsel %vm7795_vm6, %v2612_v33, 0.0  ;;  %v2614_v45 = vsub.f32 %v1908_v27, %v2478_v61  ;;  %v1909_v49 = vadd.f32 %v1810_v54, %v7796_v1  ;;  %4181 = vlog2.f32 %v7797_v18  ;;  %v7816_v1 = vld [vmem:[#allocation55_spill] sm:$0xff] }
 0x42a   :  { %v3083_v21 = vadd.f32 %v3082_v20, %v3081_v28  ;;  %v4170_v24 = vpop.eup %4169  ;;  %v3086_v44 = vsel %vm3038_vm13, %v2998_v34, 0.0  ;;  %vm7798_vm11 = vcmp.ne.s32.totalorder %v7634_v19, 255  ;;  %v1910_v46 = vadd.f32 %v1812_v60, %v7799_v59  ;;  %v7811_v20 = vld [vmem:[#allocation50_spill] sm:$0xff] }
 0x42b   :  { %v2481_v31 = vpop.xlane.xlu1 %2480  ;;  %v3000_v38 = vsel %vm7798_vm11, %v2613_v53, 0.0  ;;  %v3088_v23 = vsel %vm3038_vm13, %v2999_v50, 0.0  ;;  %v1814_v5 = vmul.f32 0.6931472, %v4170_v24  ;;  %vm7800_vm12 = vcmp.ne.s32.totalorder %v7638_v9, 255  ;;  %v7804_v9 = vld [vmem:[#allocation41_spill] sm:$0xff] }
 0x42c   :  { %v3085_v37 = vadd.f32 %v3084_v56, %v3083_v21  ;;  %v2615_v47 = vsub.f32 %v1909_v49, %v2481_v31  ;;  %v4172_v12 = vpop.eup %4171  ;;  %v3001_v35 = vsel %vm7800_vm12, %v2614_v45, 0.0  ;;  %v3090_v63 = vsel %vm3038_vm13, %v3000_v38, 0.0  ;;  %v7814_v21 = vld [vmem:[#allocation169_spill] sm:$0xff]  ;;  %v7817_v24 = vld [vmem:[#allocation156_spill] sm:$0xff]  ;;  %v7820_v59 = vld [vmem:[#allocation54_spill] sm:$0xff] }
 0x42d   :  { %v4174_v4 = vpop.eup %4173  ;;  %4183 = vlog2.f32 %v7801_v14  ;;  %vm7802_vm14 = vcmp.ne.s32.totalorder %v7639_v51, 255  ;;  %v1816_v39 = vmul.f32 0.6931472, %v4172_v12  ;;  %v3092_v30 = vsel %vm3038_vm13, %v3001_v35, 0.0 }
 0x42e   :  { %v3087_v62 = vadd.f32 %v3086_v44, %v3085_v37  ;;  %v3002_v61 = vsel %vm7802_vm14, %v2615_v47, 0.0  ;;  %4185 = vlog2.f32 %v7803_v58  ;;  %v1911_v13 = vadd.f32 %v1814_v5, %v7804_v9 }
 0x42f   :  { %v2484_v48 = vpop.xlane.xlu1 %2483  ;;  %v4176_v11 = vpop.eup %4175  ;;  %vm7805_vm15 = vcmp.ne.s32.totalorder %v7644_v36, 255  ;;  %v1818_v32 = vmul.f32 0.6931472, %v4174_v4  ;;  %v3094_v16 = vsel %vm3038_vm13, %v3002_v61, 0.0  ;;  %4187 = vlog2.f32 %v7806_v40  ;;  %v7809_v36 = vld [vmem:[#allocation51_spill] sm:$0xff]  ;;  %v7831_v40 = vld [vmem:[#allocation160_spill] sm:$0xff] }
 0x430   :  { %v2616_v7 = vsub.f32 %v1910_v46, %v2484_v48  ;;  %v3089_v19 = vadd.f32 %v3088_v23, %v3087_v62  ;;  %v1820_v43 = vmul.f32 0.6931472, %v4176_v11  ;;  %v2617_v17 = vsub.f32 %v1911_v13, %v2487_v57  ;;  %v7813_v48 = vld [vmem:[#allocation115_spill] sm:$0xff]  ;;  %v7821_v23 = vld [vmem:[#allocation117_spill] sm:$0xff] }
 0x431   :  { %v4178_v10 = vpop.eup %4177  ;;  %v1912_v15 = vadd.f32 %v1816_v39, %v7807_v2  ;;  %4189 = vlog2.f32 %v7808_v3  ;;  %v1913_v33 = vadd.f32 %v1818_v32, %v7809_v36  ;;  %vm7812_vm3 = vcmp.ne.s32.totalorder %v7641_v22, 255  ;;  %v7818_v22 = vld [vmem:[#allocation127_spill] sm:$0xff] }
 0x432   :  { %v3091_v0 = vadd.f32 %v3090_v63, %v3089_v19  ;;  %v3003_v6 = vsel %vm7805_vm15, %v2616_v7, 0.0  ;;  %v1822_v54 = vmul.f32 0.6931472, %v4178_v10  ;;  %4191 = vlog2.f32 %v7810_v29  ;;  %v7822_v62 = vld [vmem:[#allocation171_spill] sm:$0xff]  ;;  %v7824_v63 = vld [vmem:[#allocation158_spill] sm:$0xff]  ;;  %v2514_v10 = vpop.xlane.xlu0 %2513 }
 0x433   :  { %v2490_v42 = vpop.xlane.xlu1 %2489  ;;  %v4180_v51 = vpop.eup %4179  ;;  %v3096_v8 = vsel %vm3038_vm13, %v3003_v6, 0.0  ;;  %v1914_v52 = vadd.f32 %v1820_v43, %v7811_v20  ;;  %v3004_v28 = vsel %vm7812_vm3, %v2617_v17, 0.0  ;;  %4193 = vlog2.f32 %v7813_v48  ;;  %v7825_v19 = vld [vmem:[#allocation119_spill] sm:$0xff]  ;;  %v7828_v6 = vld [vmem:[#allocation120_spill] sm:$0xff]  ;;  %v7836_v29 = vld [vmem:[#allocation62_spill] sm:$0xff] }
 0x434   :  { %v3093_v55 = vadd.f32 %v3092_v30, %v3091_v0  ;;  %v2618_v26 = vsub.f32 %v1912_v15, %v2490_v42  ;;  %v1824_v60 = vmul.f32 0.6931472, %v4180_v51  ;;  %vm7815_vm0 = vcmp.ne.s32.totalorder %v7814_v21, 255  ;;  %v7827_v39 = vld [vmem:[#allocation59_spill] sm:$0xff]  ;;  %v7832_v15 = vld [vmem:[#allocation174_spill] sm:$0xff] }
 0x435   :  { %v1915_v49 = vadd.f32 %v1822_v54, %v7816_v1  ;;  %4195 = vlog2.f32 %v7817_v24  ;;  %v3098_v18 = vsel %vm3038_vm13, %v3004_v28, 0.0  ;;  %vm7819_vm2 = vcmp.ne.s32.totalorder %v7818_v22, 255 }
 0x436   :  { %v3095_v25 = vadd.f32 %v3094_v16, %v3093_v55  ;;  %v4182_v27 = vpop.eup %4181  ;;  %v3005_v50 = vsel %vm7815_vm0, %v2618_v26, 0.0  ;;  %v1916_v46 = vadd.f32 %v1824_v60, %v7820_v59  ;;  %4197 = vlog2.f32 %v7821_v23  ;;  %v7829_v16 = vld [vmem:[#allocation173_spill] sm:$0xff]  ;;  %v7835_v26 = vld [vmem:[#allocation124_spill] sm:$0xff] }
 0x437   :  { %v2493_v41 = vpop.xlane.xlu1 %2492  ;;  %v1826_v44 = vmul.f32 0.6931472, %v4182_v27  ;;  %v3100_v42 = vsel %vm3038_vm13, %v3005_v50, 0.0  ;;  %vm7823_vm4 = vcmp.ne.s32.totalorder %v7822_v62, 255  ;;  %4199 = vlog2.f32 %v7824_v63  ;;  %v7843_v23 = vld [vmem:[#allocation165_spill] sm:$0xff] }
 0x438   :  { %v3097_v34 = vadd.f32 %v3096_v8, %v3095_v25  ;;  %v2619_v53 = vsub.f32 %v1913_v33, %v2493_v41  ;;  %vm7826_vm6 = vcmp.ne.s32.totalorder %v7825_v19, 255  ;;  %4201 = vlog2.f32 %v7828_v6  ;;  %v7834_v8 = vld [vmem:[#allocation58_spill] sm:$0xff] }
 0x439   :  { %v1917_v58 = vadd.f32 %v1826_v44, %v7827_v39  ;;  %vm7830_vm11 = vcmp.ne.s32.totalorder %v7829_v16, 255  ;;  %4203 = vlog2.f32 %v7831_v40  ;;  %vm7833_vm12 = vcmp.ne.s32.totalorder %v7832_v15, 255  ;;  %v7851_v6 = vld [vmem:[#allocation170_spill] sm:$0xff]  ;;  %v7852_v16 = vld [vmem:[#allocation71_spill] sm:$0xff]  ;;  %v7855_v15 = vld [vmem:[#allocation121_spill] sm:$0xff] }
 0x43a   :  { %v3099_v37 = vadd.f32 %v3098_v18, %v3097_v34  ;;  %v3006_v38 = vsel %vm7819_vm2, %v2619_v53, 0.0  ;;  %v4184_v12 = vpop.eup %4183  ;;  %4205 = vlog2.f32 %v7835_v26  ;;  %v7837_v34 = vld [vmem:[#allocation162_spill] sm:$0xff]  ;;  %v2520_v53 = vpop.xlane.xlu0 %2519  ;;  %vm7856_vm2 = vcmp.ne.s32.totalorder %v7855_v15, 255 }
 0x43b   :  { %v2496_v31 = vpop.xlane.xlu1 %2495  ;;  %v4186_v5 = vpop.eup %4185  ;;  %v3102_v11 = vsel %vm3038_vm13, %v3006_v38, 0.0  ;;  %v1828_v57 = vmul.f32 0.6931472, %v4184_v12  ;;  %4207 = vlog2.f32 %v7837_v34  ;;  %v7841_v18 = vld [vmem:[#allocation66_spill] sm:$0xff] }
 0x43c   :  { %v2620_v45 = vsub.f32 %v1914_v52, %v2496_v31  ;;  %v3101_v14 = vadd.f32 %v3100_v42, %v3099_v37  ;;  %v4188_v30 = vpop.eup %4187  ;;  %v1832_v41 = vmul.f32 0.6931472, %v4186_v5  ;;  %v7844_v42 = vld [vmem:[#allocation67_spill] sm:$0xff] }
 0x43d   :  { %v1918_v31 = vadd.f32 %v1828_v57, %v7834_v8  ;;  %v1830_v25 = vmul.f32 0.6931472, %v4188_v30 }
 0x43e   :  { %v3007_v35 = vsel %vm7823_vm4, %v2620_v45, 0.0  ;;  %v4190_v0 = vpop.eup %4189  ;;  %v3103_v32 = vadd.f32 %v3102_v11, %v3101_v14  ;;  %v1920_v20 = vadd.f32 %v1832_v41, %v7836_v29  ;;  %v7838_v45 = vld [vmem:[#allocation19_spill] sm:$0xff]  ;;  %v7847_v14 = vld [vmem:[#allocation164_spill] sm:$0xff]  ;;  %v2526_v39 = vpop.xlane.xlu0 %2525  ;;  %v7850_v41 = vld [vmem:[#allocation70_spill] sm:$0xff] }
 0x43f   :  { %v2499_v56 = vpop.xlane.xlu1 %2498  ;;  %v3104_v9 = vsel %vm3038_vm13, %v3007_v35, 0.0  ;;  %v4192_v55 = vpop.eup %4191  ;;  %v1836_v36 = vmul.f32 0.6931472, %v4190_v0  ;;  %vm7839_vm14 = vcmp.ne.s32.totalorder %v7838_v45, 255  ;;  %v7845_v35 = vld [vmem:[#allocation176_spill] sm:$0xff]  ;;  %vm7848_vm3 = vcmp.ne.s32.totalorder %v7847_v14, 255 }
 0x440   :  { %v2621_v47 = vsub.f32 %v1915_v49, %v2499_v56  ;;  %v3105_v2 = vadd.f32 %v3104_v9, %v3103_v32  ;;  %v4194_v28 = vpop.eup %4193  ;;  %v1834_v56 = vmul.f32 0.6931472, %v4192_v55  ;;  %v2626_v21 = vsub.f32 %v1920_v20, %v2514_v10  ;;  %v7840_v49 = vld [vmem:[#allocation63_spill] sm:$0xff]  ;;  %v7858_v29 = vld [vmem:[#allocation133_spill] sm:$0xff] }
 0x441   :  { %v1919_v24 = vadd.f32 %v1830_v25, %v7840_v49  ;;  %v1922_v44 = vadd.f32 %v1836_v36, %v7841_v18  ;;  %v1840_v59 = vmul.f32 0.6931472, %v4194_v28  ;;  %vm7846_vm15 = vcmp.ne.s32.totalorder %v7845_v35, 255  ;;  %v7859_v28 = vld [vmem:[#allocation175_spill] sm:$0xff] }
 0x442   :  { %v3008_v61 = vsel %vm7826_vm6, %v2621_v47, 0.0  ;;  %v4196_v48 = vpop.eup %4195  ;;  %v7842_v47 = vld [vmem:[#allocation128_spill] sm:$0xff]  ;;  %v2532_v26 = vpop.xlane.xlu0 %2531 }
 0x443   :  { %v2502_v4 = vpop.xlane.xlu1 %2501  ;;  %v3106_v17 = vsel %vm3038_vm13, %v3008_v61, 0.0  ;;  %v4198_v38 = vpop.eup %4197  ;;  %4209 = vlog2.f32 %v7842_v47  ;;  %v1838_v5 = vmul.f32 0.6931472, %v4196_v48  ;;  %v2628_v63 = vsub.f32 %v1922_v44, %v2520_v53  ;;  %v7849_v61 = vld [vmem:[#allocation130_spill] sm:$0xff]  ;;  %v7860_v53 = vld [vmem:[#allocation75_spill] sm:$0xff] }
 0x444   :  { %v2622_v7 = vsub.f32 %v1916_v46, %v2502_v4  ;;  %v3107_v52 = vadd.f32 %v3106_v17, %v3105_v2  ;;  %4211 = vlog2.f32 %v7843_v23  ;;  %v1921_v4 = vadd.f32 %v1834_v56, %v7844_v42  ;;  %v4200_v62 = vpop.eup %4199  ;;  %v7853_v17 = vld [vmem:[#allocation40_spill] sm:$0xff]  ;;  %v7865_v47 = vld [vmem:[#allocation78_spill] sm:$0xff] }
 0x445   :  { %4213 = vlog2.f32 %v7849_v61  ;;  %v1924_v10 = vadd.f32 %v1840_v59, %v7850_v41  ;;  %v4202_v0 = vpop.eup %4201  ;;  %vm7854_vm0 = vcmp.ne.s32.totalorder %v7853_v17, 255  ;;  %v7866_v42 = vld [vmem:[#allocation180_spill] sm:$0xff] }
 0x446   :  { %v3009_v43 = vsel %vm7830_vm11, %v2622_v7, 0.0  ;;  %v3013_v7 = vsel %vm7846_vm15, %v2626_v21, 0.0  ;;  %4215 = vlog2.f32 %v7851_v6  ;;  %v4204_v40 = vpop.eup %4203  ;;  %v3015_v55 = vsel %vm7854_vm0, %v2628_v63, 0.0  ;;  %v7861_v21 = vld [vmem:[#allocation179_spill] sm:$0xff]  ;;  %v2538_v18 = vpop.xlane.xlu0 %2537 }
 0x447   :  { %v2505_v13 = vpop.xlane.xlu1 %2504  ;;  %v3108_v33 = vsel %vm3038_vm13, %v3009_v43, 0.0  ;;  %v3116_v32 = vsel %vm3038_vm13, %v3013_v7, 0.0  ;;  %v1923_v43 = vadd.f32 %v1838_v5, %v7852_v16  ;;  %v2630_v2 = vsub.f32 %v1924_v10, %v2526_v39  ;;  %v7867_v5 = vld [vmem:[#allocation79_spill] sm:$0xff]  ;;  %v7874_v16 = vld [vmem:[#allocation184_spill] sm:$0xff] }
 0x448   :  { %v2623_v51 = vsub.f32 %v1917_v58, %v2505_v13  ;;  %v3109_v50 = vadd.f32 %v3108_v33, %v3107_v52  ;;  %v1844_v58 = vmul.f32 0.6931472, %v4198_v38  ;;  %4217 = vlog2.f32 %v7858_v29  ;;  %v7864_v38 = vld [vmem:[#allocation136_spill] sm:$0xff]  ;;  %v7868_v63 = vld [vmem:[#allocation183_spill] sm:$0xff] }
 0x449   :  { %v1848_v20 = vmul.f32 0.6931472, %v4202_v0  ;;  %4219 = vlog2.f32 %v7859_v28  ;;  %v3120_v34 = vsel %vm3038_vm13, %v3015_v55, 0.0  ;;  %v1846_v56 = vmul.f32 0.6931472, %v4204_v40  ;;  %v7880_v29 = vld [vmem:[#allocation143_spill] sm:$0xff] }
 0x44a   :  { %v3010_v3 = vsel %vm7833_vm12, %v2623_v51, 0.0  ;;  %v1842_v51 = vmul.f32 0.6931472, %v4200_v62  ;;  %vm7862_vm4 = vcmp.ne.s32.totalorder %v7861_v21, 255  ;;  %4221 = vlog2.f32 %v7864_v38 }
 0x44b   :  { %v2508_v54 = vpop.xlane.xlu1 %2507  ;;  %v3110_v60 = vsel %vm3038_vm13, %v3010_v3, 0.0  ;;  %v1928_v59 = vadd.f32 %v1848_v20, %v7865_v47  ;;  %4223 = vlog2.f32 %v7866_v42  ;;  %v1927_v62 = vadd.f32 %v1846_v56, %v7867_v5  ;;  %v7881_v20 = vld [vmem:[#allocation86_spill] sm:$0xff]  ;;  %v7883_v56 = vld [vmem:[#allocation87_spill] sm:$0xff]  ;;  %v7890_v5 = vld [vmem:[#allocation188_spill] sm:$0xff] }
 0x44c   :  { %v2624_v27 = vsub.f32 %v1918_v31, %v2508_v54  ;;  %v3111_v46 = vadd.f32 %v3110_v60, %v3109_v50  ;;  %v7857_v31 = vld [vmem:[#allocation74_spill] sm:$0xff]  ;;  %v4206_v54 = vpop.eup %4205  ;;  %v1925_v60 = vadd.f32 %v1842_v51, %v7860_v53  ;;  %v3017_v50 = vsel %vm7862_vm4, %v2630_v2, 0.0  ;;  %v7875_v51 = vld [vmem:[#allocation83_spill] sm:$0xff]  ;;  %v7876_v2 = vld [vmem:[#allocation44_spill] sm:$0xff] }
 0x44d   :  { %v1926_v25 = vadd.f32 %v1844_v58, %v7857_v31  ;;  %v4208_v48 = vpop.eup %4207  ;;  %v1852_v44 = vmul.f32 0.6931472, %v4206_v54  ;;  %v2634_v14 = vsub.f32 %v1928_v59, %v2538_v18  ;;  %v7872_v58 = vld [vmem:[#allocation82_spill] sm:$0xff]  ;;  %vm7877_vm11 = vcmp.ne.s32.totalorder %v7876_v2, 255  ;;  %v7897_v2 = vld [vmem:[#allocation125_spill] sm:$0xff] }
 0x44e   :  { %v3011_v1 = vsel %vm7839_vm14, %v2624_v27, 0.0  ;;  %v1850_v35 = vmul.f32 0.6931472, %v4208_v48  ;;  %v7882_v53 = vld [vmem:[#allocation186_spill] sm:$0xff]  ;;  %vm7898_vm0 = vcmp.ne.s32.totalorder %v7897_v2, 255 }
 0x44f   :  { %v3112_v37 = vsel %vm3038_vm13, %v3011_v1, 0.0  ;;  %v2511_v22 = vpop.xlane.xlu1 %2510  ;;  %v2632_v45 = vsub.f32 %v1926_v25, %v2532_v26  ;;  %v3021_v15 = vsel %vm7877_vm11, %v2634_v14, 0.0  ;;  %v7892_v14 = vld [vmem:[#allocation123_spill] sm:$0xff] }
 0x450   :  { %v2625_v12 = vsub.f32 %v1919_v24, %v2511_v22  ;;  %v3113_v11 = vadd.f32 %v3112_v37, %v3111_v46  ;;  %v4210_v23 = vpop.eup %4209  ;;  %v1929_v40 = vadd.f32 %v1850_v35, %v7875_v51  ;;  %v7891_v35 = vld [vmem:[#allocation91_spill] sm:$0xff] }
 0x451   :  { %v4212_v7 = vpop.eup %4211  ;;  %v1856_v0 = vmul.f32 0.6931472, %v4210_v23  ;;  %v7896_v51 = vld [vmem:[#allocation95_spill] sm:$0xff] }
 0x452   :  { %v3012_v19 = vsel %vm7848_vm3, %v2625_v12, 0.0  ;;  %v1854_v17 = vmul.f32 0.6931472, %v4212_v7  ;;  %vm7893_vm3 = vcmp.ne.s32.totalorder %v7892_v14, 255 }
 0x453   :  { %v3114_v57 = vsel %vm3038_vm13, %v3012_v19, 0.0  ;;  %v2517_v30 = vpop.xlane.xlu1 %2516  ;;  %v7870_v19 = vld [vmem:[#allocation181_spill] sm:$0xff] }
 0x454   :  { %v3115_v9 = vadd.f32 %v3114_v57, %v3113_v11  ;;  %v2627_v13 = vsub.f32 %v1921_v4, %v2517_v30  ;;  %v3124_v4 = vsel %vm3038_vm13, %v3017_v50, 0.0  ;;  %vm7871_vm6 = vcmp.ne.s32.totalorder %v7870_v19, 255  ;;  %v2544_v30 = vpop.xlane.xlu0 %2543 }
 0x455   :  { %v1930_v57 = vadd.f32 %v1852_v44, %v7872_v58  ;;  %v1931_v48 = vadd.f32 %v1854_v17, %v7883_v56 }
 0x456   :  { %v3014_v3 = vsel %vm7856_vm2, %v2627_v13, 0.0  ;;  %v3117_v8 = vadd.f32 %v3116_v32, %v3115_v9  ;;  %v4214_v9 = vpop.eup %4213  ;;  %v7873_v13 = vld [vmem:[#allocation140_spill] sm:$0xff] }
 0x457   :  { %v3118_v36 = vsel %vm3038_vm13, %v3014_v3, 0.0  ;;  %v2523_v33 = vpop.xlane.xlu1 %2522  ;;  %4225 = vlog2.f32 %v7873_v13  ;;  %v4216_v55 = vpop.eup %4215  ;;  %v2636_v3 = vsub.f32 %v1930_v57, %v2544_v30 }
 0x458   :  { %v3119_v52 = vadd.f32 %v3118_v36, %v3117_v8  ;;  %v2629_v27 = vsub.f32 %v1923_v43, %v2523_v33  ;;  %4227 = vlog2.f32 %v7874_v16  ;;  %v7878_v8 = vld [vmem:[#allocation21_spill] sm:$0xff]  ;;  %v2550_v26 = vpop.xlane.xlu0 %2549  ;;  %v1860_v36 = vmul.f32 0.6931472, %v4214_v9  ;;  %v7895_v9 = vld [vmem:[#allocation94_spill] sm:$0xff] }
 0x459   :  { %vm7879_vm12 = vcmp.ne.s32.totalorder %v7878_v8, 255  ;;  %4229 = vlog2.f32 %v7880_v29  ;;  %v1858_v21 = vmul.f32 0.6931472, %v4216_v55  ;;  %v7899_v8 = vld [vmem:[#allocation23_spill] sm:$0xff] }
 0x45a   :  { %v3016_v49 = vsel %vm2824_vm10, %v2629_v27, 0.0  ;;  %v3121_v24 = vadd.f32 %v3120_v34, %v3119_v52  ;;  %vm7869_vm10 = vcmp.ne.s32.totalorder %v7868_v63, 255  ;;  %v1932_v52 = vadd.f32 %v1856_v0, %v7881_v20  ;;  %v4218_v34 = vpop.eup %4217 }
 0x45b   :  { %v3122_v37 = vsel %vm3038_vm13, %v3016_v49, 0.0  ;;  %v2529_v22 = vpop.xlane.xlu1 %2528  ;;  %v3019_v11 = vsel %vm7869_vm10, %v2632_v45, 0.0  ;;  %4231 = vlog2.f32 %v7882_v53  ;;  %v4220_v50 = vpop.eup %4219  ;;  %v7884_v45 = vld [vmem:[#allocation10_spill] sm:$0xff]  ;;  %v1933_v7 = vadd.f32 %v1858_v21, %v7891_v35  ;;  %v7903_v21 = vld [vmem:[#allocation13_spill] sm:$0xff]  ;;  %v7908_v35 = vld [vmem:[#allocation12_spill] sm:$0xff] }
 0x45c   :  { %v3123_v46 = vadd.f32 %v3122_v37, %v3121_v24  ;;  %v2631_v12 = vsub.f32 %v1925_v60, %v2529_v22  ;;  %v3128_v43 = vsel %vm3038_vm13, %v3019_v11, 0.0  ;;  %v3132_v60 = vsel %vm3038_vm13, %v3021_v15, 0.0  ;;  %v7886_v24 = vld [vmem:[#allocation166_spill] sm:$0xff]  ;;  %v2556_v38 = vpop.xlane.xlu0 %2555 }
 0x45d   :  { %vm7885_vm14 = vcmp.ne.s32.totalorder %v7884_v45, 255  ;;  %v2638_v49 = vsub.f32 %v1932_v52, %v2550_v26  ;;  %vm7887_vm15 = vcmp.ne.s32.totalorder %v7886_v24, 255  ;;  %v7888_v37 = vld [vmem:[#allocation90_spill] sm:$0xff]  ;;  %v1862_v63 = vmul.f32 0.6931472, %v4220_v50 }
 0x45e   :  { %v3018_v61 = vsel %vm7871_vm6, %v2631_v12, 0.0  ;;  %v3125_v39 = vadd.f32 %v3124_v4, %v3123_v46  ;;  %v3023_v1 = vsel %vm7885_vm14, %v2636_v3, 0.0  ;;  %v1934_v22 = vadd.f32 %v1860_v36, %v7888_v37  ;;  %v7889_v46 = vld [vmem:[#allocation146_spill] sm:$0xff]  ;;  %v4222_v4 = vpop.eup %4221 }
 0x45f   :  { %v3126_v41 = vsel %vm3038_vm13, %v3018_v61, 0.0  ;;  %v2535_v10 = vpop.xlane.xlu1 %2534  ;;  %4233 = vlog2.f32 %v7889_v46  ;;  %v1864_v12 = vmul.f32 0.6931472, %v4218_v34  ;;  %v4224_v11 = vpop.eup %4223  ;;  %v3025_v19 = vsel %vm7893_vm3, %v2638_v49, 0.0  ;;  %v7902_v53 = vld [vmem:[#allocation98_spill] sm:$0xff] }
 0x460   :  { %v3127_v6 = vadd.f32 %v3126_v41, %v3125_v39  ;;  %v2633_v32 = vsub.f32 %v1927_v62, %v2535_v10  ;;  %4235 = vlog2.f32 %v7890_v5  ;;  %v3136_v62 = vsel %vm3038_vm13, %v3023_v1, 0.0  ;;  %v2562_v30 = vpop.xlane.xlu0 %2561 }
 0x461   :  { %v2640_v61 = vsub.f32 %v1934_v22, %v2556_v38  ;;  %v1936_v13 = vadd.f32 %v1864_v12, %v7895_v9  ;;  %v1868_v0 = vmul.f32 0.6931472, %v4222_v4  ;;  %v1866_v17 = vmul.f32 0.6931472, %v4224_v11  ;;  %v7906_v22 = vld [vmem:[#allocation101_spill] sm:$0xff]  ;;  %v7910_v11 = vld [vmem:[#allocation26_spill] sm:$0xff] }
 0x462   :  { %v3020_v31 = vsel %vm7879_vm12, %v2633_v32, 0.0  ;;  %v3129_v25 = vadd.f32 %v3128_v43, %v3127_v6  ;;  %v3140_v43 = vsel %vm3038_vm13, %v3025_v19, 0.0  ;;  %vm7904_vm2 = vcmp.ne.s32.totalorder %v7903_v21, 255 }
 0x463   :  { %v3130_v33 = vsel %vm3038_vm13, %v3020_v31, 0.0  ;;  %v2541_v54 = vpop.xlane.xlu1 %2540  ;;  %v3027_v15 = vsel %vm7898_vm0, %v2640_v61, 0.0  ;;  %v2642_v3 = vsub.f32 %v1936_v13, %v2562_v30  ;;  %vm7909_vm4 = vcmp.ne.s32.totalorder %v7908_v35, 255 }
 0x464   :  { %v3131_v27 = vadd.f32 %v3130_v33, %v3129_v25  ;;  %v2635_v28 = vsub.f32 %v1929_v40, %v2541_v54  ;;  %v4226_v16 = vpop.eup %4225  ;;  %v1935_v40 = vadd.f32 %v1862_v63, %v7896_v51  ;;  %v2568_v26 = vpop.xlane.xlu0 %2567  ;;  %v7901_v54 = vld [vmem:[#allocation25_spill] sm:$0xff]  ;;  %v3144_v34 = vsel %vm3038_vm13, %v3027_v15, 0.0 }
 0x465   :  { %v4228_v55 = vpop.eup %4227  ;;  %v1938_v29 = vadd.f32 %v1868_v0, %v7901_v54  ;;  %v1872_v20 = vmul.f32 0.6931472, %v4226_v16  ;;  %v3029_v50 = vsel %vm7904_vm2, %v2642_v3, 0.0  ;;  %v7913_v0 = vld [vmem:[#allocation103_spill] sm:$0xff] }
 0x466   :  { %v3022_v18 = vsel %vm7887_vm15, %v2635_v28, 0.0  ;;  %v3133_v44 = vadd.f32 %v3132_v60, %v3131_v27  ;;  %v4230_v28 = vpop.eup %4229  ;;  %v1937_v60 = vadd.f32 %v1866_v17, %v7902_v53  ;;  %v1870_v56 = vmul.f32 0.6931472, %v4228_v55 }
 0x467   :  { %v3134_v47 = vsel %vm3038_vm13, %v3022_v18, 0.0  ;;  %v2547_v59 = vpop.xlane.xlu1 %2546  ;;  %v2644_v45 = vsub.f32 %v1938_v29, %v2568_v26  ;;  %v1940_v38 = vadd.f32 %v1872_v20, %v7906_v22  ;;  %v7919_v29 = vld [vmem:[#allocation29_spill] sm:$0xff] }
 0x468   :  { %v3135_v23 = vadd.f32 %v3134_v47, %v3133_v44  ;;  %v2637_v42 = vsub.f32 %v1931_v48, %v2547_v59  ;;  %v4232_v48 = vpop.eup %4231  ;;  %v2574_v18 = vpop.xlane.xlu0 %2573  ;;  %v1876_v47 = vmul.f32 0.6931472, %v4230_v28  ;;  %vm7920_vm6 = vcmp.ne.s32.totalorder %v7919_v29, 255 }
 0x469   :  { %v1874_v5 = vmul.f32 0.6931472, %v4232_v48  ;;  %v2646_v63 = vsub.f32 %v1940_v38, %v2574_v18 }
 0x46a   :  { %v3024_v58 = vsel %vm2832_vm9, %v2637_v42, 0.0  ;;  %v3137_v57 = vadd.f32 %v3136_v62, %v3135_v23  ;;  %vm7900_vm9 = vcmp.ne.s32.totalorder %v7899_v8, 255  ;;  %v3148_v23 = vsel %vm3038_vm13, %v3029_v50, 0.0  ;;  %v7907_v42 = vld [vmem:[#allocation100_spill] sm:$0xff] }
 0x46b   :  { %v3138_v41 = vsel %vm3038_vm13, %v3024_v58, 0.0  ;;  %v2553_v10 = vpop.xlane.xlu1 %2552  ;;  %v1939_v4 = vadd.f32 %v1870_v56, %v7907_v42  ;;  %v7917_v8 = vld [vmem:[#allocation104_spill] sm:$0xff] }
 0x46c   :  { %v3139_v6 = vadd.f32 %v3138_v41, %v3137_v57  ;;  %v2639_v32 = vsub.f32 %v1933_v7, %v2553_v10  ;;  %v4234_v12 = vpop.eup %4233  ;;  %v3031_v7 = vsel %vm7909_vm4, %v2644_v45, 0.0  ;;  %v2580_v61 = vpop.xlane.xlu0 %2579  ;;  %v7912_v57 = vld [vmem:[#allocation34_spill] sm:$0xff] }
 0x46d   :  { %v4236_v62 = vpop.eup %4235  ;;  %v1942_v30 = vadd.f32 %v1876_v47, %v7912_v57  ;;  %v1880_v10 = vmul.f32 0.6931472, %v4234_v12  ;;  %v3152_v13 = vsel %vm3038_vm13, %v3031_v7, 0.0 }
 0x46e   :  { %v3026_v31 = vsel %vm7900_vm9, %v2639_v32, 0.0  ;;  %v3141_v25 = vadd.f32 %v3140_v43, %v3139_v6  ;;  %v1941_v6 = vadd.f32 %v1874_v5, %v7913_v0  ;;  %v1878_v32 = vmul.f32 0.6931472, %v4236_v62 }
 0x46f   :  { %v3142_v36 = vsel %vm3038_vm13, %v3026_v31, 0.0  ;;  %v2559_v33 = vpop.xlane.xlu1 %2558  ;;  %v3033_v43 = vsel %vm2841_vm7, %v2646_v63, 0.0  ;;  %v2648_v51 = vsub.f32 %v1942_v30, %v2580_v61  ;;  %v1944_v31 = vadd.f32 %v1880_v10, %v7917_v8 }
 0x470   :  { %v3143_v52 = vadd.f32 %v3142_v36, %v3141_v25  ;;  %v2641_v27 = vsub.f32 %v1935_v40, %v2559_v33  ;;  %v7915_v40 = vld [vmem:[#allocation14_spill] sm:$0xff]  ;;  %v3156_v36 = vsel %vm3038_vm13, %v3033_v43, 0.0  ;;  %v7918_v33 = vld [vmem:[#allocation45_spill] sm:$0xff] }
 0x471   :  { %vm7916_vm10 = vcmp.ne.s32.totalorder %v7915_v40, 255  ;;  %v1943_v54 = vadd.f32 %v1878_v32, %v7918_v33  ;;  %v3035_v20 = vsel %vm7920_vm6, %v2648_v51, 0.0 }
 0x472   :  { %v3028_v49 = vsel %vm2836_vm5, %v2641_v27, 0.0  ;;  %v3145_v24 = vadd.f32 %v3144_v34, %v3143_v52  ;;  %vm7911_vm5 = vcmp.ne.s32.totalorder %v7910_v11, 255  ;;  %v7921_v27 = vld [vmem:[#allocation16_spill] sm:$0xff]  ;;  %v3160_v21 = vsel %vm3038_vm13, %v3035_v20, 0.0 }
 0x473   :  { %v3146_v44 = vsel %vm3038_vm13, %v3028_v49, 0.0  ;;  %v2565_v37 = vpop.xlane.xlu1 %2564  ;;  %v2586_v2 = vpop.xlane.xlu0 %2585  ;;  %vm7922_vm7 = vcmp.ne.s32.totalorder %v7921_v27, 255 }
 0x474   :  { %v3147_v59 = vadd.f32 %v3146_v44, %v3145_v24  ;;  %v2643_v46 = vsub.f32 %v1937_v60, %v2565_v37  ;;  %v2650_v52 = vsub.f32 %v1944_v31, %v2586_v2 }
 0x476   :  { %v3030_v14 = vsel %vm7911_vm5, %v2643_v46, 0.0  ;;  %v3149_v19 = vadd.f32 %v3148_v23, %v3147_v59  ;;  %v3037_v45 = vsel %vm2845_vm8, %v2650_v52, 0.0 }
 0x477   :  { %v3150_v39 = vsel %vm3038_vm13, %v3030_v14, 0.0  ;;  %v2571_v58 = vpop.xlane.xlu1 %2570  ;;  %v3164_v37 = vsel %vm3038_vm13, %v3037_v45, 0.0 }
 0x478   :  { %v3151_v41 = vadd.f32 %v3150_v39, %v3149_v19  ;;  %v2645_v9 = vsub.f32 %v1939_v4, %v2571_v58 }
 0x47a   :  { %v3032_v17 = vsel %vm7916_vm10, %v2645_v9, 0.0  ;;  %v3153_v55 = vadd.f32 %v3152_v13, %v3151_v41 }
 0x47b   :  { %v3154_v15 = vsel %vm3038_vm13, %v3032_v17, 0.0  ;;  %v2577_v3 = vpop.xlane.xlu1 %2576 }
 0x47c   :  { %v3155_v25 = vadd.f32 %v3154_v15, %v3153_v55  ;;  %v2647_v26 = vsub.f32 %v1941_v6, %v2577_v3 }
 0x47e   :  { %v3034_v28 = vsel %vm7922_vm7, %v2647_v26, 0.0  ;;  %v3157_v34 = vadd.f32 %v3156_v36, %v3155_v25 }
 0x47f   :  { %v3158_v53 = vsel %vm3038_vm13, %v3034_v28, 0.0  ;;  %v2583_v60 = vpop.xlane.xlu1 %2582 }
 0x480   :  { %v3159_v56 = vadd.f32 %v3158_v53, %v3157_v34  ;;  %v2649_v48 = vsub.f32 %v1943_v54, %v2583_v60 }
 0x482   :  { %v3036_v49 = vsel %vm2844_vm1, %v2649_v48, 0.0  ;;  %v3161_v24 = vadd.f32 %v3160_v21, %v3159_v56 }
 0x483   :  { %v3162_v18 = vsel %vm3038_vm13, %v3036_v49, 0.0 }
 0x484   :  { %v3163_v44 = vadd.f32 %v3162_v18, %v3161_v24 }
 0x486   :  { %v3165_v22 = vadd.f32 %v3164_v37, %v3163_v44 }
 0x488   :  { %3166 = vadd.xlane.f32.xlu1 %v3165_v22 }
 0x48c   :  { %v3431_v38 = vpop.xlane.xlu0 %3430 }
 0x48d   :  { %v3432_v47 = vrot.slane %v3431_v38, 4 }
 0x48f   :  { %v3433_v59 = vadd.f32 %v3432_v47, %v3431_v38 }
 0x491   :  { %v3434_v46 = vrot.slane %v3433_v59, 2 }
 0x493   :  { %v3435_v4 = vadd.f32 %v3434_v46, %v3433_v59 }
 0x495   :  { %v3436_v35 = vrot.slane %v3435_v4, 1 }
 0x497   :  { %v3437_v11 = vadd.f32 %v3436_v35, %v3435_v4 }
 0x511   :  { %v3167_v12 = vpop.xlane.xlu1 %3166 }
 0x512   :  { %v3168_v23 = vrot.slane %v3167_v12, 4 }
 0x514   :  { %v3169_v42 = vadd.f32 %v3168_v23, %v3167_v12 }
 0x516   :  { %v3170_v5 = vrot.slane %v3169_v42, 2 }
 0x518   :  { %v3171_v62 = vadd.f32 %v3170_v5, %v3169_v42 }
 0x51a   :  { %v3172_v7 = vrot.slane %v3171_v62, 1 }
 0x51c   :  { %v3173_v63 = vadd.f32 %v3172_v7, %v3171_v62 }
 0x51e   :  { %3843 = vpush %v3173_v63 }
 0x51f   :  { %3845 = vpush %v3437_v11 }
 0x54f   :  { %s3844_s10 = spop %3843 }
 0x550   :  { %v3439_v14 = vstv %s3844_s10  ;;  %s3846_s11 = spop %3845 }
 0x551   :  { %3440 = vst [vmem:[#allocation2] sm:$0xff] %v3439_v14  ;;  %v3441_v19 = vstv %s3846_s11 }
 0x552   :  { %3442 = vst [vmem:[#allocation4] sm:$0xff] %v3441_v19 }
 0x553   :  { %4277 = shalt.err (!%p4274_p4)
}
 0x554   :  { %3452 = dma.vmem_to_hbm [thread:$0]  %s3450_s7, 128, %s7157_s3, [#allocation3]  }
 0x555   :  { %s4286_s14 = scalar_lea.vmem %s3460_s9, 128  ;;  %p4291_p6 = scmp.lt.s32.totalorder %s3460_s9, %s3460_s9 }
 0x556   :  { %p4287_p5 = scmp.ne.s32.totalorder %s3460_s9, %s4286_s14  ;;  %p4292_p7 = scmp.lt.s32.totalorder %s4286_s14, %s4286_s14 }
 0x558   :  { %p4293_p8 = por %p4292_p7, %p4291_p6 }
 0x55a   :  { %p4294_p9 = pnand %p4293_p8, %p4287_p5 }
 0x55c   :  { %4297 = shalt.err (!%p4294_p9)
}
 0x55d   :  { %3462 = dma.vmem_to_hbm [thread:$0]  %s3460_s9, 128, %s7158_s4, [#allocation5]  }
 0x55e   :  { %4306 = dma.done.wait [#allocation3], 128  }
 0x55f   :  { %4307 = vsyncadd [#allocation3], 4294967168 }
 0x560   :  { %4308 = dma.done.wait [#allocation5], 128  }
 0x561   :  { %4309 = vsyncadd [#allocation5], 4294967168 }
 0x562   :  { %3469 = vsyncpa [#allocation3], 1 }
 0x563   :  { %3470 = vsyncpa [#allocation5], 1 }

</bundles_post_ra>
